<compile_context>
chip_gen: v7x
topology: tpu7x:2x2x1
jax: 0.10.0
libtpu: 0.0.40
codegen_flags: <defaults>
</compile_context>

<pallas_src>
import jax
import jax.numpy as jnp
import numpy as np
from jax.experimental import pallas as pl
from jax.experimental.pallas import tpu as pltpu

H = W = 28            # spatial size implied by dense1 = 32 * 14 * 14
C_OUT = 32
PH = PW = 14          # after 2x2 maxpool
NPIX = PH * PW        # 196 pooled pixels per image
FEAT = C_OUT * NPIX   # 6272
HID = 128
NCLS = 10
NTAP = 9              # 3x3 conv taps
NQ = 4                # 2x2 pooling quadrants


def conv_relu_pool_kernel(p_ref, w_ref, b_ref, o_ref):
    """3x3 conv (pad 1) + bias + ReLU + 2x2 maxpool, on the MXU.

    p_ref: (TB*196, 36)  im2col patches; column = quadrant*9 + tap.
    w_ref: (36, 128)     block-diagonal conv weights; column = quadrant*32 + ch.
    b_ref: (1, 32)       conv bias.
    o_ref: (TB*196, 32)  pooled activations; row = b*196 + h*14 + w.
    """
    conv = jnp.dot(p_ref[...], w_ref[...], preferred_element_type=jnp.float32)
    # 2x2 maxpool = max over the 4 quadrant lane-groups of the 128-wide result.
    m01 = jnp.maximum(conv[:, 0:C_OUT], conv[:, C_OUT:2 * C_OUT])
    m23 = jnp.maximum(conv[:, 2 * C_OUT:3 * C_OUT], conv[:, 3 * C_OUT:4 * C_OUT])
    pooled = jnp.maximum(m01, m23)
    # per-channel bias + monotone ReLU commute with the quadrant max.
    o_ref[...] = jnp.maximum(pooled + b_ref[...], 0.0)


def mlp_logsoftmax_kernel(x_ref, w1_ref, b1_ref, w2_ref, b2_ref, o_ref):
    """(TB, 6272) -> dense(128) -> dense(10) -> log_softmax(axis=-1)."""
    h = jnp.dot(x_ref[...], w1_ref[...],
                preferred_element_type=jnp.float32) + b1_ref[...]
    logits = jnp.dot(h, w2_ref[...],
                     preferred_element_type=jnp.float32) + b2_ref[...]
    m = jnp.max(logits, axis=-1, keepdims=True)
    z = logits - m
    lse = jnp.log(jnp.sum(jnp.exp(z), axis=-1, keepdims=True))
    o_ref[...] = z - lse


def _batch_tile(batch, cap):
    """Largest batch tile <= cap that divides batch and keeps blocks 8-aligned.

    Falls back to the full batch (block == full array, which is always a legal
    block shape) when no aligned divisor exists.
    """
    if batch <= cap:
        return batch
    for t in range(cap, 0, -1):
        if batch % t == 0 and t % 8 == 0:
            return t
    return batch


def cnn2_forward(x, params):
    """x: (B, 1, 28, 28) float32, NCHW (same as the PyTorch module)."""
    conv_w, conv_b, w1, b1, w2, b2 = params   # PyTorch-shaped parameters
    B = x.shape[0]

    # ---- glue (trace-time layout plumbing): im2col with pooling quadrants ----
    xpad = jnp.pad(x[:, 0], ((0, 0), (1, 1), (1, 1)))                 # (B, 30, 30)
    cols = []
    for pi in range(2):
        for pj in range(2):
            for dh in range(3):
                for dw in range(3):
                    cols.append(
                        xpad[:, pi + dh:pi + dh + 2 * PH:2,
                                pj + dw:pj + dw + 2 * PW:2].reshape(B, NPIX))
    patches = jnp.stack(cols, axis=-1).reshape(B * NPIX, NQ * NTAP)   # (B*196, 36)

    # block-diagonal conv weight: column q*32+c computes quadrant q, channel c.
    w9t = conv_w.reshape(C_OUT, NTAP).T                               # (9, 32)
    wblk = jnp.kron(jnp.eye(NQ, dtype=jnp.float32), w9t)              # (36, 128)

    tb1 = _batch_tile(B, 32)
    pooled = pl.pallas_call(
        conv_relu_pool_kernel,
        out_shape=jax.ShapeDtypeStruct((B * NPIX, C_OUT), jnp.float32),
        grid=(B // tb1,),
        in_specs=[
            pl.BlockSpec((tb1 * NPIX, NQ * NTAP), lambda i: (i, 0)),
            pl.BlockSpec((NQ * NTAP, NQ * C_OUT), lambda i: (0, 0)),   # resident
            pl.BlockSpec((1, C_OUT), lambda i: (0, 0)),                # resident
        ],
        out_specs=pl.BlockSpec((tb1 * NPIX, C_OUT), lambda i: (i, 0)),
        compiler_params=pltpu.CompilerParams(
            dimension_semantics=("parallel",),
            vmem_limit_bytes=32 * 1024 * 1024),
    )(patches, wblk, conv_b.reshape(1, C_OUT))

    # Contiguous reshape only (no transpose): feature order is (h, w, c).
    feats = pooled.reshape(B, FEAT)
    # Permute w1's input axis once (free at trace time) to the same (h, w, c) order.
    w1p = jnp.transpose(w1.reshape(HID, C_OUT, PH, PW),
                        (2, 3, 1, 0)).reshape(FEAT, HID)               # (6272, 128)

    tb2 = _batch_tile(B, 128)
    out = pl.pallas_call(
        mlp_logsoftmax_kernel,
        out_shape=jax.ShapeDtypeStruct((B, NCLS), jnp.float32),
        grid=(B // tb2,),
        in_specs=[
            pl.BlockSpec((tb2, FEAT), lambda i: (i, 0)),
            pl.BlockSpec((FEAT, HID), lambda i: (0, 0)),   # w1 resident across tiles
            pl.BlockSpec((1, HID), lambda i: (0, 0)),
            pl.BlockSpec((HID, NCLS), lambda i: (0, 0)),
            pl.BlockSpec((1, NCLS), lambda i: (0, 0)),
        ],
        out_specs=pl.BlockSpec((tb2, NCLS), lambda i: (i, 0)),
        compiler_params=pltpu.CompilerParams(
            dimension_semantics=("parallel",),
            vmem_limit_bytes=32 * 1024 * 1024),
    )(feats, w1p, b1.reshape(1, HID), w2.T, b2.reshape(1, NCLS))
    return out


def reference(x, conv_w, conv_b, w1, b1, w2, b2):
    B = x.shape[0]
    y = jax.lax.conv_general_dilated(
        x, conv_w, window_strides=(1, 1), padding=((1, 1), (1, 1)),
        dimension_numbers=("NCHW", "OIHW", "NCHW"))
    y = jax.nn.relu(y + conv_b[None, :, None, None])
    y = y.reshape(B, C_OUT, PH, 2, PW, 2).max(axis=(3, 5))
    f = y.reshape(B, -1)
    h = f @ w1.T + b1
    logits = h @ w2.T + b2
    return jax.nn.log_softmax(logits, axis=-1)


if __name__ == "__main__":
    key = jax.random.PRNGKey(0)
    kx, k1, k2, k3, k4, k5, k6 = jax.random.split(key, 7)
    B = 2

    x = jax.random.normal(kx, (B, 1, H, W), jnp.float32)
    # Deterministic synthetic parameters (PyTorch layouts: OIHW / (out, in)).
    conv_w = jax.random.normal(k1, (C_OUT, 1, 3, 3), jnp.float32) * 0.1
    conv_b = jax.random.normal(k2, (C_OUT,), jnp.float32) * 0.1
    w1 = jax.random.normal(k3, (HID, FEAT), jnp.float32) * 0.01
    b1 = jax.random.normal(k4, (HID,), jnp.float32) * 0.01
    w2 = jax.random.normal(k5, (NCLS, HID), jnp.float32) * 0.1
    b2 = jax.random.normal(k6, (NCLS,), jnp.float32) * 0.1
    params = (conv_w, conv_b, w1, b1, w2, b2)

    out = jax.jit(cnn2_forward)(x, params)
    out = jax.block_until_ready(out)

    ref = reference(x, *params)
    assert out.shape == (B, NCLS)
    assert np.allclose(np.asarray(out), np.asarray(ref), atol=1e-3, rtol=1e-3)
    print("KERNEL_OK")
</pallas_src>

<mosaic_0001>
module attributes {stable_mosaic.version = 11 : i64} {
  func.func @conv_relu_pool_kernel(%arg0: i32, %arg1: memref<392x36xf32, #tpu.memory_space<vmem>>, %arg2: memref<36x128xf32, #tpu.memory_space<vmem>>, %arg3: memref<1x32xf32, #tpu.memory_space<vmem>>, %arg4: memref<392x32xf32, #tpu.memory_space<vmem>>) attributes {dimension_semantics = [#tpu.dimension_semantics<parallel>], iteration_bounds = array<i64: 1>, scalar_prefetch = 0 : i64, scratch_operands = 0 : i64, tpu.core_type = #tpu.core_type<tc>, window_params = [{transform_indices = @transform_0, window_bounds = array<i64: 392, 36>}, {pipeline_mode = #tpu.pipeline_mode<synchronous>, transform_indices = @transform_1, window_bounds = array<i64: 36, 128>}, {pipeline_mode = #tpu.pipeline_mode<synchronous>, transform_indices = @transform_2, window_bounds = array<i64: 1, 32>}, {transform_indices = @transform_3, window_bounds = array<i64: 392, 32>}]} {
    %c0 = arith.constant 0 : index
    %c0_0 = arith.constant 0 : index
    %0 = vector.load %arg1[%c0, %c0_0] : memref<392x36xf32, #tpu.memory_space<vmem>>, vector<392x36xf32>
    %c0_1 = arith.constant 0 : index
    %c0_2 = arith.constant 0 : index
    %1 = vector.load %arg2[%c0_1, %c0_2] : memref<36x128xf32, #tpu.memory_space<vmem>>, vector<36x128xf32>
    %cst = arith.constant dense<0.000000e+00> : vector<392x128xf32>
    %2 = tpu.matmul %0, %1, %cst {dimension_numbers = #tpu.dot_dimension_numbers<[1], [0], [0], [1], [0, 0, 1, 1], [], []>} : vector<392x36xf32>, vector<36x128xf32>, vector<392x128xf32> -> vector<392x128xf32>
    %3 = vector.extract_strided_slice %2 {offsets = [0, 0], sizes = [392, 32], strides = [1, 1]} : vector<392x128xf32> to vector<392x32xf32>
    %4 = vector.extract_strided_slice %2 {offsets = [0, 32], sizes = [392, 32], strides = [1, 1]} : vector<392x128xf32> to vector<392x32xf32>
    %5 = arith.maximumf %3, %4 : vector<392x32xf32>
    %6 = vector.extract_strided_slice %2 {offsets = [0, 64], sizes = [392, 32], strides = [1, 1]} : vector<392x128xf32> to vector<392x32xf32>
    %7 = vector.extract_strided_slice %2 {offsets = [0, 96], sizes = [392, 32], strides = [1, 1]} : vector<392x128xf32> to vector<392x32xf32>
    %8 = arith.maximumf %6, %7 : vector<392x32xf32>
    %9 = arith.maximumf %5, %8 : vector<392x32xf32>
    %c0_3 = arith.constant 0 : index
    %c0_4 = arith.constant 0 : index
    %10 = vector.load %arg3[%c0_3, %c0_4] : memref<1x32xf32, #tpu.memory_space<vmem>>, vector<1x32xf32>
    %11 = vector.broadcast %10 : vector<1x32xf32> to vector<392x32xf32>
    %12 = arith.addf %9, %11 : vector<392x32xf32>
    %cst_5 = arith.constant 0.000000e+00 : f32
    %13 = vector.broadcast %cst_5 : f32 to vector<392x32xf32>
    %14 = arith.maximumf %12, %13 : vector<392x32xf32>
    %c0_6 = arith.constant 0 : index
    %c0_7 = arith.constant 0 : index
    %15 = vector.load %arg4[%c0_6, %c0_7] : memref<392x32xf32, #tpu.memory_space<vmem>>, vector<392x32xf32>
    tpu.vector_store %arg4[%c0_6, %c0_7], %14 {strides = array<i32>} : memref<392x32xf32, #tpu.memory_space<vmem>>, vector<392x32xf32>,
    return
  }
  func.func @transform_0(%arg0: i32) -> (i32, i32) {
    %c0_i32 = arith.constant 0 : i32
    %c0_i32_0 = arith.constant 0 : i32
    return %arg0, %c0_i32 : i32, i32
  }
  func.func @transform_1(%arg0: i32) -> (i32, i32) {
    %c0_i32 = arith.constant 0 : i32
    %c0_i32_0 = arith.constant 0 : i32
    %c0_i32_1 = arith.constant 0 : i32
    return %c0_i32, %c0_i32_0 : i32, i32
  }
  func.func @transform_2(%arg0: i32) -> (i32, i32) {
    %c0_i32 = arith.constant 0 : i32
    %c0_i32_0 = arith.constant 0 : i32
    %c0_i32_1 = arith.constant 0 : i32
    return %c0_i32, %c0_i32_0 : i32, i32
  }
  func.func @transform_3(%arg0: i32) -> (i32, i32) {
    %c0_i32 = arith.constant 0 : i32
    %c0_i32_0 = arith.constant 0 : i32
    return %arg0, %c0_i32 : i32, i32
  }
}

module attributes {stable_mosaic.version = 11 : i64} {
  func.func @mlp_logsoftmax_kernel(%arg0: i32, %arg1: memref<2x6272xf32, #tpu.memory_space<vmem>>, %arg2: memref<6272x128xf32, #tpu.memory_space<vmem>>, %arg3: memref<1x128xf32, #tpu.memory_space<vmem>>, %arg4: memref<128x10xf32, #tpu.memory_space<vmem>>, %arg5: memref<1x10xf32, #tpu.memory_space<vmem>>, %arg6: memref<2x10xf32, #tpu.memory_space<vmem>>) attributes {dimension_semantics = [#tpu.dimension_semantics<parallel>], iteration_bounds = array<i64: 1>, scalar_prefetch = 0 : i64, scratch_operands = 0 : i64, tpu.core_type = #tpu.core_type<tc>, window_params = [{transform_indices = @transform_0, window_bounds = array<i64: 2, 6272>}, {pipeline_mode = #tpu.pipeline_mode<synchronous>, transform_indices = @transform_1, window_bounds = array<i64: 6272, 128>}, {pipeline_mode = #tpu.pipeline_mode<synchronous>, transform_indices = @transform_2, window_bounds = array<i64: 1, 128>}, {pipeline_mode = #tpu.pipeline_mode<synchronous>, transform_indices = @transform_3, window_bounds = array<i64: 128, 10>}, {pipeline_mode = #tpu.pipeline_mode<synchronous>, transform_indices = @transform_4, window_bounds = array<i64: 1, 10>}, {transform_indices = @transform_5, window_bounds = array<i64: 2, 10>}]} {
    %c0 = arith.constant 0 : index
    %c0_0 = arith.constant 0 : index
    %0 = vector.load %arg1[%c0, %c0_0] : memref<2x6272xf32, #tpu.memory_space<vmem>>, vector<2x6272xf32>
    %c0_1 = arith.constant 0 : index
    %c0_2 = arith.constant 0 : index
    %1 = vector.load %arg2[%c0_1, %c0_2] : memref<6272x128xf32, #tpu.memory_space<vmem>>, vector<6272x128xf32>
    %cst = arith.constant dense<0.000000e+00> : vector<2x128xf32>
    %2 = tpu.matmul %0, %1, %cst {dimension_numbers = #tpu.dot_dimension_numbers<[1], [0], [0], [1], [0, 0, 1, 1], [], []>} : vector<2x6272xf32>, vector<6272x128xf32>, vector<2x128xf32> -> vector<2x128xf32>
    %c0_3 = arith.constant 0 : index
    %c0_4 = arith.constant 0 : index
    %3 = vector.load %arg3[%c0_3, %c0_4] : memref<1x128xf32, #tpu.memory_space<vmem>>, vector<1x128xf32>
    %4 = vector.broadcast %3 : vector<1x128xf32> to vector<2x128xf32>
    %5 = arith.addf %2, %4 : vector<2x128xf32>
    %c0_5 = arith.constant 0 : index
    %c0_6 = arith.constant 0 : index
    %6 = vector.load %arg4[%c0_5, %c0_6] : memref<128x10xf32, #tpu.memory_space<vmem>>, vector<128x10xf32>
    %cst_7 = arith.constant dense<0.000000e+00> : vector<2x10xf32>
    %7 = tpu.matmul %5, %6, %cst_7 {dimension_numbers = #tpu.dot_dimension_numbers<[1], [0], [0], [1], [0, 0, 1, 1], [], []>} : vector<2x128xf32>, vector<128x10xf32>, vector<2x10xf32> -> vector<2x10xf32>
    %c0_8 = arith.constant 0 : index
    %c0_9 = arith.constant 0 : index
    %8 = vector.load %arg5[%c0_8, %c0_9] : memref<1x10xf32, #tpu.memory_space<vmem>>, vector<1x10xf32>
    %9 = vector.broadcast %8 : vector<1x10xf32> to vector<2x10xf32>
    %10 = arith.addf %7, %9 : vector<2x10xf32>
    %cst_10 = arith.constant dense<0xFF800000> : vector<2xf32>
    %11 = vector.multi_reduction <maximumf>, %10, %cst_10 [1] : vector<2x10xf32> to vector<2xf32>
    %12 = vector.shape_cast %11 : vector<2xf32> to vector<2x1xf32>
    %13 = vector.broadcast %12 : vector<2x1xf32> to vector<2x10xf32>
    %14 = arith.subf %10, %13 : vector<2x10xf32>
    %15 = math.exp %14 : vector<2x10xf32>
    %cst_11 = arith.constant dense<0.000000e+00> : vector<2xf32>
    %16 = vector.multi_reduction <add>, %15, %cst_11 [1] : vector<2x10xf32> to vector<2xf32>
    %17 = vector.shape_cast %16 : vector<2xf32> to vector<2x1xf32>
    %18 = math.log %17 : vector<2x1xf32>
    %19 = vector.broadcast %18 : vector<2x1xf32> to vector<2x10xf32>
    %20 = arith.subf %14, %19 : vector<2x10xf32>
    %c0_12 = arith.constant 0 : index
    %c0_13 = arith.constant 0 : index
    %21 = vector.load %arg6[%c0_12, %c0_13] : memref<2x10xf32, #tpu.memory_space<vmem>>, vector<2x10xf32>
    tpu.vector_store %arg6[%c0_12, %c0_13], %20 {strides = array<i32>} : memref<2x10xf32, #tpu.memory_space<vmem>>, vector<2x10xf32>,
    return
  }
  func.func @transform_0(%arg0: i32) -> (i32, i32) {
    %c0_i32 = arith.constant 0 : i32
    %c0_i32_0 = arith.constant 0 : i32
    return %arg0, %c0_i32 : i32, i32
  }
  func.func @transform_1(%arg0: i32) -> (i32, i32) {
    %c0_i32 = arith.constant 0 : i32
    %c0_i32_0 = arith.constant 0 : i32
    %c0_i32_1 = arith.constant 0 : i32
    return %c0_i32, %c0_i32_0 : i32, i32
  }
  func.func @transform_2(%arg0: i32) -> (i32, i32) {
    %c0_i32 = arith.constant 0 : i32
    %c0_i32_0 = arith.constant 0 : i32
    %c0_i32_1 = arith.constant 0 : i32
    return %c0_i32, %c0_i32_0 : i32, i32
  }
  func.func @transform_3(%arg0: i32) -> (i32, i32) {
    %c0_i32 = arith.constant 0 : i32
    %c0_i32_0 = arith.constant 0 : i32
    %c0_i32_1 = arith.constant 0 : i32
    return %c0_i32, %c0_i32_0 : i32, i32
  }
  func.func @transform_4(%arg0: i32) -> (i32, i32) {
    %c0_i32 = arith.constant 0 : i32
    %c0_i32_0 = arith.constant 0 : i32
    %c0_i32_1 = arith.constant 0 : i32
    return %c0_i32, %c0_i32_0 : i32, i32
  }
  func.func @transform_5(%arg0: i32) -> (i32, i32) {
    %c0_i32 = arith.constant 0 : i32
    %c0_i32_0 = arith.constant 0 : i32
    return %arg0, %c0_i32 : i32, i32
  }
}

</mosaic_0001>

<bundles_post_ra>
// kernel: cnn2_forward.2
= control target key start
LH: loop header
LB: loop body
LE: loop exit
PB: predicated region body
PF: predicated region fallthrough
CT: control target
= control target key end

     0   :  { %8 = vsyncpa [#allocation3], 0  ;;  %s1496_s12 = smov [#allocation2]   ;;  %s2582_s0 = inlined_call_operand.vmem [shape: f32[392,36], index: 0, kind: input, shape index: {}]   ;;  %s2583_s1 = inlined_call_operand.vmem [shape: f32[36,128], index: 1, kind: input, shape index: {}]   ;;  %s2584_s2 = inlined_call_operand.hbm [shape: f32[1,32], index: 2, kind: input, shape index: {}]   ;;  %s2585_s3 = inlined_call_operand.vmem [shape: f32[392,32], index: 3, kind: output, shape index: {}]  }
   0x1   :  { %s19_s13 = sshll.u32 %s1496_s12, 4  ;;  %s1472_s16 = scalar_lea.hbm %s2584_s2, 16  ;;  %s20_s13 = int_to_ptr.vmem [resolvable:$true] %s19_s13 }
   0x2   :  { %p1473_p0 = scmp.ne.s32.totalorder %s2584_s2, %s1472_s16  ;;  %p1476_p1 = scmp.lt.u32.totalorder %s1472_s16, %s2584_s2 }
   0x4   :  { %p1478_p2 = pnand %p1476_p1, %p1473_p0 }
   0x6   :  { %1481 = shalt.err (!%p1478_p2)
}
   0x7   :  { %s1482_s21 = scalar_lea.vmem %s20_s13, 16  ;;  %s1486_s22 = scalar_lea.vmem %s20_s13, 32 }
   0x8   :  { %p1483_p3 = scmp.ne.s32.totalorder %s20_s13, %s1482_s21  ;;  %p1487_p4 = scmp.lt.s32.totalorder %s20_s13, %s20_s13 }
   0x9   :  { %p1488_p5 = scmp.lt.s32.totalorder %s1486_s22, %s1482_s21 }
   0xb   :  { %p1489_p6 = por %p1488_p5, %p1487_p4 }
   0xd   :  { %p1490_p7 = pnand %p1489_p6, %p1483_p3 }
   0xf   :  { %1493 = shalt.err (!%p1490_p7)
}
  0x10   :  { %22 = dma.hbm_to_vmem [thread:$0]  %s2584_s2, 16, %s20_s13, [#allocation3]  }
  0x11   :  { %1494 = dma.done.wait [#allocation3], 16  }
  0x12   :  { %1495 = vsyncadd [#allocation3], 4294967280  ;;  %v1497_v0 = vmov 0.0|0.0   ;;  %vm1498_vm0 = vmmov 0   ;;  %v1499_v1 = vmov 0.0   ;;  %v75_v2 = vld [vmem:[%s2583_s1] sm:$0xff] }
  0x13   :  { %1454 = vmatprep.subr.bf16.mxu0 %v1497_v0  ;;  %1460 = vmatprep.subr.bf16.mxu1 %v1497_v0  ;;  %v76_v3 = vld [vmem:[%s2583_s1 + $0x8] sm:$0xff]  ;;  %v77_v4 = vld [vmem:[%s2583_s1 + $0x10] sm:$0xff]  ;;  %v78_v6 = vld [vmem:[%s2583_s1 + $0x18] sm:$0xff]  ;;  %vm228_vm1 = vcmask 1043456   ;;  %vm80_vm2 = vcmask 293888   ;;  %s1500_s17 = smov 96  }
  0x14   :  { %1307 = vmatprep.mubr.msk.f32.mxu0 %vm1498_vm0, %v1499_v1  ;;  %1382 = vmatprep.mubr.msk.f32.mxu1 %vm1498_vm0, %v1499_v1  ;;  %v1455_v5 = vpack.c.bf16 %v76_v3, %v75_v2  ;;  %v1458_v7 = vpack.c.bf16 %v78_v6, %v77_v4  ;;  %v79_v8 = vld [vmem:[%s2583_s1 + $0x20] sm:$0xf]  ;;  %v51_v10 = vld [vmem:[%s2582_s0 + $0xc8] sm:$0xff]  ;;  %v52_v12 = vld [vmem:[%s2582_s0 + $0xd0] sm:$0xff]  ;;  %vm1137_vm3 = vcmask 261120  }
  0x15   :  { %v26_v9 = vld [vmem:[%s2582_s0] sm:$0xff]  ;;  %v27_v11 = vld [vmem:[%s2582_s0 + $0x8] sm:$0xff]  ;;  %v28_v13 = vld [vmem:[%s2582_s0 + $0x10] sm:$0xff] }
  0x16   :  { %1456 = vmatpush3.bf16.msra.mxu0 %v1455_v5  ;;  %1463 = vmatpush3.bf16.msra.mxu1 %v1455_v5  ;;  %v53_v14 = vld [vmem:[%s2582_s0 + $0xd8] sm:$0xff]  ;;  %v54_v16 = vld [vmem:[%s2582_s0 + $0xe0] sm:$0xff]  ;;  %v55_v18 = vld [vmem:[%s2582_s0 + $0xe8] sm:$0xff] }
  0x17   :  { %1457 = vmatprep.subr.bf16.mxu0 %v1497_v0  ;;  %1461 = vmatprep.subr.bf16.mxu1 %v1497_v0  ;;  %v29_v15 = vld [vmem:[%s2582_s0 + $0x18] sm:$0xff]  ;;  %v30_v17 = vld [vmem:[%s2582_s0 + $0x20] sm:$0xff]  ;;  %v31_v19 = vld [vmem:[%s2582_s0 + $0x28] sm:$0xff] }
  0x18   :  { %v56_v20 = vld [vmem:[%s2582_s0 + $0xf0] sm:$0xff]  ;;  %v57_v22 = vld [vmem:[%s2582_s0 + $0xf8] sm:$0xff]  ;;  %v58_v24 = vld [vmem:[%s2582_s0 + $0x100] sm:$0xff] }
  0x19   :  { %v32_v21 = vld [vmem:[%s2582_s0 + $0x30] sm:$0xff]  ;;  %v33_v23 = vld [vmem:[%s2582_s0 + $0x38] sm:$0xff]  ;;  %v34_v25 = vld [vmem:[%s2582_s0 + $0x40] sm:$0xff] }
  0x1a   :  { %1459 = vmatpush3.bf16.msra.mxu0 %v1458_v7  ;;  %1464 = vmatpush3.bf16.msra.mxu1 %v1458_v7  ;;  %v59_v26 = vld [vmem:[%s2582_s0 + $0x108] sm:$0xff]  ;;  %v60_v28 = vld [vmem:[%s2582_s0 + $0x110] sm:$0xff]  ;;  %v61_v30 = vld [vmem:[%s2582_s0 + $0x118] sm:$0xff] }
  0x1b   :  { %1305 = vmatprep.subr.mxu0 %v1499_v1  ;;  %1462 = vmatprep.subr.mxu1 %v1499_v1  ;;  %v35_v27 = vld [vmem:[%s2582_s0 + $0x48] sm:$0xff]  ;;  %v36_v29 = vld [vmem:[%s2582_s0 + $0x50] sm:$0xff]  ;;  %v37_v31 = vld [vmem:[%s2582_s0 + $0x58] sm:$0xff] }
  0x1c   :  { %v62_v32 = vld [vmem:[%s2582_s0 + $0x120] sm:$0xff]  ;;  %v63_v34 = vld [vmem:[%s2582_s0 + $0x128] sm:$0xff]  ;;  %v64_v36 = vld [vmem:[%s2582_s0 + $0x130] sm:$0xff] }
  0x1d   :  { %v38_v33 = vld [vmem:[%s2582_s0 + $0x60] sm:$0xff]  ;;  %v39_v35 = vld [vmem:[%s2582_s0 + $0x68] sm:$0xff]  ;;  %v40_v37 = vld [vmem:[%s2582_s0 + $0x70] sm:$0xff] }
  0x1e   :  { %1306 = vmatpush3.msk.msra.mxu0 %vm228_vm1, %v79_v8  ;;  %1465 = vmatpush3.msk.msra.mxu1 %vm228_vm1, %v79_v8  ;;  %v65_v38 = vld [vmem:[%s2582_s0 + $0x138] sm:$0xff]  ;;  %v66_v40 = vld [vmem:[%s2582_s0 + $0x140] sm:$0xff]  ;;  %v67_v42 = vld [vmem:[%s2582_s0 + $0x148] sm:$0xff] }
  0x1f   :  { %1308 = vmatmul.mubr.msk.f32.vlgmr.msra.gmra.mrb[0].mxu0 %vm80_vm2, %v26_v9  ;;  %1383 = vmatmul.mubr.msk.f32.vlgmr.msra.gmra.mrb[0].mxu1 %vm80_vm2, %v51_v10  ;;  %v41_v39 = vld [vmem:[%s2582_s0 + $0x78] sm:$0xff]  ;;  %v42_v41 = vld [vmem:[%s2582_s0 + $0x80] sm:$0xff]  ;;  %v43_v43 = vld [vmem:[%s2582_s0 + $0x88] sm:$0xff] }
  0x20   :  { %1310 = vmatprep.mubr.msk.f32.mxu0 %vm1498_vm0, %v1499_v1  ;;  %1385 = vmatprep.mubr.msk.f32.mxu1 %vm1498_vm0, %v1499_v1  ;;  %v68_v44 = vld [vmem:[%s2582_s0 + $0x150] sm:$0xff]  ;;  %v69_v46 = vld [vmem:[%s2582_s0 + $0x158] sm:$0xff]  ;;  %v70_v48 = vld [vmem:[%s2582_s0 + $0x160] sm:$0xff] }
  0x21   :  { %v44_v45 = vld [vmem:[%s2582_s0 + $0x90] sm:$0xff]  ;;  %v45_v47 = vld [vmem:[%s2582_s0 + $0x98] sm:$0xff]  ;;  %v46_v49 = vld [vmem:[%s2582_s0 + $0xa0] sm:$0xff] }
  0x22   :  { %v71_v50 = vld [vmem:[%s2582_s0 + $0x168] sm:$0xff]  ;;  %v72_v52 = vld [vmem:[%s2582_s0 + $0x170] sm:$0xff]  ;;  %v73_v54 = vld [vmem:[%s2582_s0 + $0x178] sm:$0xff] }
  0x23   :  { %1311 = vmatmul.mubr.msk.f32.gmra.mrb[2].mxu0 %vm80_vm2, %v27_v11  ;;  %1386 = vmatmul.mubr.msk.f32.gmra.mrb[2].mxu1 %vm80_vm2, %v52_v12  ;;  %v47_v51 = vld [vmem:[%s2582_s0 + $0xa8] sm:$0xff]  ;;  %v48_v53 = vld [vmem:[%s2582_s0 + $0xb0] sm:$0xff]  ;;  %v49_v55 = vld [vmem:[%s2582_s0 + $0xb8] sm:$0xff] }
  0x24   :  { %1313 = vmatprep.mubr.msk.f32.mxu0 %vm1498_vm0, %v1499_v1  ;;  %1388 = vmatprep.mubr.msk.f32.mxu1 %vm1498_vm0, %v1499_v1  ;;  %v74_v56 = vld [vmem:[%s2582_s0 + $0x180] sm:$0xff] }
  0x25   :  { %v50_v57 = vld [vmem:[%s2582_s0 + $0xc0] sm:$0xff]  ;;  %s1501_s0 = smov 64  }
  0x27   :  { %1314 = vmatmul.mubr.msk.f32.gmra.mrb[4].mxu0 %vm80_vm2, %v28_v13  ;;  %1389 = vmatmul.mubr.msk.f32.gmra.mrb[4].mxu1 %vm80_vm2, %v53_v14 }
  0x28   :  { %1316 = vmatprep.mubr.msk.f32.mxu0 %vm1498_vm0, %v1499_v1  ;;  %1391 = vmatprep.mubr.msk.f32.mxu1 %vm1498_vm0, %v1499_v1 }
  0x2b   :  { %1317 = vmatmul.mubr.msk.f32.gmra.mrb[6].mxu0 %vm80_vm2, %v29_v15  ;;  %1392 = vmatmul.mubr.msk.f32.gmra.mrb[6].mxu1 %vm80_vm2, %v54_v16 }
  0x2c   :  { %1319 = vmatprep.mubr.msk.f32.mxu0 %vm1498_vm0, %v1499_v1  ;;  %1394 = vmatprep.mubr.msk.f32.mxu1 %vm1498_vm0, %v1499_v1 }
  0x2f   :  { %1320 = vmatmul.mubr.msk.f32.gmra.mrb[8].mxu0 %vm80_vm2, %v30_v17  ;;  %1395 = vmatmul.mubr.msk.f32.gmra.mrb[8].mxu1 %vm80_vm2, %v55_v18 }
  0x30   :  { %1322 = vmatprep.mubr.msk.f32.mxu0 %vm1498_vm0, %v1499_v1  ;;  %1397 = vmatprep.mubr.msk.f32.mxu1 %vm1498_vm0, %v1499_v1 }
  0x33   :  { %1323 = vmatmul.mubr.msk.f32.gmra.mrb[10].mxu0 %vm80_vm2, %v31_v19  ;;  %1398 = vmatmul.mubr.msk.f32.gmra.mrb[10].mxu1 %vm80_vm2, %v56_v20 }
  0x34   :  { %1325 = vmatprep.mubr.msk.f32.mxu0 %vm1498_vm0, %v1499_v1  ;;  %1400 = vmatprep.mubr.msk.f32.mxu1 %vm1498_vm0, %v1499_v1 }
  0x37   :  { %1326 = vmatmul.mubr.msk.f32.gmra.mrb[12].mxu0 %vm80_vm2, %v32_v21  ;;  %1401 = vmatmul.mubr.msk.f32.gmra.mrb[12].mxu1 %vm80_vm2, %v57_v22 }
  0x38   :  { %1328 = vmatprep.mubr.msk.f32.mxu0 %vm1498_vm0, %v1499_v1  ;;  %1403 = vmatprep.mubr.msk.f32.mxu1 %vm1498_vm0, %v1499_v1 }
  0x3b   :  { %1329 = vmatmul.mubr.msk.f32.gmra.mrb[14].mxu0 %vm80_vm2, %v33_v23  ;;  %1404 = vmatmul.mubr.msk.f32.gmra.mrb[14].mxu1 %vm80_vm2, %v58_v24 }
  0x3c   :  { %1331 = vmatprep.mubr.msk.f32.mxu0 %vm1498_vm0, %v1499_v1  ;;  %1406 = vmatprep.mubr.msk.f32.mxu1 %vm1498_vm0, %v1499_v1 }
  0x3f   :  { %1332 = vmatmul.mubr.msk.f32.gmra.mrb[16].mxu0 %vm80_vm2, %v34_v25  ;;  %1407 = vmatmul.mubr.msk.f32.gmra.mrb[16].mxu1 %vm80_vm2, %v59_v26 }
  0x40   :  { %1334 = vmatprep.mubr.msk.f32.mxu0 %vm1498_vm0, %v1499_v1  ;;  %1409 = vmatprep.mubr.msk.f32.mxu1 %vm1498_vm0, %v1499_v1 }
  0x43   :  { %1335 = vmatmul.mubr.msk.f32.gmra.mrb[18].mxu0 %vm80_vm2, %v35_v27  ;;  %1410 = vmatmul.mubr.msk.f32.gmra.mrb[18].mxu1 %vm80_vm2, %v60_v28 }
  0x44   :  { %1337 = vmatprep.mubr.msk.f32.mxu0 %vm1498_vm0, %v1499_v1  ;;  %1412 = vmatprep.mubr.msk.f32.mxu1 %vm1498_vm0, %v1499_v1 }
  0x47   :  { %1338 = vmatmul.mubr.msk.f32.gmra.mrb[20].mxu0 %vm80_vm2, %v36_v29  ;;  %1413 = vmatmul.mubr.msk.f32.gmra.mrb[20].mxu1 %vm80_vm2, %v61_v30 }
  0x48   :  { %1340 = vmatprep.mubr.msk.f32.mxu0 %vm1498_vm0, %v1499_v1  ;;  %1415 = vmatprep.mubr.msk.f32.mxu1 %vm1498_vm0, %v1499_v1 }
  0x4b   :  { %1341 = vmatmul.mubr.msk.f32.gmra.mrb[22].mxu0 %vm80_vm2, %v37_v31  ;;  %1416 = vmatmul.mubr.msk.f32.gmra.mrb[22].mxu1 %vm80_vm2, %v62_v32 }
  0x4c   :  { %1343 = vmatprep.mubr.msk.f32.mxu0 %vm1498_vm0, %v1499_v1  ;;  %1418 = vmatprep.mubr.msk.f32.mxu1 %vm1498_vm0, %v1499_v1 }
  0x4f   :  { %1344 = vmatmul.mubr.msk.f32.gmra.mrb[24].mxu0 %vm80_vm2, %v38_v33  ;;  %1419 = vmatmul.mubr.msk.f32.gmra.mrb[24].mxu1 %vm80_vm2, %v63_v34 }
  0x50   :  { %1346 = vmatprep.mubr.msk.f32.mxu0 %vm1498_vm0, %v1499_v1  ;;  %1421 = vmatprep.mubr.msk.f32.mxu1 %vm1498_vm0, %v1499_v1 }
  0x53   :  { %1347 = vmatmul.mubr.msk.f32.gmra.mrb[26].mxu0 %vm80_vm2, %v39_v35  ;;  %1422 = vmatmul.mubr.msk.f32.gmra.mrb[26].mxu1 %vm80_vm2, %v64_v36 }
  0x54   :  { %1349 = vmatprep.mubr.msk.f32.mxu0 %vm1498_vm0, %v1499_v1  ;;  %1424 = vmatprep.mubr.msk.f32.mxu1 %vm1498_vm0, %v1499_v1 }
  0x57   :  { %1350 = vmatmul.mubr.msk.f32.gmra.mrb[28].mxu0 %vm80_vm2, %v40_v37  ;;  %1425 = vmatmul.mubr.msk.f32.gmra.mrb[28].mxu1 %vm80_vm2, %v65_v38 }
  0x58   :  { %1352 = vmatprep.mubr.msk.f32.mxu0 %vm1498_vm0, %v1499_v1  ;;  %1427 = vmatprep.mubr.msk.f32.mxu1 %vm1498_vm0, %v1499_v1 }
  0x5b   :  { %1353 = vmatmul.mubr.msk.f32.gmra.mrb[30].mxu0 %vm80_vm2, %v41_v39  ;;  %1428 = vmatmul.mubr.msk.f32.gmra.mrb[30].mxu1 %vm80_vm2, %v66_v40 }
  0x5c   :  { %1355 = vmatprep.mubr.msk.f32.mxu0 %vm1498_vm0, %v1499_v1  ;;  %1430 = vmatprep.mubr.msk.f32.mxu1 %vm1498_vm0, %v1499_v1 }
  0x5f   :  { %1356 = vmatmul.mubr.msk.f32.gmra.mrb[32].mxu0 %vm80_vm2, %v42_v41  ;;  %1431 = vmatmul.mubr.msk.f32.gmra.mrb[32].mxu1 %vm80_vm2, %v67_v42 }
  0x60   :  { %1358 = vmatprep.mubr.msk.f32.mxu0 %vm1498_vm0, %v1499_v1  ;;  %1433 = vmatprep.mubr.msk.f32.mxu1 %vm1498_vm0, %v1499_v1 }
  0x63   :  { %1359 = vmatmul.mubr.msk.f32.gmra.mrb[34].mxu0 %vm80_vm2, %v43_v43  ;;  %1434 = vmatmul.mubr.msk.f32.gmra.mrb[34].mxu1 %vm80_vm2, %v68_v44 }
  0x64   :  { %1361 = vmatprep.mubr.msk.f32.mxu0 %vm1498_vm0, %v1499_v1  ;;  %1436 = vmatprep.mubr.msk.f32.mxu1 %vm1498_vm0, %v1499_v1 }
  0x67   :  { %1362 = vmatmul.mubr.msk.f32.gmra.mrb[36].mxu0 %vm80_vm2, %v44_v45  ;;  %1437 = vmatmul.mubr.msk.f32.gmra.mrb[36].mxu1 %vm80_vm2, %v69_v46 }
  0x68   :  { %1364 = vmatprep.mubr.msk.f32.mxu0 %vm1498_vm0, %v1499_v1  ;;  %1439 = vmatprep.mubr.msk.f32.mxu1 %vm1498_vm0, %v1499_v1 }
  0x6b   :  { %1365 = vmatmul.mubr.msk.f32.gmra.mrb[38].mxu0 %vm80_vm2, %v45_v47  ;;  %1440 = vmatmul.mubr.msk.f32.gmra.mrb[38].mxu1 %vm80_vm2, %v70_v48 }
  0x6c   :  { %1367 = vmatprep.mubr.msk.f32.mxu0 %vm1498_vm0, %v1499_v1  ;;  %1442 = vmatprep.mubr.msk.f32.mxu1 %vm1498_vm0, %v1499_v1 }
  0x6f   :  { %1368 = vmatmul.mubr.msk.f32.gmra.mrb[40].mxu0 %vm80_vm2, %v46_v49  ;;  %1443 = vmatmul.mubr.msk.f32.gmra.mrb[40].mxu1 %vm80_vm2, %v71_v50 }
  0x70   :  { %1370 = vmatprep.mubr.msk.f32.mxu0 %vm1498_vm0, %v1499_v1  ;;  %1445 = vmatprep.mubr.msk.f32.mxu1 %vm1498_vm0, %v1499_v1 }
  0x73   :  { %1371 = vmatmul.mubr.msk.f32.gmra.mrb[42].mxu0 %vm80_vm2, %v47_v51  ;;  %1446 = vmatmul.mubr.msk.f32.gmra.mrb[42].mxu1 %vm80_vm2, %v72_v52 }
  0x74   :  { %1373 = vmatprep.mubr.msk.f32.mxu0 %vm1498_vm0, %v1499_v1  ;;  %1448 = vmatprep.mubr.msk.f32.mxu1 %vm1498_vm0, %v1499_v1 }
  0x77   :  { %1374 = vmatmul.mubr.msk.f32.gmra.mrb[44].mxu0 %vm80_vm2, %v48_v53  ;;  %1449 = vmatmul.mubr.msk.f32.gmra.mrb[44].mxu1 %vm80_vm2, %v73_v54 }
  0x78   :  { %1376 = vmatprep.mubr.msk.f32.mxu0 %vm1498_vm0, %v1499_v1  ;;  %1451 = vmatprep.mubr.msk.f32.mxu1 %vm1498_vm0, %v1499_v1 }
  0x7b   :  { %1377 = vmatmul.mubr.msk.f32.gmra.mrb[46].mxu0 %vm80_vm2, %v49_v55  ;;  %1452 = vmatmul.mubr.msk.f32.gmra.mrb[46].mxu1 %vm80_vm2, %v74_v56 }
  0x7c   :  { %1379 = vmatprep.mubr.msk.f32.mxu0 %vm1498_vm0, %v1499_v1 }
  0x7f   :  { %1380 = vmatmul.mubr.msk.f32.gmra.mrb[48].mxu0 %vm80_vm2, %v50_v57 }
  0xf2   :  { %v1845_v58 = vpop.f32.mrb[0].mxu0  ;;  %v1847_v59 = vpop.f32.mrb[0].mxu1 }
  0xf3   :  { %641 = vrot.lane.b32.xlu1 %v1847_v59, %s1500_s17  ;;  %v1384_v60 = vpop.f32.mrb[1].mxu1  ;;  %591 = vrot.lane.b32.xlu0 %v1845_v58, %s1500_s17  ;;  %v1309_v61 = vpop.f32.mrb[1].mxu0 }
  0xf6   :  { %v1853_v62 = vpop.f32.mrb[2].mxu0  ;;  %v1855_v63 = vpop.f32.mrb[2].mxu1 }
  0xf7   :  { %v1387_v0 = vpop.f32.mrb[3].mxu1  ;;  %593 = vrot.lane.b32.xlu0 %v1853_v62, %s1500_s17  ;;  %v1312_v1 = vpop.f32.mrb[3].mxu0 }
  0xfa   :  { %v1859_v2 = vpop.f32.mrb[4].mxu0  ;;  %v1861_v3 = vpop.f32.mrb[4].mxu1 }
  0xfb   :  { %v1390_v4 = vpop.f32.mrb[5].mxu1  ;;  %643 = vrot.lane.b32.xlu0 %v1855_v63, %s1500_s17  ;;  %595 = vrot.lane.b32.xlu1 %v1859_v2, %s1500_s17  ;;  %v1315_v5 = vpop.f32.mrb[5].mxu0 }
  0xfe   :  { %v1867_v6 = vpop.f32.mrb[6].mxu0  ;;  %v1869_v7 = vpop.f32.mrb[6].mxu1 }
  0xff   :  { %v1393_v8 = vpop.f32.mrb[7].mxu1  ;;  %647 = vrot.lane.b32.xlu0 %v1869_v7, %s1500_s17  ;;  %645 = vrot.lane.b32.xlu1 %v1861_v3, %s1500_s17  ;;  %v1318_v9 = vpop.f32.mrb[7].mxu0 }
 0x102   :  { %v1875_v10 = vpop.f32.mrb[8].mxu0  ;;  %v1877_v11 = vpop.f32.mrb[8].mxu1 }
 0x103   :  { %v1396_v12 = vpop.f32.mrb[9].mxu1  ;;  %597 = vrot.lane.b32.xlu1 %v1867_v6, %s1500_s17  ;;  %599 = vrot.lane.b32.xlu0 %v1875_v10, %s1500_s17  ;;  %v1321_v13 = vpop.f32.mrb[9].mxu0 }
 0x106   :  { %v1883_v14 = vpop.f32.mrb[10].mxu0  ;;  %v1885_v15 = vpop.f32.mrb[10].mxu1 }
 0x107   :  { %v1399_v16 = vpop.f32.mrb[11].mxu1  ;;  %649 = vrot.lane.b32.xlu1 %v1877_v11, %s1500_s17  ;;  %651 = vrot.lane.b32.xlu0 %v1885_v15, %s1500_s17  ;;  %v1324_v17 = vpop.f32.mrb[11].mxu0 }
 0x10a   :  { %v1891_v18 = vpop.f32.mrb[12].mxu0  ;;  %v1893_v19 = vpop.f32.mrb[12].mxu1 }
 0x10b   :  { %v1402_v20 = vpop.f32.mrb[13].mxu1  ;;  %601 = vrot.lane.b32.xlu1 %v1883_v14, %s1500_s17  ;;  %603 = vrot.lane.b32.xlu0 %v1891_v18, %s1500_s17  ;;  %v1327_v21 = vpop.f32.mrb[13].mxu0 }
 0x10e   :  { %v1899_v22 = vpop.f32.mrb[14].mxu0  ;;  %v1901_v23 = vpop.f32.mrb[14].mxu1 }
 0x10f   :  { %v1405_v24 = vpop.f32.mrb[15].mxu1  ;;  %653 = vrot.lane.b32.xlu1 %v1893_v19, %s1500_s17  ;;  %655 = vrot.lane.b32.xlu0 %v1901_v23, %s1500_s17  ;;  %v1330_v25 = vpop.f32.mrb[15].mxu0 }
 0x112   :  { %v1907_v26 = vpop.f32.mrb[16].mxu0  ;;  %v1909_v27 = vpop.f32.mrb[16].mxu1 }
 0x113   :  { %v1408_v28 = vpop.f32.mrb[17].mxu1  ;;  %605 = vrot.lane.b32.xlu1 %v1899_v22, %s1500_s17  ;;  %607 = vrot.lane.b32.xlu0 %v1907_v26, %s1500_s17  ;;  %v1333_v29 = vpop.f32.mrb[17].mxu0 }
 0x116   :  { %v1915_v30 = vpop.f32.mrb[18].mxu0  ;;  %v1917_v31 = vpop.f32.mrb[18].mxu1 }
 0x117   :  { %v1411_v32 = vpop.f32.mrb[19].mxu1  ;;  %657 = vrot.lane.b32.xlu1 %v1909_v27, %s1500_s17  ;;  %659 = vrot.lane.b32.xlu0 %v1917_v31, %s1500_s17  ;;  %v1336_v33 = vpop.f32.mrb[19].mxu0 }
 0x11a   :  { %v1923_v34 = vpop.f32.mrb[20].mxu0  ;;  %v1925_v35 = vpop.f32.mrb[20].mxu1 }
 0x11b   :  { %v1414_v36 = vpop.f32.mrb[21].mxu1  ;;  %609 = vrot.lane.b32.xlu1 %v1915_v30, %s1500_s17  ;;  %611 = vrot.lane.b32.xlu0 %v1923_v34, %s1500_s17  ;;  %v1339_v37 = vpop.f32.mrb[21].mxu0 }
 0x11e   :  { %v1931_v38 = vpop.f32.mrb[22].mxu0  ;;  %v1933_v39 = vpop.f32.mrb[22].mxu1 }
 0x11f   :  { %v1417_v40 = vpop.f32.mrb[23].mxu1  ;;  %661 = vrot.lane.b32.xlu1 %v1925_v35, %s1500_s17  ;;  %663 = vrot.lane.b32.xlu0 %v1933_v39, %s1500_s17  ;;  %v1342_v41 = vpop.f32.mrb[23].mxu0 }
 0x122   :  { %v1939_v42 = vpop.f32.mrb[24].mxu0  ;;  %v1941_v43 = vpop.f32.mrb[24].mxu1 }
 0x123   :  { %v1420_v44 = vpop.f32.mrb[25].mxu1  ;;  %613 = vrot.lane.b32.xlu1 %v1931_v38, %s1500_s17  ;;  %615 = vrot.lane.b32.xlu0 %v1939_v42, %s1500_s17  ;;  %v1345_v45 = vpop.f32.mrb[25].mxu0 }
 0x126   :  { %v1947_v46 = vpop.f32.mrb[26].mxu0  ;;  %v1949_v47 = vpop.f32.mrb[26].mxu1 }
 0x127   :  { %v1423_v48 = vpop.f32.mrb[27].mxu1  ;;  %665 = vrot.lane.b32.xlu1 %v1941_v43, %s1500_s17  ;;  %667 = vrot.lane.b32.xlu0 %v1949_v47, %s1500_s17  ;;  %v1348_v49 = vpop.f32.mrb[27].mxu0 }
 0x12a   :  { %v1955_v50 = vpop.f32.mrb[28].mxu0  ;;  %v1957_v51 = vpop.f32.mrb[28].mxu1 }
 0x12b   :  { %v1426_v52 = vpop.f32.mrb[29].mxu1  ;;  %617 = vrot.lane.b32.xlu1 %v1947_v46, %s1500_s17  ;;  %619 = vrot.lane.b32.xlu0 %v1955_v50, %s1500_s17  ;;  %v1351_v53 = vpop.f32.mrb[29].mxu0 }
 0x12e   :  { %v1963_v54 = vpop.f32.mrb[30].mxu0  ;;  %v1965_v55 = vpop.f32.mrb[30].mxu1 }
 0x12f   :  { %v1429_v56 = vpop.f32.mrb[31].mxu1  ;;  %669 = vrot.lane.b32.xlu1 %v1957_v51, %s1500_s17  ;;  %671 = vrot.lane.b32.xlu0 %v1965_v55, %s1500_s17  ;;  %v1354_v57 = vpop.f32.mrb[31].mxu0 }
 0x132   :  { %v1971_v60 = vpop.f32.mrb[32].mxu0  ;;  %v1973_v61 = vpop.f32.mrb[32].mxu1 }
 0x133   :  { %v1432_v0 = vpop.f32.mrb[33].mxu1  ;;  %621 = vrot.lane.b32.xlu1 %v1963_v54, %s1500_s17  ;;  %623 = vrot.lane.b32.xlu0 %v1971_v60, %s1500_s17  ;;  %v1357_v1 = vpop.f32.mrb[33].mxu0 }
 0x136   :  { %v1979_v4 = vpop.f32.mrb[34].mxu0  ;;  %v1981_v5 = vpop.f32.mrb[34].mxu1 }
 0x137   :  { %v1435_v8 = vpop.f32.mrb[35].mxu1  ;;  %673 = vrot.lane.b32.xlu1 %v1973_v61, %s1500_s17  ;;  %675 = vrot.lane.b32.xlu0 %v1981_v5, %s1500_s17  ;;  %v1360_v9 = vpop.f32.mrb[35].mxu0 }
 0x13a   :  { %v1987_v12 = vpop.f32.mrb[36].mxu0  ;;  %v1989_v13 = vpop.f32.mrb[36].mxu1 }
 0x13b   :  { %v1438_v16 = vpop.f32.mrb[37].mxu1  ;;  %625 = vrot.lane.b32.xlu1 %v1979_v4, %s1500_s17  ;;  %627 = vrot.lane.b32.xlu0 %v1987_v12, %s1500_s17  ;;  %v1363_v17 = vpop.f32.mrb[37].mxu0 }
 0x13e   :  { %v1995_v20 = vpop.f32.mrb[38].mxu0  ;;  %v1997_v21 = vpop.f32.mrb[38].mxu1 }
 0x13f   :  { %v1441_v24 = vpop.f32.mrb[39].mxu1  ;;  %677 = vrot.lane.b32.xlu1 %v1989_v13, %s1500_s17  ;;  %679 = vrot.lane.b32.xlu0 %v1997_v21, %s1500_s17  ;;  %v1366_v25 = vpop.f32.mrb[39].mxu0 }
 0x142   :  { %v2003_v28 = vpop.f32.mrb[40].mxu0  ;;  %v2005_v29 = vpop.f32.mrb[40].mxu1 }
 0x143   :  { %v1444_v32 = vpop.f32.mrb[41].mxu1  ;;  %629 = vrot.lane.b32.xlu1 %v1995_v20, %s1500_s17  ;;  %631 = vrot.lane.b32.xlu0 %v2003_v28, %s1500_s17  ;;  %v1369_v33 = vpop.f32.mrb[41].mxu0 }
 0x146   :  { %v2011_v36 = vpop.f32.mrb[42].mxu0  ;;  %v2013_v37 = vpop.f32.mrb[42].mxu1 }
 0x147   :  { %v1447_v40 = vpop.f32.mrb[43].mxu1  ;;  %681 = vrot.lane.b32.xlu1 %v2005_v29, %s1500_s17  ;;  %683 = vrot.lane.b32.xlu0 %v2013_v37, %s1500_s17  ;;  %v1372_v41 = vpop.f32.mrb[43].mxu0 }
 0x14a   :  { %v2019_v44 = vpop.f32.mrb[44].mxu0  ;;  %v2021_v45 = vpop.f32.mrb[44].mxu1 }
 0x14b   :  { %v1450_v48 = vpop.f32.mrb[45].mxu1  ;;  %633 = vrot.lane.b32.xlu1 %v2011_v36, %s1500_s17  ;;  %635 = vrot.lane.b32.xlu0 %v2019_v44, %s1500_s17  ;;  %v1375_v49 = vpop.f32.mrb[45].mxu0 }
 0x14e   :  { %v2027_v52 = vpop.f32.mrb[46].mxu0  ;;  %v2029_v53 = vpop.f32.mrb[46].mxu1 }
 0x14f   :  { %v1453_v56 = vpop.f32.mrb[47].mxu1  ;;  %685 = vrot.lane.b32.xlu1 %v2021_v45, %s1500_s17  ;;  %687 = vrot.lane.b32.xlu0 %v2029_v53, %s1500_s17  ;;  %v1378_v57 = vpop.f32.mrb[47].mxu0 }
 0x152   :  { %v2035_v0 = vpop.f32.mrb[48].mxu0 }
 0x153   :  { %637 = vrot.lane.b32.xlu1 %v2027_v52, %s1500_s17  ;;  %639 = vrot.lane.b32.xlu0 %v2035_v0, %s1500_s17  ;;  %v1381_v1 = vpop.f32.mrb[49].mxu0 }
 0x165   :  { %v642_v8 = vpop.permute.xlu1 %641  ;;  %v592_v9 = vpop.permute.xlu0 %591 }
 0x166   :  { %v2042_v16 = vmax.f32 %v1847_v59, %v642_v8  ;;  %v2045_v17 = vmax.f32 %v1845_v58, %v592_v9 }
 0x168   :  { %836 = vrot.lane.b32.xlu1 %v2045_v17, %s1501_s0  ;;  %886 = vrot.lane.b32.xlu0 %v2042_v16, %s1501_s0 }
 0x169   :  { %v594_v24 = vpop.permute.xlu0 %593 }
 0x16a   :  { %v2052_v25 = vmax.f32 %v1853_v62, %v594_v24 }
 0x16c   :  { %838 = vrot.lane.b32.xlu0 %v2052_v25, %s1501_s0 }
 0x16d   :  { %v644_v32 = vpop.permute.xlu0 %643  ;;  %v596_v59 = vpop.permute.xlu1 %595 }
 0x16e   :  { %v2057_v33 = vmax.f32 %v1855_v63, %v644_v32  ;;  %v2062_v41 = vmax.f32 %v1859_v2, %v596_v59 }
 0x170   :  { %888 = vrot.lane.b32.xlu1 %v2057_v33, %s1501_s0 }
 0x171   :  { %v648_v58 = vpop.permute.xlu0 %647  ;;  %v646_v40 = vpop.permute.xlu1 %645 }
 0x172   :  { %v2065_v48 = vmax.f32 %v1861_v3, %v646_v40  ;;  %v2072_v49 = vmax.f32 %v1869_v7, %v648_v58 }
 0x174   :  { %840 = vrot.lane.b32.xlu1 %v2062_v41, %s1501_s0  ;;  %890 = vrot.lane.b32.xlu0 %v2065_v48, %s1501_s0 }
 0x175   :  { %v598_v62 = vpop.permute.xlu1 %597  ;;  %v600_v63 = vpop.permute.xlu0 %599 }
 0x176   :  { %v2075_v56 = vmax.f32 %v1867_v6, %v598_v62  ;;  %v2082_v57 = vmax.f32 %v1875_v10, %v600_v63 }
 0x178   :  { %892 = vrot.lane.b32.xlu1 %v2072_v49, %s1501_s0  ;;  %842 = vrot.lane.b32.xlu0 %v2075_v56, %s1501_s0 }
 0x179   :  { %v650_v2 = vpop.permute.xlu1 %649  ;;  %v652_v3 = vpop.permute.xlu0 %651 }
 0x17a   :  { %v2085_v1 = vmax.f32 %v1877_v11, %v650_v2  ;;  %v2092_v8 = vmax.f32 %v1885_v15, %v652_v3 }
 0x17c   :  { %844 = vrot.lane.b32.xlu1 %v2082_v57, %s1501_s0  ;;  %894 = vrot.lane.b32.xlu0 %v2085_v1, %s1501_s0 }
 0x17d   :  { %v602_v6 = vpop.permute.xlu1 %601  ;;  %v604_v7 = vpop.permute.xlu0 %603 }
 0x17e   :  { %v2095_v9 = vmax.f32 %v1883_v14, %v602_v6  ;;  %v2102_v24 = vmax.f32 %v1891_v18, %v604_v7 }
 0x180   :  { %896 = vrot.lane.b32.xlu1 %v2092_v8, %s1501_s0  ;;  %846 = vrot.lane.b32.xlu0 %v2095_v9, %s1501_s0 }
 0x181   :  { %v654_v10 = vpop.permute.xlu1 %653  ;;  %v656_v11 = vpop.permute.xlu0 %655 }
 0x182   :  { %v2105_v32 = vmax.f32 %v1893_v19, %v654_v10  ;;  %v2112_v59 = vmax.f32 %v1901_v23, %v656_v11 }
 0x184   :  { %848 = vrot.lane.b32.xlu1 %v2102_v24, %s1501_s0  ;;  %898 = vrot.lane.b32.xlu0 %v2105_v32, %s1501_s0 }
 0x185   :  { %v606_v14 = vpop.permute.xlu1 %605  ;;  %v608_v15 = vpop.permute.xlu0 %607 }
 0x186   :  { %v2115_v58 = vmax.f32 %v1899_v22, %v606_v14  ;;  %v2122_v40 = vmax.f32 %v1907_v26, %v608_v15 }
 0x188   :  { %900 = vrot.lane.b32.xlu1 %v2112_v59, %s1501_s0  ;;  %850 = vrot.lane.b32.xlu0 %v2115_v58, %s1501_s0 }
 0x189   :  { %v658_v18 = vpop.permute.xlu1 %657  ;;  %v660_v19 = vpop.permute.xlu0 %659 }
 0x18a   :  { %v2125_v62 = vmax.f32 %v1909_v27, %v658_v18  ;;  %v2132_v63 = vmax.f32 %v1917_v31, %v660_v19 }
 0x18c   :  { %852 = vrot.lane.b32.xlu1 %v2122_v40, %s1501_s0  ;;  %902 = vrot.lane.b32.xlu0 %v2125_v62, %s1501_s0 }
 0x18d   :  { %v610_v22 = vpop.permute.xlu1 %609  ;;  %v612_v23 = vpop.permute.xlu0 %611 }
 0x18e   :  { %v2135_v2 = vmax.f32 %v1915_v30, %v610_v22  ;;  %v2142_v3 = vmax.f32 %v1923_v34, %v612_v23 }
 0x190   :  { %904 = vrot.lane.b32.xlu1 %v2132_v63, %s1501_s0  ;;  %854 = vrot.lane.b32.xlu0 %v2135_v2, %s1501_s0 }
 0x191   :  { %v662_v26 = vpop.permute.xlu1 %661  ;;  %v664_v27 = vpop.permute.xlu0 %663 }
 0x192   :  { %v2145_v6 = vmax.f32 %v1925_v35, %v662_v26  ;;  %v2152_v7 = vmax.f32 %v1933_v39, %v664_v27 }
 0x194   :  { %856 = vrot.lane.b32.xlu1 %v2142_v3, %s1501_s0  ;;  %906 = vrot.lane.b32.xlu0 %v2145_v6, %s1501_s0 }
 0x195   :  { %v614_v30 = vpop.permute.xlu1 %613  ;;  %v616_v31 = vpop.permute.xlu0 %615 }
 0x196   :  { %v2155_v10 = vmax.f32 %v1931_v38, %v614_v30  ;;  %v2162_v11 = vmax.f32 %v1939_v42, %v616_v31 }
 0x198   :  { %908 = vrot.lane.b32.xlu1 %v2152_v7, %s1501_s0  ;;  %858 = vrot.lane.b32.xlu0 %v2155_v10, %s1501_s0 }
 0x199   :  { %v666_v34 = vpop.permute.xlu1 %665  ;;  %v668_v35 = vpop.permute.xlu0 %667 }
 0x19a   :  { %v2165_v14 = vmax.f32 %v1941_v43, %v666_v34  ;;  %v2172_v15 = vmax.f32 %v1949_v47, %v668_v35 }
 0x19c   :  { %860 = vrot.lane.b32.xlu1 %v2162_v11, %s1501_s0  ;;  %910 = vrot.lane.b32.xlu0 %v2165_v14, %s1501_s0 }
 0x19d   :  { %v618_v38 = vpop.permute.xlu1 %617  ;;  %v620_v39 = vpop.permute.xlu0 %619 }
 0x19e   :  { %v2175_v18 = vmax.f32 %v1947_v46, %v618_v38  ;;  %v2182_v19 = vmax.f32 %v1955_v50, %v620_v39 }
 0x1a0   :  { %912 = vrot.lane.b32.xlu1 %v2172_v15, %s1501_s0  ;;  %862 = vrot.lane.b32.xlu0 %v2175_v18, %s1501_s0 }
 0x1a1   :  { %v670_v42 = vpop.permute.xlu1 %669  ;;  %v672_v43 = vpop.permute.xlu0 %671 }
 0x1a2   :  { %v2185_v22 = vmax.f32 %v1957_v51, %v670_v42  ;;  %v2192_v23 = vmax.f32 %v1965_v55, %v672_v43 }
 0x1a4   :  { %864 = vrot.lane.b32.xlu1 %v2182_v19, %s1501_s0  ;;  %914 = vrot.lane.b32.xlu0 %v2185_v22, %s1501_s0 }
 0x1a5   :  { %v622_v46 = vpop.permute.xlu1 %621  ;;  %v624_v47 = vpop.permute.xlu0 %623 }
 0x1a6   :  { %v2195_v26 = vmax.f32 %v1963_v54, %v622_v46  ;;  %v2202_v27 = vmax.f32 %v1971_v60, %v624_v47 }
 0x1a8   :  { %916 = vrot.lane.b32.xlu1 %v2192_v23, %s1501_s0  ;;  %866 = vrot.lane.b32.xlu0 %v2195_v26, %s1501_s0 }
 0x1a9   :  { %v674_v50 = vpop.permute.xlu1 %673  ;;  %v676_v51 = vpop.permute.xlu0 %675 }
 0x1aa   :  { %v2205_v30 = vmax.f32 %v1973_v61, %v674_v50  ;;  %v2212_v31 = vmax.f32 %v1981_v5, %v676_v51 }
 0x1ac   :  { %868 = vrot.lane.b32.xlu1 %v2202_v27, %s1501_s0  ;;  %918 = vrot.lane.b32.xlu0 %v2205_v30, %s1501_s0 }
 0x1ad   :  { %v626_v54 = vpop.permute.xlu1 %625  ;;  %v628_v55 = vpop.permute.xlu0 %627 }
 0x1ae   :  { %v2215_v34 = vmax.f32 %v1979_v4, %v626_v54  ;;  %v2222_v35 = vmax.f32 %v1987_v12, %v628_v55 }
 0x1b0   :  { %920 = vrot.lane.b32.xlu1 %v2212_v31, %s1501_s0  ;;  %870 = vrot.lane.b32.xlu0 %v2215_v34, %s1501_s0 }
 0x1b1   :  { %v678_v60 = vpop.permute.xlu1 %677  ;;  %v680_v61 = vpop.permute.xlu0 %679 }
 0x1b2   :  { %v2225_v38 = vmax.f32 %v1989_v13, %v678_v60  ;;  %v2232_v39 = vmax.f32 %v1997_v21, %v680_v61 }
 0x1b4   :  { %872 = vrot.lane.b32.xlu1 %v2222_v35, %s1501_s0  ;;  %922 = vrot.lane.b32.xlu0 %v2225_v38, %s1501_s0 }
 0x1b5   :  { %v630_v4 = vpop.permute.xlu1 %629  ;;  %v632_v5 = vpop.permute.xlu0 %631 }
 0x1b6   :  { %v2235_v42 = vmax.f32 %v1995_v20, %v630_v4  ;;  %v2242_v43 = vmax.f32 %v2003_v28, %v632_v5 }
 0x1b8   :  { %924 = vrot.lane.b32.xlu1 %v2232_v39, %s1501_s0  ;;  %874 = vrot.lane.b32.xlu0 %v2235_v42, %s1501_s0 }
 0x1b9   :  { %v682_v12 = vpop.permute.xlu1 %681  ;;  %v684_v13 = vpop.permute.xlu0 %683 }
 0x1ba   :  { %v2245_v46 = vmax.f32 %v2005_v29, %v682_v12  ;;  %v2252_v47 = vmax.f32 %v2013_v37, %v684_v13 }
 0x1bc   :  { %876 = vrot.lane.b32.xlu1 %v2242_v43, %s1501_s0  ;;  %926 = vrot.lane.b32.xlu0 %v2245_v46, %s1501_s0 }
 0x1bd   :  { %v634_v20 = vpop.permute.xlu1 %633  ;;  %v636_v21 = vpop.permute.xlu0 %635 }
 0x1be   :  { %v2255_v50 = vmax.f32 %v2011_v36, %v634_v20  ;;  %v2262_v51 = vmax.f32 %v2019_v44, %v636_v21 }
 0x1c0   :  { %928 = vrot.lane.b32.xlu1 %v2252_v47, %s1501_s0  ;;  %878 = vrot.lane.b32.xlu0 %v2255_v50, %s1501_s0 }
 0x1c1   :  { %v686_v28 = vpop.permute.xlu1 %685  ;;  %v688_v29 = vpop.permute.xlu0 %687 }
 0x1c2   :  { %v2277_v44 = vmax.f32 %v2021_v45, %v686_v28  ;;  %v2280_v60 = vmax.f32 %v2029_v53, %v688_v29 }
 0x1c4   :  { %880 = vrot.lane.b32.xlu1 %v2262_v51, %s1501_s0 }
 0x1c5   :  { %v638_v54 = vpop.permute.xlu1 %637  ;;  %v640_v37 = vpop.permute.xlu0 %639 }
 0x1c6   :  { %v2267_v55 = vmax.f32 %v2027_v52, %v638_v54  ;;  %v2270_v36 = vmax.f32 %v2035_v0, %v640_v37  ;;  %v2286_v52 = vld [vmem:[#allocation2] ss:$0 sm:$0xff] }
 0x1c8   :  { %882 = vrot.lane.b32.xlu0 %v2267_v55, %s1501_s0  ;;  %884 = vrot.lane.b32.xlu1 %v2270_v36, %s1501_s0 }
 0x1cc   :  { %930 = vrot.lane.b32.xlu0 %v2277_v44, %s1501_s0  ;;  %932 = vrot.lane.b32.xlu1 %v2280_v60, %s1501_s0 }
 0x1da   :  { %v837_v0 = vpop.permute.xlu1 %836  ;;  %v887_v61 = vpop.permute.xlu0 %886 }
 0x1db   :  { %v983_v4 = vmax.f32 %v2045_v17, %v837_v0  ;;  %v1008_v5 = vmax.f32 %v2042_v16, %v887_v61 }
 0x1dd   :  { %v1039_v45 = vadd.f32 %v2286_v52, %v983_v4  ;;  %v1064_v12 = vadd.f32 %v2286_v52, %v1008_v5 }
 0x1de   :  { %v839_v53 = vpop.permute.xlu0 %838 }
 0x1df   :  { %v1088_v13 = vmax.f32 %v1039_v45, 0.0  ;;  %v1113_v20 = vmax.f32 %v1064_v12, 0.0  ;;  %v984_v21 = vmax.f32 %v2052_v25, %v839_v53 }
 0x1e1   :  { %1138 = vst.msk [vmem:[%s2585_s3] sm:$0xff] %vm1137_vm3, %v1088_v13  ;;  %1163 = vst.msk [vmem:[%s2585_s3 + $0xc8] sm:$0xff] %vm1137_vm3, %v1113_v20  ;;  %v1040_v16 = vadd.f32 %v2286_v52, %v984_v21 }
 0x1e2   :  { %v889_v17 = vpop.permute.xlu1 %888 }
 0x1e3   :  { %v1089_v28 = vmax.f32 %v1040_v16, 0.0  ;;  %v1009_v29 = vmax.f32 %v2057_v33, %v889_v17 }
 0x1e5   :  { %1139 = vst.msk [vmem:[%s2585_s3 + $0x8] sm:$0xff] %vm1137_vm3, %v1089_v28  ;;  %v1065_v25 = vadd.f32 %v2286_v52, %v1009_v29 }
 0x1e6   :  { %v841_v54 = vpop.permute.xlu1 %840  ;;  %v891_v37 = vpop.permute.xlu0 %890 }
 0x1e7   :  { %v1114_v0 = vmax.f32 %v1065_v25, 0.0  ;;  %v985_v61 = vmax.f32 %v2062_v41, %v841_v54  ;;  %v1010_v4 = vmax.f32 %v2065_v48, %v891_v37 }
 0x1e9   :  { %1164 = vst.msk [vmem:[%s2585_s3 + $0xd0] sm:$0xff] %vm1137_vm3, %v1114_v0  ;;  %v1041_v33 = vadd.f32 %v2286_v52, %v985_v61  ;;  %v1066_v5 = vadd.f32 %v2286_v52, %v1010_v4 }
 0x1ea   :  { %v893_v45 = vpop.permute.xlu1 %892  ;;  %v843_v12 = vpop.permute.xlu0 %842 }
 0x1eb   :  { %v1090_v53 = vmax.f32 %v1041_v33, 0.0  ;;  %v1115_v13 = vmax.f32 %v1066_v5, 0.0  ;;  %v1011_v20 = vmax.f32 %v2072_v49, %v893_v45  ;;  %v986_v21 = vmax.f32 %v2075_v56, %v843_v12 }
 0x1ed   :  { %1140 = vst.msk [vmem:[%s2585_s3 + $0x10] sm:$0xff] %vm1137_vm3, %v1090_v53  ;;  %1165 = vst.msk [vmem:[%s2585_s3 + $0xd8] sm:$0xff] %vm1137_vm3, %v1115_v13  ;;  %v1067_v41 = vadd.f32 %v2286_v52, %v1011_v20  ;;  %v1042_v48 = vadd.f32 %v2286_v52, %v986_v21 }
 0x1ee   :  { %v845_v16 = vpop.permute.xlu1 %844  ;;  %v895_v17 = vpop.permute.xlu0 %894 }
 0x1ef   :  { %v1116_v28 = vmax.f32 %v1067_v41, 0.0  ;;  %v1091_v49 = vmax.f32 %v1042_v48, 0.0  ;;  %v987_v56 = vmax.f32 %v2082_v57, %v845_v16  ;;  %v1012_v29 = vmax.f32 %v2085_v1, %v895_v17 }
 0x1f1   :  { %1166 = vst.msk [vmem:[%s2585_s3 + $0xe0] sm:$0xff] %vm1137_vm3, %v1116_v28  ;;  %1141 = vst.msk [vmem:[%s2585_s3 + $0x18] sm:$0xff] %vm1137_vm3, %v1091_v49  ;;  %v1043_v25 = vadd.f32 %v2286_v52, %v987_v56  ;;  %v1068_v54 = vadd.f32 %v2286_v52, %v1012_v29 }
 0x1f2   :  { %v897_v37 = vpop.permute.xlu1 %896  ;;  %v847_v0 = vpop.permute.xlu0 %846 }
 0x1f3   :  { %v1092_v61 = vmax.f32 %v1043_v25, 0.0  ;;  %v1117_v57 = vmax.f32 %v1068_v54, 0.0  ;;  %v1013_v1 = vmax.f32 %v2092_v8, %v897_v37  ;;  %v988_v4 = vmax.f32 %v2095_v9, %v847_v0 }
 0x1f5   :  { %1142 = vst.msk [vmem:[%s2585_s3 + $0x20] sm:$0xff] %vm1137_vm3, %v1092_v61  ;;  %1167 = vst.msk [vmem:[%s2585_s3 + $0xe8] sm:$0xff] %vm1137_vm3, %v1117_v57  ;;  %v1069_v33 = vadd.f32 %v2286_v52, %v1013_v1  ;;  %v1044_v5 = vadd.f32 %v2286_v52, %v988_v4 }
 0x1f6   :  { %v849_v45 = vpop.permute.xlu1 %848  ;;  %v899_v12 = vpop.permute.xlu0 %898 }
 0x1f7   :  { %v1118_v53 = vmax.f32 %v1069_v33, 0.0  ;;  %v1093_v8 = vmax.f32 %v1044_v5, 0.0  ;;  %v989_v9 = vmax.f32 %v2102_v24, %v849_v45  ;;  %v1014_v13 = vmax.f32 %v2105_v32, %v899_v12 }
 0x1f9   :  { %1168 = vst.msk [vmem:[%s2585_s3 + $0xf0] sm:$0xff] %vm1137_vm3, %v1118_v53  ;;  %1143 = vst.msk [vmem:[%s2585_s3 + $0x28] sm:$0xff] %vm1137_vm3, %v1093_v8  ;;  %v1045_v20 = vadd.f32 %v2286_v52, %v989_v9  ;;  %v1070_v21 = vadd.f32 %v2286_v52, %v1014_v13 }
 0x1fa   :  { %v901_v41 = vpop.permute.xlu1 %900  ;;  %v851_v48 = vpop.permute.xlu0 %850 }
 0x1fb   :  { %v1094_v16 = vmax.f32 %v1045_v20, 0.0  ;;  %v1119_v24 = vmax.f32 %v1070_v21, 0.0  ;;  %v1015_v32 = vmax.f32 %v2112_v59, %v901_v41  ;;  %v990_v17 = vmax.f32 %v2115_v58, %v851_v48 }
 0x1fd   :  { %1144 = vst.msk [vmem:[%s2585_s3 + $0x30] sm:$0xff] %vm1137_vm3, %v1094_v16  ;;  %1169 = vst.msk [vmem:[%s2585_s3 + $0xf8] sm:$0xff] %vm1137_vm3, %v1119_v24  ;;  %v1071_v28 = vadd.f32 %v2286_v52, %v1015_v32  ;;  %v1046_v49 = vadd.f32 %v2286_v52, %v990_v17 }
 0x1fe   :  { %v853_v56 = vpop.permute.xlu1 %852  ;;  %v903_v29 = vpop.permute.xlu0 %902 }
 0x1ff   :  { %v1120_v25 = vmax.f32 %v1071_v28, 0.0  ;;  %v1095_v59 = vmax.f32 %v1046_v49, 0.0  ;;  %v991_v58 = vmax.f32 %v2122_v40, %v853_v56  ;;  %v1016_v54 = vmax.f32 %v2125_v62, %v903_v29 }
 0x201   :  { %1170 = vst.msk [vmem:[%s2585_s3 + $0x100] sm:$0xff] %vm1137_vm3, %v1120_v25  ;;  %1145 = vst.msk [vmem:[%s2585_s3 + $0x38] sm:$0xff] %vm1137_vm3, %v1095_v59  ;;  %v1047_v37 = vadd.f32 %v2286_v52, %v991_v58  ;;  %v1072_v0 = vadd.f32 %v2286_v52, %v1016_v54 }
 0x202   :  { %v905_v61 = vpop.permute.xlu1 %904  ;;  %v855_v57 = vpop.permute.xlu0 %854 }
 0x203   :  { %v1096_v1 = vmax.f32 %v1047_v37, 0.0  ;;  %v1121_v40 = vmax.f32 %v1072_v0, 0.0  ;;  %v1017_v62 = vmax.f32 %v2132_v63, %v905_v61  ;;  %v992_v4 = vmax.f32 %v2135_v2, %v855_v57 }
 0x205   :  { %1146 = vst.msk [vmem:[%s2585_s3 + $0x40] sm:$0xff] %vm1137_vm3, %v1096_v1  ;;  %1171 = vst.msk [vmem:[%s2585_s3 + $0x108] sm:$0xff] %vm1137_vm3, %v1121_v40  ;;  %v1073_v33 = vadd.f32 %v2286_v52, %v1017_v62  ;;  %v1048_v5 = vadd.f32 %v2286_v52, %v992_v4 }
 0x206   :  { %v857_v45 = vpop.permute.xlu1 %856  ;;  %v907_v12 = vpop.permute.xlu0 %906 }
 0x207   :  { %v1122_v53 = vmax.f32 %v1073_v33, 0.0  ;;  %v1097_v63 = vmax.f32 %v1048_v5, 0.0  ;;  %v993_v2 = vmax.f32 %v2142_v3, %v857_v45  ;;  %v1018_v8 = vmax.f32 %v2145_v6, %v907_v12 }
 0x209   :  { %1172 = vst.msk [vmem:[%s2585_s3 + $0x110] sm:$0xff] %vm1137_vm3, %v1122_v53  ;;  %1147 = vst.msk [vmem:[%s2585_s3 + $0x48] sm:$0xff] %vm1137_vm3, %v1097_v63  ;;  %v1049_v9 = vadd.f32 %v2286_v52, %v993_v2  ;;  %v1074_v13 = vadd.f32 %v2286_v52, %v1018_v8 }
 0x20a   :  { %v909_v20 = vpop.permute.xlu1 %908  ;;  %v859_v21 = vpop.permute.xlu0 %858 }
 0x20b   :  { %v1098_v41 = vmax.f32 %v1049_v9, 0.0  ;;  %v1123_v3 = vmax.f32 %v1074_v13, 0.0  ;;  %v1019_v6 = vmax.f32 %v2152_v7, %v909_v20  ;;  %v994_v48 = vmax.f32 %v2155_v10, %v859_v21 }
 0x20d   :  { %1148 = vst.msk [vmem:[%s2585_s3 + $0x50] sm:$0xff] %vm1137_vm3, %v1098_v41  ;;  %1173 = vst.msk [vmem:[%s2585_s3 + $0x118] sm:$0xff] %vm1137_vm3, %v1123_v3  ;;  %v1075_v16 = vadd.f32 %v2286_v52, %v1019_v6  ;;  %v1050_v24 = vadd.f32 %v2286_v52, %v994_v48 }
 0x20e   :  { %v861_v32 = vpop.permute.xlu1 %860  ;;  %v911_v17 = vpop.permute.xlu0 %910 }
 0x20f   :  { %v1124_v28 = vmax.f32 %v1075_v16, 0.0  ;;  %v1099_v7 = vmax.f32 %v1050_v24, 0.0  ;;  %v995_v10 = vmax.f32 %v2162_v11, %v861_v32  ;;  %v1020_v49 = vmax.f32 %v2165_v14, %v911_v17 }
 0x211   :  { %1174 = vst.msk [vmem:[%s2585_s3 + $0x120] sm:$0xff] %vm1137_vm3, %v1124_v28  ;;  %1149 = vst.msk [vmem:[%s2585_s3 + $0x58] sm:$0xff] %vm1137_vm3, %v1099_v7  ;;  %v1051_v56 = vadd.f32 %v2286_v52, %v995_v10  ;;  %v1076_v29 = vadd.f32 %v2286_v52, %v1020_v49 }
 0x212   :  { %v913_v25 = vpop.permute.xlu1 %912  ;;  %v863_v59 = vpop.permute.xlu0 %862 }
 0x213   :  { %v1100_v58 = vmax.f32 %v1051_v56, 0.0  ;;  %v1125_v11 = vmax.f32 %v1076_v29, 0.0  ;;  %v1021_v14 = vmax.f32 %v2172_v15, %v913_v25  ;;  %v996_v54 = vmax.f32 %v2175_v18, %v863_v59 }
 0x215   :  { %1150 = vst.msk [vmem:[%s2585_s3 + $0x60] sm:$0xff] %vm1137_vm3, %v1100_v58  ;;  %1175 = vst.msk [vmem:[%s2585_s3 + $0x128] sm:$0xff] %vm1137_vm3, %v1125_v11  ;;  %v1077_v37 = vadd.f32 %v2286_v52, %v1021_v14  ;;  %v1052_v0 = vadd.f32 %v2286_v52, %v996_v54 }
 0x216   :  { %v865_v61 = vpop.permute.xlu1 %864  ;;  %v915_v57 = vpop.permute.xlu0 %914 }
 0x217   :  { %v1126_v1 = vmax.f32 %v1077_v37, 0.0  ;;  %v1101_v15 = vmax.f32 %v1052_v0, 0.0  ;;  %v997_v18 = vmax.f32 %v2182_v19, %v865_v61  ;;  %v1022_v40 = vmax.f32 %v2185_v22, %v915_v57 }
 0x219   :  { %1176 = vst.msk [vmem:[%s2585_s3 + $0x130] sm:$0xff] %vm1137_vm3, %v1126_v1  ;;  %1151 = vst.msk [vmem:[%s2585_s3 + $0x68] sm:$0xff] %vm1137_vm3, %v1101_v15  ;;  %v1053_v62 = vadd.f32 %v2286_v52, %v997_v18  ;;  %v1078_v4 = vadd.f32 %v2286_v52, %v1022_v40 }
 0x21a   :  { %v917_v33 = vpop.permute.xlu1 %916  ;;  %v867_v5 = vpop.permute.xlu0 %866 }
 0x21b   :  { %v1102_v45 = vmax.f32 %v1053_v62, 0.0  ;;  %v1127_v19 = vmax.f32 %v1078_v4, 0.0  ;;  %v1023_v22 = vmax.f32 %v2192_v23, %v917_v33  ;;  %v998_v12 = vmax.f32 %v2195_v26, %v867_v5 }
 0x21d   :  { %1152 = vst.msk [vmem:[%s2585_s3 + $0x70] sm:$0xff] %vm1137_vm3, %v1102_v45  ;;  %1177 = vst.msk [vmem:[%s2585_s3 + $0x138] sm:$0xff] %vm1137_vm3, %v1127_v19  ;;  %v1079_v53 = vadd.f32 %v2286_v52, %v1023_v22  ;;  %v1054_v63 = vadd.f32 %v2286_v52, %v998_v12 }
 0x21e   :  { %v869_v2 = vpop.permute.xlu1 %868  ;;  %v919_v8 = vpop.permute.xlu0 %918 }
 0x21f   :  { %v1128_v9 = vmax.f32 %v1079_v53, 0.0  ;;  %v1103_v23 = vmax.f32 %v1054_v63, 0.0  ;;  %v999_v26 = vmax.f32 %v2202_v27, %v869_v2  ;;  %v1024_v13 = vmax.f32 %v2205_v30, %v919_v8 }
 0x221   :  { %1178 = vst.msk [vmem:[%s2585_s3 + $0x140] sm:$0xff] %vm1137_vm3, %v1128_v9  ;;  %1153 = vst.msk [vmem:[%s2585_s3 + $0x78] sm:$0xff] %vm1137_vm3, %v1103_v23  ;;  %v1055_v20 = vadd.f32 %v2286_v52, %v999_v26  ;;  %v1080_v21 = vadd.f32 %v2286_v52, %v1024_v13 }
 0x222   :  { %v921_v41 = vpop.permute.xlu1 %920  ;;  %v871_v3 = vpop.permute.xlu0 %870 }
 0x223   :  { %v1104_v6 = vmax.f32 %v1055_v20, 0.0  ;;  %v1129_v27 = vmax.f32 %v1080_v21, 0.0  ;;  %v1025_v30 = vmax.f32 %v2212_v31, %v921_v41  ;;  %v1000_v48 = vmax.f32 %v2215_v34, %v871_v3 }
 0x225   :  { %1154 = vst.msk [vmem:[%s2585_s3 + $0x80] sm:$0xff] %vm1137_vm3, %v1104_v6  ;;  %1179 = vst.msk [vmem:[%s2585_s3 + $0x148] sm:$0xff] %vm1137_vm3, %v1129_v27  ;;  %v1081_v16 = vadd.f32 %v2286_v52, %v1025_v30  ;;  %v1056_v24 = vadd.f32 %v2286_v52, %v1000_v48 }
 0x226   :  { %v873_v32 = vpop.permute.xlu1 %872  ;;  %v923_v17 = vpop.permute.xlu0 %922 }
 0x227   :  { %v1130_v28 = vmax.f32 %v1081_v16, 0.0  ;;  %v1105_v31 = vmax.f32 %v1056_v24, 0.0  ;;  %v1001_v34 = vmax.f32 %v2222_v35, %v873_v32  ;;  %v1026_v7 = vmax.f32 %v2225_v38, %v923_v17 }
 0x229   :  { %1180 = vst.msk [vmem:[%s2585_s3 + $0x150] sm:$0xff] %vm1137_vm3, %v1130_v28  ;;  %1155 = vst.msk [vmem:[%s2585_s3 + $0x88] sm:$0xff] %vm1137_vm3, %v1105_v31  ;;  %v1057_v10 = vadd.f32 %v2286_v52, %v1001_v34  ;;  %v1082_v49 = vadd.f32 %v2286_v52, %v1026_v7 }
 0x22a   :  { %v925_v56 = vpop.permute.xlu1 %924  ;;  %v875_v29 = vpop.permute.xlu0 %874 }
 0x22b   :  { %v1106_v25 = vmax.f32 %v1057_v10, 0.0  ;;  %v1131_v35 = vmax.f32 %v1082_v49, 0.0  ;;  %v1027_v38 = vmax.f32 %v2232_v39, %v925_v56  ;;  %v1002_v59 = vmax.f32 %v2235_v42, %v875_v29 }
 0x22d   :  { %1156 = vst.msk [vmem:[%s2585_s3 + $0x90] sm:$0xff] %vm1137_vm3, %v1106_v25  ;;  %1181 = vst.msk [vmem:[%s2585_s3 + $0x158] sm:$0xff] %vm1137_vm3, %v1131_v35  ;;  %v1083_v58 = vadd.f32 %v2286_v52, %v1027_v38  ;;  %v1058_v11 = vadd.f32 %v2286_v52, %v1002_v59 }
 0x22e   :  { %v877_v14 = vpop.permute.xlu1 %876  ;;  %v927_v54 = vpop.permute.xlu0 %926 }
 0x22f   :  { %v1132_v37 = vmax.f32 %v1083_v58, 0.0  ;;  %v1107_v39 = vmax.f32 %v1058_v11, 0.0  ;;  %v1003_v42 = vmax.f32 %v2242_v43, %v877_v14  ;;  %v1028_v0 = vmax.f32 %v2245_v46, %v927_v54 }
 0x231   :  { %1182 = vst.msk [vmem:[%s2585_s3 + $0x160] sm:$0xff] %vm1137_vm3, %v1132_v37  ;;  %1157 = vst.msk [vmem:[%s2585_s3 + $0x98] sm:$0xff] %vm1137_vm3, %v1107_v39  ;;  %v1059_v61 = vadd.f32 %v2286_v52, %v1003_v42  ;;  %v1084_v57 = vadd.f32 %v2286_v52, %v1028_v0 }
 0x232   :  { %v929_v1 = vpop.permute.xlu1 %928  ;;  %v879_v15 = vpop.permute.xlu0 %878 }
 0x233   :  { %v1108_v18 = vmax.f32 %v1059_v61, 0.0  ;;  %v1133_v43 = vmax.f32 %v1084_v57, 0.0  ;;  %v1029_v46 = vmax.f32 %v2252_v47, %v929_v1  ;;  %v1004_v40 = vmax.f32 %v2255_v50, %v879_v15 }
 0x235   :  { %1158 = vst.msk [vmem:[%s2585_s3 + $0xa0] sm:$0xff] %vm1137_vm3, %v1108_v18  ;;  %1183 = vst.msk [vmem:[%s2585_s3 + $0x168] sm:$0xff] %vm1137_vm3, %v1133_v43  ;;  %v1085_v62 = vadd.f32 %v2286_v52, %v1029_v46  ;;  %v1060_v4 = vadd.f32 %v2286_v52, %v1004_v40 }
 0x236   :  { %v881_v33 = vpop.permute.xlu1 %880 }
 0x237   :  { %v1134_v5 = vmax.f32 %v1085_v62, 0.0  ;;  %v1109_v45 = vmax.f32 %v1060_v4, 0.0  ;;  %v1005_v47 = vmax.f32 %v2262_v51, %v881_v33 }
 0x239   :  { %1184 = vst.msk [vmem:[%s2585_s3 + $0x170] sm:$0xff] %vm1137_vm3, %v1134_v5  ;;  %1159 = vst.msk [vmem:[%s2585_s3 + $0xa8] sm:$0xff] %vm1137_vm3, %v1109_v45  ;;  %v1061_v50 = vadd.f32 %v2286_v52, %v1005_v47 }
 0x23a   :  { %v885_v19 = vpop.permute.xlu1 %884  ;;  %v883_v22 = vpop.permute.xlu0 %882 }
 0x23b   :  { %v1110_v12 = vmax.f32 %v1061_v50, 0.0  ;;  %v1007_v53 = vmax.f32 %v2270_v36, %v885_v19  ;;  %v1006_v63 = vmax.f32 %v2267_v55, %v883_v22 }
 0x23d   :  { %1160 = vst.msk [vmem:[%s2585_s3 + $0xb0] sm:$0xff] %vm1137_vm3, %v1110_v12  ;;  %v1063_v51 = vadd.f32 %v2286_v52, %v1007_v53  ;;  %v1062_v2 = vadd.f32 %v2286_v52, %v1006_v63 }
 0x23e   :  { %v933_v8 = vpop.permute.xlu1 %932  ;;  %v931_v9 = vpop.permute.xlu0 %930 }
 0x23f   :  { %v1112_v23 = vmax.f32 %v1063_v51, 0.0  ;;  %v1111_v26 = vmax.f32 %v1062_v2, 0.0  ;;  %v1031_v13 = vmax.f32 %v2280_v60, %v933_v8  ;;  %v1030_v20 = vmax.f32 %v2277_v44, %v931_v9 }
 0x241   :  { %1162 = vst.msk [vmem:[%s2585_s3 + $0xc0] sm:$0xff] %vm1137_vm3, %v1112_v23  ;;  %1161 = vst.msk [vmem:[%s2585_s3 + $0xb8] sm:$0xff] %vm1137_vm3, %v1111_v26  ;;  %v1087_v55 = vadd.f32 %v2286_v52, %v1031_v13  ;;  %v1086_v36 = vadd.f32 %v2286_v52, %v1030_v20 }
 0x243   :  { %v1136_v21 = vmax.f32 %v1087_v55, 0.0  ;;  %v1135_v41 = vmax.f32 %v1086_v36, 0.0 }
 0x245   :  { %1186 = vst.msk [vmem:[%s2585_s3 + $0x180] sm:$0xff] %vm1137_vm3, %v1136_v21  ;;  %1185 = vst.msk [vmem:[%s2585_s3 + $0x178] sm:$0xff] %vm1137_vm3, %v1135_v41 }
 0x246   :  { %1191 = vsyncpa [#allocation3], 1 }

// kernel: cnn2_forward.3
= control target key start
LH: loop header
LB: loop body
LE: loop exit
PB: predicated region body
PF: predicated region fallthrough
CT: control target
= control target key end

     0   :  { %v4777_v43 = vmov 1983009808   ;;  %v842_v45 = vlaneseq  ;;  %s7436_s0 = inlined_call_operand.vmem [shape: f32[2,6272], index: 0, kind: input, shape index: {}]   ;;  %s7437_s1 = inlined_call_operand.vmem [shape: f32[6272,128], index: 1, kind: input, shape index: {}]   ;;  %s7438_s2 = inlined_call_operand.vmem [shape: f32[1,128], index: 2, kind: input, shape index: {}]   ;;  %s7439_s3 = inlined_call_operand.vmem [shape: f32[128,10], index: 3, kind: input, shape index: {}]   ;;  %s7440_s4 = inlined_call_operand.vmem [shape: f32[1,10], index: 4, kind: input, shape index: {}]   ;;  %s7441_s5 = inlined_call_operand.hbm [shape: f32[2,10], index: 5, kind: output, shape index: {}]  }
   0x1   :  { %v50_v0 = vld [vmem:[%s7437_s1 + $0x80] sm:$0xff]  ;;  %v51_v1 = vld [vmem:[%s7437_s1 + $0x88] sm:$0xff]  ;;  %v52_v11 = vld [vmem:[%s7437_s1 + $0x90] sm:$0xff]  ;;  %v840_v44 = vunpack.c.l.s4 %v4777_v43 }
   0x2   :  { %v34_v2 = vld [vmem:[%s7437_s1] sm:$0xff]  ;;  %v3916_v3 = vpack.c.bf16 %v51_v1, %v50_v0  ;;  %v35_v4 = vld [vmem:[%s7437_s1 + $0x8] sm:$0xff]  ;;  %v53_v13 = vld [vmem:[%s7437_s1 + $0x98] sm:$0xff]  ;;  %v843_v60 = vshrl.u32 %v842_v45, 7 }
   0x3   :  { %v82_v5 = vld [vmem:[%s7437_s1 + $0x180] sm:$0xff]  ;;  %v83_v6 = vld [vmem:[%s7437_s1 + $0x188] sm:$0xff]  ;;  %v3918_v7 = vpack.c.bf16 %v35_v4, %v34_v2  ;;  %v36_v14 = vld [vmem:[%s7437_s1 + $0x10] sm:$0xff]  ;;  %v3920_v16 = vpack.c.bf16 %v53_v13, %v52_v11  ;;  %v841_v59 = vunpack.c.0.s8 %v840_v44 }
   0x4   :  { %v3948_v8 = vpack.c.bf16 %v83_v6, %v82_v5  ;;  %v66_v9 = vld [vmem:[%s7437_s1 + $0x100] sm:$0xff]  ;;  %v67_v10 = vld [vmem:[%s7437_s1 + $0x108] sm:$0xff]  ;;  %3917 = vmatprep.subr.bf16.mxu0 %v3916_v3  ;;  %v37_v15 = vld [vmem:[%s7437_s1 + $0x18] sm:$0xff] }
   0x5   :  { %v3950_v12 = vpack.c.bf16 %v67_v10, %v66_v9  ;;  %3919 = vmatpush3.bf16.msra.mxu0 %v3918_v7  ;;  %v3922_v17 = vpack.c.bf16 %v37_v15, %v36_v14  ;;  %v84_v18 = vld [vmem:[%s7437_s1 + $0x190] sm:$0xff]  ;;  %v85_v19 = vld [vmem:[%s7437_s1 + $0x198] sm:$0xff]  ;;  %v54_v23 = vld [vmem:[%s7437_s1 + $0xa0] sm:$0xff]  ;;  %v4956_v10 = vsub.s32 %v841_v59, %v843_v60 }
   0x6   :  { %3949 = vmatprep.subr.bf16.mxu1 %v3948_v8  ;;  %v68_v20 = vld [vmem:[%s7437_s1 + $0x110] sm:$0xff]  ;;  %v3952_v21 = vpack.c.bf16 %v85_v19, %v84_v18  ;;  %v69_v22 = vld [vmem:[%s7437_s1 + $0x118] sm:$0xff]  ;;  %v55_v24 = vld [vmem:[%s7437_s1 + $0xa8] sm:$0xff]  ;;  %3921 = vmatprep.subr.bf16.mxu0 %v3920_v16 }
   0x7   :  { %3951 = vmatpush3.bf16.msra.mxu1 %v3950_v12  ;;  %v3954_v25 = vpack.c.bf16 %v69_v22, %v68_v20  ;;  %v3924_v26 = vpack.c.bf16 %v55_v24, %v54_v23  ;;  %v38_v27 = vld [vmem:[%s7437_s1 + $0x20] sm:$0xff]  ;;  %v39_v28 = vld [vmem:[%s7437_s1 + $0x28] sm:$0xff]  ;;  %v56_v35 = vld [vmem:[%s7437_s1 + $0xb0] sm:$0xff] }
   0x8   :  { %v86_v29 = vld [vmem:[%s7437_s1 + $0x1a0] sm:$0xff]  ;;  %3953 = vmatprep.subr.bf16.mxu1 %v3952_v21  ;;  %v87_v30 = vld [vmem:[%s7437_s1 + $0x1a8] sm:$0xff]  ;;  %v3926_v33 = vpack.c.bf16 %v39_v28, %v38_v27  ;;  %v57_v36 = vld [vmem:[%s7437_s1 + $0xb8] sm:$0xff] }
   0x9   :  { %v70_v31 = vld [vmem:[%s7437_s1 + $0x120] sm:$0xff]  ;;  %v71_v32 = vld [vmem:[%s7437_s1 + $0x128] sm:$0xff]  ;;  %3923 = vmatpush3.bf16.msra.mxu0 %v3922_v17  ;;  %v3956_v34 = vpack.c.bf16 %v87_v30, %v86_v29  ;;  %v40_v37 = vld [vmem:[%s7437_s1 + $0x30] sm:$0xff]  ;;  %v3928_v39 = vpack.c.bf16 %v57_v36, %v56_v35 }
   0xa   :  { %3925 = vmatprep.subr.bf16.mxu0 %v3924_v26  ;;  %v3958_v38 = vpack.c.bf16 %v71_v32, %v70_v31  ;;  %v41_v40 = vld [vmem:[%s7437_s1 + $0x38] sm:$0xff]  ;;  %v88_v41 = vld [vmem:[%s7437_s1 + $0x1b0] sm:$0xff]  ;;  %v58_v49 = vld [vmem:[%s7437_s1 + $0xc0] sm:$0xff] }
   0xb   :  { %3955 = vmatpush3.bf16.msra.mxu1 %v3954_v25  ;;  %v89_v42 = vld [vmem:[%s7437_s1 + $0x1b8] sm:$0xff]  ;;  %v72_v47 = vld [vmem:[%s7437_s1 + $0x130] sm:$0xff]  ;;  %v59_v50 = vld [vmem:[%s7437_s1 + $0xc8] sm:$0xff]  ;;  %v3930_v51 = vpack.c.bf16 %v41_v40, %v40_v37 }
   0xc   :  { %3957 = vmatprep.subr.bf16.mxu1 %v3956_v34  ;;  %v3960_v46 = vpack.c.bf16 %v89_v42, %v88_v41  ;;  %v73_v48 = vld [vmem:[%s7437_s1 + $0x138] sm:$0xff]  ;;  %v90_v52 = vld [vmem:[%s7437_s1 + $0x1c0] sm:$0xff]  ;;  %v91_v53 = vld [vmem:[%s7437_s1 + $0x1c8] sm:$0xff]  ;;  %v3932_v55 = vpack.c.bf16 %v59_v50, %v58_v49 }
   0xd   :  { %3927 = vmatpush3.bf16.msra.mxu0 %v3926_v33  ;;  %v3962_v54 = vpack.c.bf16 %v73_v48, %v72_v47  ;;  %v42_v56 = vld [vmem:[%s7437_s1 + $0x40] sm:$0xff]  ;;  %v43_v57 = vld [vmem:[%s7437_s1 + $0x48] sm:$0xff]  ;;  %v3964_v61 = vpack.c.bf16 %v91_v53, %v90_v52  ;;  %v60_v63 = vld [vmem:[%s7437_s1 + $0xd0] sm:$0xff] }
   0xe   :  { %3929 = vmatprep.subr.bf16.mxu0 %v3928_v39  ;;  %v74_v58 = vld [vmem:[%s7437_s1 + $0x140] sm:$0xff]  ;;  %v75_v62 = vld [vmem:[%s7437_s1 + $0x148] sm:$0xff]  ;;  %v61_v0 = vld [vmem:[%s7437_s1 + $0xd8] sm:$0xff]  ;;  %v3934_v3 = vpack.c.bf16 %v43_v57, %v42_v56 }
   0xf   :  { %3959 = vmatpush3.bf16.msra.mxu1 %v3958_v38  ;;  %v92_v1 = vld [vmem:[%s7437_s1 + $0x1d0] sm:$0xff]  ;;  %v93_v2 = vld [vmem:[%s7437_s1 + $0x1d8] sm:$0xff]  ;;  %v3966_v5 = vpack.c.bf16 %v75_v62, %v74_v58  ;;  %v3936_v6 = vpack.c.bf16 %v61_v0, %v60_v63  ;;  %v62_v12 = vld [vmem:[%s7437_s1 + $0xe0] sm:$0xff] }
  0x10   :  { %3961 = vmatprep.subr.bf16.mxu1 %v3960_v46  ;;  %v44_v4 = vld [vmem:[%s7437_s1 + $0x50] sm:$0xff]  ;;  %v45_v7 = vld [vmem:[%s7437_s1 + $0x58] sm:$0xff]  ;;  %v3968_v11 = vpack.c.bf16 %v93_v2, %v92_v1  ;;  %v63_v13 = vld [vmem:[%s7437_s1 + $0xe8] sm:$0xff] }
  0x11   :  { %3931 = vmatpush3.bf16.msra.mxu0 %v3930_v51  ;;  %v76_v8 = vld [vmem:[%s7437_s1 + $0x150] sm:$0xff]  ;;  %v77_v9 = vld [vmem:[%s7437_s1 + $0x158] sm:$0xff]  ;;  %v94_v14 = vld [vmem:[%s7437_s1 + $0x1e0] sm:$0xff]  ;;  %v3938_v16 = vpack.c.bf16 %v45_v7, %v44_v4  ;;  %v3940_v19 = vpack.c.bf16 %v63_v13, %v62_v12 }
  0x12   :  { %3933 = vmatprep.subr.bf16.mxu0 %v3932_v55  ;;  %v95_v15 = vld [vmem:[%s7437_s1 + $0x1e8] sm:$0xff]  ;;  %v3970_v17 = vpack.c.bf16 %v77_v9, %v76_v8  ;;  %v21_v18 = vld [vmem:[%s7436_s0] sm:$0xff]  ;;  %v64_v27 = vld [vmem:[%s7437_s1 + $0xf0] sm:$0xff] }
  0x13   :  { %3963 = vmatpush3.bf16.msra.mxu1 %v3962_v54  ;;  %v46_v20 = vld [vmem:[%s7437_s1 + $0x60] sm:$0xff]  ;;  %v47_v21 = vld [vmem:[%s7437_s1 + $0x68] sm:$0xff]  ;;  %v845_v23 = vrot.slane %v21_v18, %v4956_v10  ;;  %v838_v24 = vcombine.high %v21_v18, %v21_v18  ;;  %v3972_v25 = vpack.c.bf16 %v95_v15, %v94_v14  ;;  %v65_v28 = vld [vmem:[%s7437_s1 + $0xf8] sm:$0xff] }
  0x14   :  { %3965 = vmatprep.subr.bf16.mxu1 %v3964_v61  ;;  %v78_v22 = vld [vmem:[%s7437_s1 + $0x160] sm:$0xff]  ;;  %v79_v26 = vld [vmem:[%s7437_s1 + $0x168] sm:$0xff]  ;;  %v96_v29 = vld [vmem:[%s7437_s1 + $0x1f0] sm:$0xff]  ;;  %v3942_v33 = vpack.c.bf16 %v47_v21, %v46_v20  ;;  %v3944_v35 = vpack.c.bf16 %v65_v28, %v64_v27 }
  0x15   :  { %3935 = vmatpush3.bf16.msra.mxu0 %v3934_v3  ;;  %v97_v30 = vld [vmem:[%s7437_s1 + $0x1f8] sm:$0xff]  ;;  %v853_v31 = vcombine.high %v845_v23, %v845_v23  ;;  %v852_v32 = vrot.slane %v838_v24, %v4956_v10  ;;  %v3974_v34 = vpack.c.bf16 %v79_v26, %v78_v22  ;;  %v48_v36 = vld [vmem:[%s7437_s1 + $0x70] sm:$0xff]  ;;  %v114_v42 = vld [vmem:[%s7437_s1 + $0x280] sm:$0xff] }
  0x16   :  { %3937 = vmatprep.subr.bf16.mxu0 %v3936_v6  ;;  %v49_v37 = vld [vmem:[%s7437_s1 + $0x78] sm:$0xff]  ;;  %v80_v38 = vld [vmem:[%s7437_s1 + $0x170] sm:$0xff]  ;;  %v3976_v40 = vpack.c.bf16 %v97_v30, %v96_v29  ;;  %v115_v43 = vld [vmem:[%s7437_s1 + $0x288] sm:$0xff] }
  0x17   :  { %3967 = vmatpush3.bf16.msra.mxu1 %v3966_v5  ;;  %v854_v39 = vcombine.high %v852_v32, %v852_v32  ;;  %1162 = vmatprep.mubr.f32.mxu0 %v853_v31  ;;  %v81_v41 = vld [vmem:[%s7437_s1 + $0x178] sm:$0xff]  ;;  %v146_v44 = vld [vmem:[%s7437_s1 + $0x380] sm:$0xff]  ;;  %v147_v45 = vld [vmem:[%s7437_s1 + $0x388] sm:$0xff]  ;;  %v3946_v46 = vpack.c.bf16 %v49_v37, %v48_v36  ;;  %v3980_v48 = vpack.c.bf16 %v115_v43, %v114_v42 }
  0x18   :  { %3969 = vmatprep.subr.bf16.mxu1 %v3968_v11  ;;  %v3978_v47 = vpack.c.bf16 %v81_v41, %v80_v38  ;;  %v98_v49 = vld [vmem:[%s7437_s1 + $0x200] sm:$0xff]  ;;  %v99_v50 = vld [vmem:[%s7437_s1 + $0x208] sm:$0xff]  ;;  %v4012_v52 = vpack.c.bf16 %v147_v45, %v146_v44  ;;  %v116_v54 = vld [vmem:[%s7437_s1 + $0x290] sm:$0xff] }
  0x19   :  { %3939 = vmatpush3.bf16.msra.mxu0 %v3938_v16  ;;  %1232 = vmatprep.mubr.f32.mxu1 %v854_v39  ;;  %v130_v51 = vld [vmem:[%s7437_s1 + $0x300] sm:$0xff]  ;;  %v131_v53 = vld [vmem:[%s7437_s1 + $0x308] sm:$0xff]  ;;  %v117_v55 = vld [vmem:[%s7437_s1 + $0x298] sm:$0xff]  ;;  %v3982_v58 = vpack.c.bf16 %v99_v50, %v98_v49 }
  0x1a   :  { %3941 = vmatprep.subr.bf16.mxu0 %v3940_v19  ;;  %v148_v56 = vld [vmem:[%s7437_s1 + $0x390] sm:$0xff]  ;;  %v149_v57 = vld [vmem:[%s7437_s1 + $0x398] sm:$0xff]  ;;  %v4014_v59 = vpack.c.bf16 %v131_v53, %v130_v51  ;;  %v3984_v60 = vpack.c.bf16 %v117_v55, %v116_v54  ;;  %v118_v2 = vld [vmem:[%s7437_s1 + $0x2a0] sm:$0xff] }
  0x1b   :  { %3971 = vmatpush3.bf16.msra.mxu1 %v3970_v17  ;;  %v100_v61 = vld [vmem:[%s7437_s1 + $0x210] sm:$0xff]  ;;  %v101_v62 = vld [vmem:[%s7437_s1 + $0x218] sm:$0xff]  ;;  %v4016_v0 = vpack.c.bf16 %v149_v57, %v148_v56  ;;  %v119_v3 = vld [vmem:[%s7437_s1 + $0x2a8] sm:$0xff] }
  0x1c   :  { %3973 = vmatprep.subr.bf16.mxu1 %v3972_v25  ;;  %v132_v63 = vld [vmem:[%s7437_s1 + $0x310] sm:$0xff]  ;;  %v133_v1 = vld [vmem:[%s7437_s1 + $0x318] sm:$0xff]  ;;  %v150_v4 = vld [vmem:[%s7437_s1 + $0x3a0] sm:$0xff]  ;;  %v3986_v6 = vpack.c.bf16 %v101_v62, %v100_v61  ;;  %v3988_v8 = vpack.c.bf16 %v119_v3, %v118_v2 }
  0x1d   :  { %3943 = vmatpush3.bf16.msra.mxu0 %v3942_v33  ;;  %v151_v5 = vld [vmem:[%s7437_s1 + $0x3a8] sm:$0xff]  ;;  %v4018_v7 = vpack.c.bf16 %v133_v1, %v132_v63  ;;  %v102_v9 = vld [vmem:[%s7437_s1 + $0x220] sm:$0xff]  ;;  %v120_v15 = vld [vmem:[%s7437_s1 + $0x2b0] sm:$0xff] }
  0x1e   :  { %3945 = vmatprep.subr.bf16.mxu0 %v3944_v35  ;;  %v103_v11 = vld [vmem:[%s7437_s1 + $0x228] sm:$0xff]  ;;  %v134_v12 = vld [vmem:[%s7437_s1 + $0x320] sm:$0xff]  ;;  %v4020_v13 = vpack.c.bf16 %v151_v5, %v150_v4  ;;  %v121_v16 = vld [vmem:[%s7437_s1 + $0x2b8] sm:$0xff] }
  0x1f   :  { %3975 = vmatpush3.bf16.msra.mxu1 %v3974_v34  ;;  %v135_v14 = vld [vmem:[%s7437_s1 + $0x328] sm:$0xff]  ;;  %v152_v17 = vld [vmem:[%s7437_s1 + $0x3b0] sm:$0xff]  ;;  %v153_v18 = vld [vmem:[%s7437_s1 + $0x3b8] sm:$0xff]  ;;  %v3990_v19 = vpack.c.bf16 %v103_v11, %v102_v9  ;;  %v3992_v22 = vpack.c.bf16 %v121_v16, %v120_v15 }
  0x20   :  { %3977 = vmatprep.subr.bf16.mxu1 %v3976_v40  ;;  %v104_v20 = vld [vmem:[%s7437_s1 + $0x230] sm:$0xff]  ;;  %v4022_v21 = vpack.c.bf16 %v135_v14, %v134_v12  ;;  %v137_v25 = vld [vmem:[%s7437_s1 + $0x338] sm:$0xff]  ;;  %v4024_v26 = vpack.c.bf16 %v153_v18, %v152_v17  ;;  %v122_v27 = vld [vmem:[%s7437_s1 + $0x2c0] sm:$0xff] }
  0x21   :  { %3947 = vmatpush3.bf16.msra.mxu0 %v3946_v46  ;;  %v136_v24 = vld [vmem:[%s7437_s1 + $0x330] sm:$0xff]  ;;  %v123_v28 = vld [vmem:[%s7437_s1 + $0x2c8] sm:$0xff]  ;;  %v154_v30 = vld [vmem:[%s7437_s1 + $0x3c0] sm:$0xff] }
  0x22   :  { %3981 = vmatprep.subr.bf16.mxu0 %v3980_v48  ;;  %v22_v29 = vld [vmem:[%s7436_s0 + $0x8] sm:$0xff]  ;;  %v4026_v35 = vpack.c.bf16 %v137_v25, %v136_v24  ;;  %v3996_v36 = vpack.c.bf16 %v123_v28, %v122_v27  ;;  %v106_v37 = vld [vmem:[%s7437_s1 + $0x240] sm:$0xff]  ;;  %v124_v44 = vld [vmem:[%s7437_s1 + $0x2d0] sm:$0xff] }
  0x23   :  { %3979 = vmatpush3.bf16.msra.mxu1 %v3978_v47  ;;  %v155_v31 = vld [vmem:[%s7437_s1 + $0x3c8] sm:$0xff]  ;;  %v855_v33 = vcombine.high %v22_v29, %v22_v29  ;;  %v138_v39 = vld [vmem:[%s7437_s1 + $0x340] sm:$0xff]  ;;  %v125_v45 = vld [vmem:[%s7437_s1 + $0x2d8] sm:$0xff] }
  0x24   :  { %4013 = vmatprep.subr.bf16.mxu1 %v4012_v52  ;;  %1163 = vmatmul.mubr.f32.vlgmr.msra.gmra.mrb[0].mxu0 %v845_v23  ;;  %v105_v23 = vld [vmem:[%s7437_s1 + $0x238] sm:$0xff]  ;;  %v107_v38 = vld [vmem:[%s7437_s1 + $0x248] sm:$0xff]  ;;  %v4028_v42 = vpack.c.bf16 %v155_v31, %v154_v30  ;;  %v156_v46 = vld [vmem:[%s7437_s1 + $0x3d0] sm:$0xff]  ;;  %v4000_v51 = vpack.c.bf16 %v125_v45, %v124_v44 }
  0x25   :  { %3983 = vmatpush3.bf16.msra.mxu0 %v3982_v58  ;;  %v3994_v34 = vpack.c.bf16 %v105_v23, %v104_v20  ;;  %v5137_v41 = vrot.slane %v855_v33, %v4956_v10  ;;  %v139_v43 = vld [vmem:[%s7437_s1 + $0x348] sm:$0xff]  ;;  %v157_v47 = vld [vmem:[%s7437_s1 + $0x3d8] sm:$0xff]  ;;  %v3998_v49 = vpack.c.bf16 %v107_v38, %v106_v37  ;;  %v108_v52 = vld [vmem:[%s7437_s1 + $0x250] sm:$0xff] }
  0x26   :  { %1233 = vmatmul.mubr.f32.vlgmr.msra.gmra.mrb[0].mxu1 %v852_v32  ;;  %3985 = vmatprep.subr.bf16.mxu0 %v3984_v60  ;;  %v5123_v32 = vrot.slane %v22_v29, %v4956_v10  ;;  %v4030_v50 = vpack.c.bf16 %v139_v43, %v138_v39  ;;  %v109_v53 = vld [vmem:[%s7437_s1 + $0x258] sm:$0xff]  ;;  %v140_v54 = vld [vmem:[%s7437_s1 + $0x350] sm:$0xff]  ;;  %v4032_v55 = vpack.c.bf16 %v157_v47, %v156_v46  ;;  %v126_v57 = vld [vmem:[%s7437_s1 + $0x2e0] sm:$0xff] }
  0x27   :  { %4015 = vmatpush3.bf16.msra.mxu1 %v4014_v59  ;;  %v871_v48 = vcombine.high %v5137_v41, %v5137_v41  ;;  %v141_v56 = vld [vmem:[%s7437_s1 + $0x358] sm:$0xff]  ;;  %v127_v58 = vld [vmem:[%s7437_s1 + $0x2e8] sm:$0xff]  ;;  %v158_v59 = vld [vmem:[%s7437_s1 + $0x3e0] sm:$0xff]  ;;  %v4002_v61 = vpack.c.bf16 %v109_v53, %v108_v52 }
  0x28   :  { %4017 = vmatprep.subr.bf16.mxu1 %v4016_v0  ;;  %v870_v40 = vcombine.high %v5123_v32, %v5123_v32  ;;  %v159_v60 = vld [vmem:[%s7437_s1 + $0x3e8] sm:$0xff]  ;;  %v4034_v62 = vpack.c.bf16 %v141_v56, %v140_v54  ;;  %v4004_v63 = vpack.c.bf16 %v127_v58, %v126_v57  ;;  %v110_v0 = vld [vmem:[%s7437_s1 + $0x260] sm:$0xff]  ;;  %v128_v5 = vld [vmem:[%s7437_s1 + $0x2f0] sm:$0xff] }
  0x29   :  { %3987 = vmatpush3.bf16.msra.mxu0 %v3986_v6  ;;  %1372 = vmatprep.mubr.f32.mxu1 %v871_v48  ;;  %v111_v1 = vld [vmem:[%s7437_s1 + $0x268] sm:$0xff]  ;;  %v142_v2 = vld [vmem:[%s7437_s1 + $0x360] sm:$0xff]  ;;  %v4036_v3 = vpack.c.bf16 %v159_v60, %v158_v59  ;;  %v129_v6 = vld [vmem:[%s7437_s1 + $0x2f8] sm:$0xff] }
  0x2a   :  { %3989 = vmatprep.subr.bf16.mxu0 %v3988_v8  ;;  %1302 = vmatprep.mubr.f32.mxu0 %v870_v40  ;;  %v143_v4 = vld [vmem:[%s7437_s1 + $0x368] sm:$0xff]  ;;  %v161_v8 = vld [vmem:[%s7437_s1 + $0x3f8] sm:$0xff]  ;;  %v4006_v9 = vpack.c.bf16 %v111_v1, %v110_v0  ;;  %v4008_v12 = vpack.c.bf16 %v129_v6, %v128_v5  ;;  %v144_v15 = vld [vmem:[%s7437_s1 + $0x370] sm:$0xff] }
  0x2b   :  { %4019 = vmatpush3.bf16.msra.mxu1 %v4018_v7  ;;  %v160_v7 = vld [vmem:[%s7437_s1 + $0x3f0] sm:$0xff]  ;;  %v4038_v11 = vpack.c.bf16 %v143_v4, %v142_v2  ;;  %v113_v14 = vld [vmem:[%s7437_s1 + $0x278] sm:$0xff]  ;;  %v178_v18 = vld [vmem:[%s7437_s1 + $0x480] sm:$0xff] }
  0x2c   :  { %4021 = vmatprep.subr.bf16.mxu1 %v4020_v13  ;;  %v112_v13 = vld [vmem:[%s7437_s1 + $0x270] sm:$0xff]  ;;  %v4040_v16 = vpack.c.bf16 %v161_v8, %v160_v7  ;;  %v145_v17 = vld [vmem:[%s7437_s1 + $0x378] sm:$0xff]  ;;  %v210_v20 = vld [vmem:[%s7437_s1 + $0x580] sm:$0xff] }
  0x2d   :  { %3991 = vmatpush3.bf16.msra.mxu0 %v3990_v19  ;;  %v179_v19 = vld [vmem:[%s7437_s1 + $0x488] sm:$0xff]  ;;  %v162_v23 = vld [vmem:[%s7437_s1 + $0x400] sm:$0xff]  ;;  %v4042_v24 = vpack.c.bf16 %v145_v17, %v144_v15  ;;  %v180_v30 = vld [vmem:[%s7437_s1 + $0x490] sm:$0xff] }
  0x2e   :  { %3993 = vmatprep.subr.bf16.mxu0 %v3992_v22  ;;  %v4010_v22 = vpack.c.bf16 %v113_v14, %v112_v13  ;;  %v4044_v25 = vpack.c.bf16 %v179_v19, %v178_v18  ;;  %v194_v27 = vld [vmem:[%s7437_s1 + $0x500] sm:$0xff]  ;;  %v195_v28 = vld [vmem:[%s7437_s1 + $0x508] sm:$0xff]  ;;  %v181_v31 = vld [vmem:[%s7437_s1 + $0x498] sm:$0xff] }
  0x2f   :  { %4023 = vmatpush3.bf16.msra.mxu1 %v4022_v21  ;;  %v211_v21 = vld [vmem:[%s7437_s1 + $0x588] sm:$0xff]  ;;  %v212_v33 = vld [vmem:[%s7437_s1 + $0x590] sm:$0xff]  ;;  %v4048_v38 = vpack.c.bf16 %v181_v31, %v180_v30  ;;  %v165_v40 = vld [vmem:[%s7437_s1 + $0x418] sm:$0xff] }
  0x30   :  { %4025 = vmatprep.subr.bf16.mxu1 %v4024_v26  ;;  %v163_v26 = vld [vmem:[%s7437_s1 + $0x408] sm:$0xff]  ;;  %v4076_v29 = vpack.c.bf16 %v211_v21, %v210_v20  ;;  %v23_v37 = vld [vmem:[%s7436_s0 + $0x10] sm:$0xff]  ;;  %v197_v46 = vld [vmem:[%s7437_s1 + $0x518] sm:$0xff] }
  0x31   :  { %3995 = vmatpush3.bf16.msra.mxu0 %v3994_v34  ;;  %v213_v34 = vld [vmem:[%s7437_s1 + $0x598] sm:$0xff]  ;;  %v164_v39 = vld [vmem:[%s7437_s1 + $0x410] sm:$0xff]  ;;  %v5265_v43 = vrot.slane %v23_v37, %v4956_v10  ;;  %v872_v44 = vcombine.high %v23_v37, %v23_v37  ;;  %v182_v47 = vld [vmem:[%s7437_s1 + $0x4a0] sm:$0xff] }
  0x32   :  { %3997 = vmatprep.subr.bf16.mxu0 %v3996_v36  ;;  %v4078_v36 = vpack.c.bf16 %v195_v28, %v194_v27  ;;  %v4080_v45 = vpack.c.bf16 %v213_v34, %v212_v33  ;;  %v183_v48 = vld [vmem:[%s7437_s1 + $0x4a8] sm:$0xff]  ;;  %v4050_v53 = vpack.c.bf16 %v165_v40, %v164_v39  ;;  %v198_v57 = vld [vmem:[%s7437_s1 + $0x520] sm:$0xff]  ;;  %v184_v60 = vld [vmem:[%s7437_s1 + $0x4b0] sm:$0xff] }
  0x33   :  { %4027 = vmatpush3.bf16.msra.mxu1 %v4026_v35  ;;  %v4046_v35 = vpack.c.bf16 %v163_v26, %v162_v23  ;;  %v5286_v52 = vrot.slane %v872_v44, %v4956_v10  ;;  %v4052_v54 = vpack.c.bf16 %v183_v48, %v182_v47  ;;  %v167_v56 = vld [vmem:[%s7437_s1 + $0x428] sm:$0xff]  ;;  %v169_v4 = vld [vmem:[%s7437_s1 + $0x438] sm:$0xff]  ;;  %v200_v5 = vld [vmem:[%s7437_s1 + $0x530] sm:$0xff] }
  0x34   :  { %4029 = vmatprep.subr.bf16.mxu1 %v4028_v42  ;;  %v196_v42 = vld [vmem:[%s7437_s1 + $0x510] sm:$0xff]  ;;  %v199_v59 = vld [vmem:[%s7437_s1 + $0x528] sm:$0xff]  ;;  %v201_v7 = vld [vmem:[%s7437_s1 + $0x538] sm:$0xff] }
  0x35   :  { %3999 = vmatpush3.bf16.msra.mxu0 %v3998_v49  ;;  %v214_v49 = vld [vmem:[%s7437_s1 + $0x5a0] sm:$0xff]  ;;  %v4086_v1 = vpack.c.bf16 %v199_v59, %v198_v57  ;;  %v4090_v14 = vpack.c.bf16 %v201_v7, %v200_v5  ;;  %v171_v17 = vld [vmem:[%s7437_s1 + $0x448] sm:$0xff]  ;;  %v188_v21 = vld [vmem:[%s7437_s1 + $0x4d0] sm:$0xff] }
  0x36   :  { %4001 = vmatprep.subr.bf16.mxu0 %v4000_v51  ;;  %v887_v51 = vcombine.high %v5265_v43, %v5265_v43  ;;  %v186_v8 = vld [vmem:[%s7437_s1 + $0x4c0] sm:$0xff]  ;;  %v203_v20 = vld [vmem:[%s7437_s1 + $0x548] sm:$0xff]  ;;  %v220_v23 = vld [vmem:[%s7437_s1 + $0x5d0] sm:$0xff] }
  0x37   :  { %4031 = vmatpush3.bf16.msra.mxu1 %v4030_v50  ;;  %v215_v50 = vld [vmem:[%s7437_s1 + $0x5a8] sm:$0xff]  ;;  %v202_v18 = vld [vmem:[%s7437_s1 + $0x540] sm:$0xff]  ;;  %v172_v28 = vld [vmem:[%s7437_s1 + $0x450] sm:$0xff] }
  0x38   :  { %4033 = vmatprep.subr.bf16.mxu1 %v4032_v55  ;;  %v166_v55 = vld [vmem:[%s7437_s1 + $0x420] sm:$0xff]  ;;  %v4084_v58 = vpack.c.bf16 %v215_v50, %v214_v49  ;;  %v4094_v26 = vpack.c.bf16 %v203_v20, %v202_v18  ;;  %v204_v30 = vld [vmem:[%s7437_s1 + $0x550] sm:$0xff]  ;;  %v205_v33 = vld [vmem:[%s7437_s1 + $0x558] sm:$0xff] }
  0x39   :  { %4003 = vmatpush3.bf16.msra.mxu0 %v4002_v61  ;;  %v185_v61 = vld [vmem:[%s7437_s1 + $0x4b8] sm:$0xff]  ;;  %v4054_v0 = vpack.c.bf16 %v167_v56, %v166_v55  ;;  %v190_v34 = vld [vmem:[%s7437_s1 + $0x4e0] sm:$0xff]  ;;  %v223_v37 = vld [vmem:[%s7437_s1 + $0x5e8] sm:$0xff]  ;;  %v4098_v39 = vpack.c.bf16 %v205_v33, %v204_v30 }
  0x3a   :  { %4005 = vmatprep.subr.bf16.mxu0 %v4004_v63  ;;  %v217_v63 = vld [vmem:[%s7437_s1 + $0x5b8] sm:$0xff]  ;;  %v4056_v2 = vpack.c.bf16 %v185_v61, %v184_v60  ;;  %v175_v44 = vld [vmem:[%s7437_s1 + $0x468] sm:$0xff]  ;;  %v192_v48 = vld [vmem:[%s7437_s1 + $0x4f0] sm:$0xff] }
  0x3b   :  { %4035 = vmatpush3.bf16.msra.mxu1 %v4034_v62  ;;  %v216_v62 = vld [vmem:[%s7437_s1 + $0x5b0] sm:$0xff]  ;;  %v207_v47 = vld [vmem:[%s7437_s1 + $0x568] sm:$0xff]  ;;  %v193_v49 = vld [vmem:[%s7437_s1 + $0x4f8] sm:$0xff] }
  0x3c   :  { %4037 = vmatprep.subr.bf16.mxu1 %v4036_v3  ;;  %v168_v3 = vld [vmem:[%s7437_s1 + $0x430] sm:$0xff]  ;;  %v4088_v6 = vpack.c.bf16 %v217_v63, %v216_v62  ;;  %v4072_v55 = vpack.c.bf16 %v193_v49, %v192_v48  ;;  %v177_v57 = vld [vmem:[%s7437_s1 + $0x478] sm:$0xff]  ;;  %v242_v60 = vld [vmem:[%s7437_s1 + $0x680] sm:$0xff] }
  0x3d   :  { %4007 = vmatpush3.bf16.msra.mxu0 %v4006_v9  ;;  %v187_v9 = vld [vmem:[%s7437_s1 + $0x4c8] sm:$0xff]  ;;  %v4058_v13 = vpack.c.bf16 %v169_v4, %v168_v3  ;;  %v224_v50 = vld [vmem:[%s7437_s1 + $0x5f0] sm:$0xff]  ;;  %v209_v59 = vld [vmem:[%s7437_s1 + $0x578] sm:$0xff] }
  0x3e   :  { %4009 = vmatprep.subr.bf16.mxu0 %v4008_v12  ;;  %v219_v12 = vld [vmem:[%s7437_s1 + $0x5c8] sm:$0xff]  ;;  %v4060_v15 = vpack.c.bf16 %v187_v9, %v186_v8  ;;  %v176_v56 = vld [vmem:[%s7437_s1 + $0x470] sm:$0xff]  ;;  %v274_v62 = vld [vmem:[%s7437_s1 + $0x780] sm:$0xff] }
  0x3f   :  { %4039 = vmatpush3.bf16.msra.mxu1 %v4038_v11  ;;  %v218_v11 = vld [vmem:[%s7437_s1 + $0x5c0] sm:$0xff]  ;;  %v243_v61 = vld [vmem:[%s7437_s1 + $0x688] sm:$0xff]  ;;  %v244_v9 = vld [vmem:[%s7437_s1 + $0x690] sm:$0xff] }
  0x40   :  { %4041 = vmatprep.subr.bf16.mxu1 %v4040_v16  ;;  %v170_v16 = vld [vmem:[%s7437_s1 + $0x440] sm:$0xff]  ;;  %v4092_v19 = vpack.c.bf16 %v219_v12, %v218_v11  ;;  %v275_v63 = vld [vmem:[%s7437_s1 + $0x788] sm:$0xff]  ;;  %v4108_v3 = vpack.c.bf16 %v243_v61, %v242_v60  ;;  %v245_v11 = vld [vmem:[%s7437_s1 + $0x698] sm:$0xff] }
  0x41   :  { %4011 = vmatpush3.bf16.msra.mxu0 %v4010_v22  ;;  %v189_v22 = vld [vmem:[%s7437_s1 + $0x4d8] sm:$0xff]  ;;  %v226_v4 = vld [vmem:[%s7437_s1 + $0x600] sm:$0xff]  ;;  %v227_v5 = vld [vmem:[%s7437_s1 + $0x608] sm:$0xff]  ;;  %v4140_v7 = vpack.c.bf16 %v275_v63, %v274_v62  ;;  %v4112_v18 = vpack.c.bf16 %v245_v11, %v244_v9 }
  0x42   :  { %4045 = vmatprep.subr.bf16.mxu0 %v4044_v25  ;;  %v4062_v25 = vpack.c.bf16 %v171_v17, %v170_v16  ;;  %v4064_v27 = vpack.c.bf16 %v189_v22, %v188_v21  ;;  %v259_v8 = vld [vmem:[%s7437_s1 + $0x708] sm:$0xff]  ;;  %v4110_v16 = vpack.c.bf16 %v227_v5, %v226_v4  ;;  %v229_v20 = vld [vmem:[%s7437_s1 + $0x618] sm:$0xff]  ;;  %v260_v21 = vld [vmem:[%s7437_s1 + $0x710] sm:$0xff] }
  0x43   :  { %4043 = vmatpush3.bf16.msra.mxu1 %v4042_v24  ;;  %v221_v24 = vld [vmem:[%s7437_s1 + $0x5d8] sm:$0xff]  ;;  %v264_v48 = vld [vmem:[%s7437_s1 + $0x730] sm:$0xff]  ;;  %v267_v61 = vld [vmem:[%s7437_s1 + $0x748] sm:$0xff] }
  0x44   :  { %4077 = vmatprep.subr.bf16.mxu1 %v4076_v29  ;;  %1303 = vmatmul.mubr.f32.vlgmr.msra.gmra.mrb[2].mxu0 %v5123_v32  ;;  %v4082_v32 = vpack.c.bf16 %v197_v46, %v196_v42  ;;  %v173_v29 = vld [vmem:[%s7437_s1 + $0x458] sm:$0xff]  ;;  %v4096_v31 = vpack.c.bf16 %v221_v24, %v220_v23  ;;  %v174_v42 = vld [vmem:[%s7437_s1 + $0x460] sm:$0xff]  ;;  %v252_v62 = vld [vmem:[%s7437_s1 + $0x6d0] sm:$0xff] }
  0x45   :  { %4047 = vmatpush3.bf16.msra.mxu0 %v4046_v35  ;;  %1442 = vmatprep.mubr.f32.mxu0 %v887_v51  ;;  %v191_v35 = vld [vmem:[%s7437_s1 + $0x4e8] sm:$0xff]  ;;  %v225_v51 = vld [vmem:[%s7437_s1 + $0x5f8] sm:$0xff]  ;;  %v246_v24 = vld [vmem:[%s7437_s1 + $0x6a0] sm:$0xff] }
  0x46   :  { %1373 = vmatmul.mubr.f32.vlgmr.msra.gmra.mrb[2].mxu1 %v5137_v41  ;;  %4049 = vmatprep.subr.bf16.mxu0 %v4048_v38  ;;  %v888_v41 = vcombine.high %v5286_v52, %v5286_v52  ;;  %v4066_v38 = vpack.c.bf16 %v173_v29, %v172_v28  ;;  %v4068_v40 = vpack.c.bf16 %v191_v35, %v190_v34  ;;  %v261_v23 = vld [vmem:[%s7437_s1 + $0x718] sm:$0xff]  ;;  %v279_v28 = vld [vmem:[%s7437_s1 + $0x7a8] sm:$0xff]  ;;  %v262_v35 = vld [vmem:[%s7437_s1 + $0x720] sm:$0xff] }
  0x47   :  { %4079 = vmatpush3.bf16.msra.mxu1 %v4078_v36  ;;  %v222_v36 = vld [vmem:[%s7437_s1 + $0x5e0] sm:$0xff]  ;;  %v231_v34 = vld [vmem:[%s7437_s1 + $0x628] sm:$0xff]  ;;  %v253_v63 = vld [vmem:[%s7437_s1 + $0x6d8] sm:$0xff] }
  0x48   :  { %4081 = vmatprep.subr.bf16.mxu1 %v4080_v45  ;;  %1512 = vmatprep.mubr.f32.mxu1 %v888_v41  ;;  %v206_v45 = vld [vmem:[%s7437_s1 + $0x560] sm:$0xff]  ;;  %v4100_v46 = vpack.c.bf16 %v223_v37, %v222_v36  ;;  %v208_v41 = vld [vmem:[%s7437_s1 + $0x570] sm:$0xff]  ;;  %v4128_v4 = vpack.c.bf16 %v253_v63, %v252_v62  ;;  %v269_v9 = vld [vmem:[%s7437_s1 + $0x758] sm:$0xff] }
  0x49   :  { %4051 = vmatpush3.bf16.msra.mxu0 %v4050_v53  ;;  %v4070_v53 = vpack.c.bf16 %v175_v44, %v174_v42  ;;  %v248_v37 = vld [vmem:[%s7437_s1 + $0x6b0] sm:$0xff]  ;;  %v254_v11 = vld [vmem:[%s7437_s1 + $0x6e0] sm:$0xff] }
  0x4a   :  { %4053 = vmatprep.subr.bf16.mxu0 %v4052_v54  ;;  %v4102_v54 = vpack.c.bf16 %v207_v47, %v206_v45  ;;  %v233_v47 = vld [vmem:[%s7437_s1 + $0x638] sm:$0xff]  ;;  %v236_v5 = vld [vmem:[%s7437_s1 + $0x650] sm:$0xff] }
  0x4b   :  { %4083 = vmatpush3.bf16.msra.mxu1 %v4082_v32  ;;  %v24_v32 = vld [vmem:[%s7436_s0 + $0x18] sm:$0xff]  ;;  %v324_v62 = vld [vmem:[%s7437_s1 + $0x910] sm:$0xff] }
  0x4c   :  { %4085 = vmatprep.subr.bf16.mxu1 %v4084_v58  ;;  %v4104_v58 = vpack.c.bf16 %v225_v51, %v224_v50  ;;  %v5457_v12 = vrot.slane %v24_v32, %v4956_v10  ;;  %v265_v50 = vld [vmem:[%s7437_s1 + $0x738] sm:$0xff]  ;;  %v250_v51 = vld [vmem:[%s7437_s1 + $0x6c0] sm:$0xff] }
  0x4d   :  { %4055 = vmatpush3.bf16.msra.mxu0 %v4054_v0  ;;  %v889_v0 = vcombine.high %v24_v32, %v24_v32  ;;  %v282_v32 = vld [vmem:[%s7437_s1 + $0x7c0] sm:$0xff] }
  0x4e   :  { %4057 = vmatprep.subr.bf16.mxu0 %v4056_v2  ;;  %v4106_v2 = vpack.c.bf16 %v209_v59, %v208_v41  ;;  %v234_v41 = vld [vmem:[%s7437_s1 + $0x640] sm:$0xff] }
  0x4f   :  { %4087 = vmatpush3.bf16.msra.mxu1 %v4086_v1  ;;  %v4074_v1 = vpack.c.bf16 %v177_v57, %v176_v56  ;;  %v4154_v56 = vpack.c.bf16 %v265_v50, %v264_v48  ;;  %v266_v59 = vld [vmem:[%s7437_s1 + $0x740] sm:$0xff]  ;;  %v291_v48 = vld [vmem:[%s7437_s1 + $0x808] sm:$0xff] }
  0x50   :  { %4089 = vmatprep.subr.bf16.mxu1 %v4088_v6  ;;  %v258_v6 = vld [vmem:[%s7437_s1 + $0x700] sm:$0xff] }
  0x51   :  { %4059 = vmatpush3.bf16.msra.mxu0 %v4058_v13  ;;  %v276_v13 = vld [vmem:[%s7437_s1 + $0x790] sm:$0xff]  ;;  %v4142_v17 = vpack.c.bf16 %v259_v8, %v258_v6  ;;  %v237_v6 = vld [vmem:[%s7437_s1 + $0x658] sm:$0xff] }
  0x52   :  { %4061 = vmatprep.subr.bf16.mxu0 %v4060_v15  ;;  %v5466_v15 = vrot.slane %v889_v0, %v4956_v10  ;;  %v284_v0 = vld [vmem:[%s7437_s1 + $0x7d0] sm:$0xff] }
  0x53   :  { %4091 = vmatpush3.bf16.msra.mxu1 %v4090_v14  ;;  %v277_v14 = vld [vmem:[%s7437_s1 + $0x798] sm:$0xff] }
  0x54   :  { %4093 = vmatprep.subr.bf16.mxu1 %v4092_v19  ;;  %v228_v19 = vld [vmem:[%s7437_s1 + $0x610] sm:$0xff]  ;;  %v4144_v22 = vpack.c.bf16 %v277_v14, %v276_v13  ;;  %v905_v29 = vcombine.high %v5466_v15, %v5466_v15  ;;  %v255_v13 = vld [vmem:[%s7437_s1 + $0x6e8] sm:$0xff]  ;;  %v286_v14 = vld [vmem:[%s7437_s1 + $0x7e0] sm:$0xff] }
  0x55   :  { %4063 = vmatpush3.bf16.msra.mxu0 %v4062_v25  ;;  %v247_v25 = vld [vmem:[%s7437_s1 + $0x6a8] sm:$0xff]  ;;  %v4114_v30 = vpack.c.bf16 %v229_v20, %v228_v19  ;;  %v4132_v19 = vpack.c.bf16 %v255_v13, %v254_v11  ;;  %v238_v20 = vld [vmem:[%s7437_s1 + $0x660] sm:$0xff] }
  0x56   :  { %4065 = vmatprep.subr.bf16.mxu0 %v4064_v27  ;;  %v278_v27 = vld [vmem:[%s7437_s1 + $0x7a0] sm:$0xff]  ;;  %v4116_v33 = vpack.c.bf16 %v247_v25, %v246_v24  ;;  %v271_v24 = vld [vmem:[%s7437_s1 + $0x768] sm:$0xff]  ;;  %v256_v25 = vld [vmem:[%s7437_s1 + $0x6f0] sm:$0xff] }
  0x57   :  { %4095 = vmatpush3.bf16.msra.mxu1 %v4094_v26  ;;  %v904_v26 = vcombine.high %v5457_v12, %v5457_v12  ;;  %v4148_v36 = vpack.c.bf16 %v279_v28, %v278_v27  ;;  %v288_v27 = vld [vmem:[%s7437_s1 + $0x7f0] sm:$0xff]  ;;  %v289_v28 = vld [vmem:[%s7437_s1 + $0x7f8] sm:$0xff]  ;;  %v295_v11 = vld [vmem:[%s7437_s1 + $0x828] sm:$0xff] }
  0x58   :  { %4097 = vmatprep.subr.bf16.mxu1 %v4096_v31  ;;  %v4146_v31 = vpack.c.bf16 %v261_v23, %v260_v21  ;;  %v239_v21 = vld [vmem:[%s7437_s1 + $0x668] sm:$0xff]  ;;  %v326_v13 = vld [vmem:[%s7437_s1 + $0x920] sm:$0xff] }
  0x59   :  { %4067 = vmatpush3.bf16.msra.mxu0 %v4066_v38  ;;  %v249_v38 = vld [vmem:[%s7437_s1 + $0x6b8] sm:$0xff] }
  0x5a   :  { %4069 = vmatprep.subr.bf16.mxu0 %v4068_v40  ;;  %v281_v40 = vld [vmem:[%s7437_s1 + $0x7b8] sm:$0xff]  ;;  %v4120_v45 = vpack.c.bf16 %v249_v38, %v248_v37  ;;  %v306_v37 = vld [vmem:[%s7437_s1 + $0x880] sm:$0xff]  ;;  %v307_v38 = vld [vmem:[%s7437_s1 + $0x888] sm:$0xff] }
  0x5b   :  { %4099 = vmatpush3.bf16.msra.mxu1 %v4098_v39  ;;  %v280_v39 = vld [vmem:[%s7437_s1 + $0x7b0] sm:$0xff] }
  0x5c   :  { %4101 = vmatprep.subr.bf16.mxu1 %v4100_v46  ;;  %v232_v46 = vld [vmem:[%s7437_s1 + $0x630] sm:$0xff]  ;;  %v4152_v49 = vpack.c.bf16 %v281_v40, %v280_v39  ;;  %v338_v39 = vld [vmem:[%s7437_s1 + $0x980] sm:$0xff]  ;;  %v339_v40 = vld [vmem:[%s7437_s1 + $0x988] sm:$0xff] }
  0x5d   :  { %4071 = vmatpush3.bf16.msra.mxu0 %v4070_v53  ;;  %v251_v53 = vld [vmem:[%s7437_s1 + $0x6c8] sm:$0xff]  ;;  %v4204_v50 = vpack.c.bf16 %v339_v40, %v338_v39  ;;  %v316_v39 = vld [vmem:[%s7437_s1 + $0x8d0] sm:$0xff]  ;;  %v317_v40 = vld [vmem:[%s7437_s1 + $0x8d8] sm:$0xff] }
  0x5e   :  { %4073 = vmatprep.subr.bf16.mxu0 %v4072_v55  ;;  %v4122_v55 = vpack.c.bf16 %v233_v47, %v232_v46  ;;  %v4124_v57 = vpack.c.bf16 %v251_v53, %v250_v51  ;;  %v4172_v46 = vpack.c.bf16 %v307_v38, %v306_v37  ;;  %v290_v47 = vld [vmem:[%s7437_s1 + $0x800] sm:$0xff]  ;;  %v323_v51 = vld [vmem:[%s7437_s1 + $0x908] sm:$0xff]  ;;  %v308_v53 = vld [vmem:[%s7437_s1 + $0x890] sm:$0xff] }
  0x5f   :  { %4103 = vmatpush3.bf16.msra.mxu1 %v4102_v54  ;;  %v283_v54 = vld [vmem:[%s7437_s1 + $0x7c8] sm:$0xff] }
  0x60   :  { %4105 = vmatprep.subr.bf16.mxu1 %v4104_v58  ;;  %v235_v58 = vld [vmem:[%s7437_s1 + $0x648] sm:$0xff]  ;;  %v4156_v60 = vpack.c.bf16 %v283_v54, %v282_v32  ;;  %v309_v32 = vld [vmem:[%s7437_s1 + $0x898] sm:$0xff] }
  0x61   :  { %4075 = vmatpush3.bf16.msra.mxu0 %v4074_v1  ;;  %v285_v1 = vld [vmem:[%s7437_s1 + $0x7d8] sm:$0xff]  ;;  %v331_v38 = vld [vmem:[%s7437_s1 + $0x948] sm:$0xff] }
  0x62   :  { %4109 = vmatprep.subr.bf16.mxu0 %v4108_v3  ;;  %v4158_v3 = vpack.c.bf16 %v267_v61, %v266_v59  ;;  %v4160_v8 = vpack.c.bf16 %v285_v1, %v284_v0  ;;  %v4176_v59 = vpack.c.bf16 %v309_v32, %v308_v53  ;;  %v293_v61 = vld [vmem:[%s7437_s1 + $0x818] sm:$0xff]  ;;  %v310_v1 = vld [vmem:[%s7437_s1 + $0x8a0] sm:$0xff] }
  0x63   :  { %4107 = vmatpush3.bf16.msra.mxu1 %v4106_v2  ;;  %v4126_v2 = vpack.c.bf16 %v235_v58, %v234_v41  ;;  %v4174_v41 = vpack.c.bf16 %v291_v48, %v290_v47  ;;  %v325_v0 = vld [vmem:[%s7437_s1 + $0x918] sm:$0xff]  ;;  %v4192_v47 = vpack.c.bf16 %v317_v40, %v316_v39  ;;  %v300_v48 = vld [vmem:[%s7437_s1 + $0x850] sm:$0xff]  ;;  %v318_v32 = vld [vmem:[%s7437_s1 + $0x8e0] sm:$0xff] }
  0x64   :  { %4141 = vmatprep.subr.bf16.mxu1 %v4140_v7  ;;  %1443 = vmatmul.mubr.f32.vlgmr.msra.gmra.mrb[4].mxu0 %v5265_v43  ;;  %v230_v43 = vld [vmem:[%s7437_s1 + $0x620] sm:$0xff]  ;;  %v268_v7 = vld [vmem:[%s7437_s1 + $0x750] sm:$0xff]  ;;  %v333_v53 = vld [vmem:[%s7437_s1 + $0x958] sm:$0xff] }
  0x65   :  { %4111 = vmatpush3.bf16.msra.mxu0 %v4110_v16  ;;  %1582 = vmatprep.mubr.f32.mxu0 %v904_v26  ;;  %v4118_v42 = vpack.c.bf16 %v231_v34, %v230_v43  ;;  %v287_v16 = vld [vmem:[%s7437_s1 + $0x7e8] sm:$0xff]  ;;  %v257_v26 = vld [vmem:[%s7437_s1 + $0x6f8] sm:$0xff]  ;;  %v240_v43 = vld [vmem:[%s7437_s1 + $0x670] sm:$0xff] }
  0x66   :  { %1513 = vmatmul.mubr.f32.vlgmr.msra.gmra.mrb[4].mxu1 %v5286_v52  ;;  %4113 = vmatprep.subr.bf16.mxu0 %v4112_v18  ;;  %v263_v52 = vld [vmem:[%s7437_s1 + $0x728] sm:$0xff]  ;;  %v4162_v18 = vpack.c.bf16 %v269_v9, %v268_v7  ;;  %v4164_v23 = vpack.c.bf16 %v287_v16, %v286_v14  ;;  %v241_v34 = vld [vmem:[%s7437_s1 + $0x678] sm:$0xff]  ;;  %v312_v16 = vld [vmem:[%s7437_s1 + $0x8b0] sm:$0xff] }
  0x67   :  { %4143 = vmatpush3.bf16.msra.mxu1 %v4142_v17  ;;  %1652 = vmatprep.mubr.f32.mxu1 %v905_v29  ;;  %v4150_v44 = vpack.c.bf16 %v263_v52, %v262_v35  ;;  %v4130_v17 = vpack.c.bf16 %v237_v6, %v236_v5  ;;  %v4134_v29 = vpack.c.bf16 %v239_v21, %v238_v20  ;;  %v272_v35 = vld [vmem:[%s7437_s1 + $0x770] sm:$0xff]  ;;  %v273_v52 = vld [vmem:[%s7437_s1 + $0x778] sm:$0xff]  ;;  %v343_v5 = vld [vmem:[%s7437_s1 + $0x9a8] sm:$0xff] }
  0x68   :  { %4145 = vmatprep.subr.bf16.mxu1 %v4144_v22  ;;  %v270_v22 = vld [vmem:[%s7437_s1 + $0x760] sm:$0xff]  ;;  %v388_v39 = vld [vmem:[%s7437_s1 + $0xb10] sm:$0xff] }
  0x69   :  { %4115 = vmatpush3.bf16.msra.mxu0 %v4114_v30  ;;  %v25_v30 = vld [vmem:[%s7436_s0 + $0x20] sm:$0xff] }
  0x6a   :  { %4117 = vmatprep.subr.bf16.mxu0 %v4116_v33  ;;  %v4136_v33 = vpack.c.bf16 %v257_v26, %v256_v25  ;;  %v5664_v54 = vrot.slane %v25_v30, %v4956_v10  ;;  %v328_v25 = vld [vmem:[%s7437_s1 + $0x930] sm:$0xff] }
  0x6b   :  { %4147 = vmatpush3.bf16.msra.mxu1 %v4146_v31  ;;  %v4166_v31 = vpack.c.bf16 %v271_v24, %v270_v22  ;;  %v297_v24 = vld [vmem:[%s7437_s1 + $0x838] sm:$0xff] }
  0x6c   :  { %4149 = vmatprep.subr.bf16.mxu1 %v4148_v36  ;;  %v4168_v36 = vpack.c.bf16 %v289_v28, %v288_v27  ;;  %v329_v27 = vld [vmem:[%s7437_s1 + $0x938] sm:$0xff]  ;;  %v314_v28 = vld [vmem:[%s7437_s1 + $0x8c0] sm:$0xff] }
  0x6d   :  { %4119 = vmatpush3.bf16.msra.mxu0 %v4118_v42  ;;  %v906_v42 = vcombine.high %v25_v30, %v25_v30  ;;  %v346_v30 = vld [vmem:[%s7437_s1 + $0x9c0] sm:$0xff] }
  0x6e   :  { %4121 = vmatprep.subr.bf16.mxu0 %v4120_v45  ;;  %v4170_v45 = vpack.c.bf16 %v273_v52, %v272_v35  ;;  %v298_v35 = vld [vmem:[%s7437_s1 + $0x840] sm:$0xff] }
  0x6f   :  { %4151 = vmatpush3.bf16.msra.mxu1 %v4150_v44  ;;  %v4138_v44 = vpack.c.bf16 %v241_v34, %v240_v43  ;;  %v4218_v43 = vpack.c.bf16 %v329_v27, %v328_v25  ;;  %v330_v52 = vld [vmem:[%s7437_s1 + $0x940] sm:$0xff]  ;;  %v355_v25 = vld [vmem:[%s7437_s1 + $0xa08] sm:$0xff] }
  0x70   :  { %4153 = vmatprep.subr.bf16.mxu1 %v4152_v49  ;;  %v322_v49 = vld [vmem:[%s7437_s1 + $0x900] sm:$0xff] }
  0x71   :  { %4123 = vmatpush3.bf16.msra.mxu0 %v4122_v55  ;;  %v340_v55 = vld [vmem:[%s7437_s1 + $0x990] sm:$0xff]  ;;  %v4206_v58 = vpack.c.bf16 %v323_v51, %v322_v49  ;;  %v301_v49 = vld [vmem:[%s7437_s1 + $0x858] sm:$0xff] }
  0x72   :  { %4125 = vmatprep.subr.bf16.mxu0 %v4124_v57  ;;  %v5673_v57 = vrot.slane %v906_v42, %v4956_v10  ;;  %v348_v42 = vld [vmem:[%s7437_s1 + $0x9d0] sm:$0xff] }
  0x73   :  { %4155 = vmatpush3.bf16.msra.mxu1 %v4154_v56  ;;  %v341_v56 = vld [vmem:[%s7437_s1 + $0x998] sm:$0xff] }
  0x74   :  { %4157 = vmatprep.subr.bf16.mxu1 %v4156_v60  ;;  %v292_v60 = vld [vmem:[%s7437_s1 + $0x810] sm:$0xff]  ;;  %v4208_v63 = vpack.c.bf16 %v341_v56, %v340_v55  ;;  %v922_v6 = vcombine.high %v5673_v57, %v5673_v57  ;;  %v319_v55 = vld [vmem:[%s7437_s1 + $0x8e8] sm:$0xff]  ;;  %v350_v56 = vld [vmem:[%s7437_s1 + $0x9e0] sm:$0xff] }
  0x75   :  { %4127 = vmatpush3.bf16.msra.mxu0 %v4126_v2  ;;  %v311_v2 = vld [vmem:[%s7437_s1 + $0x8a8] sm:$0xff]  ;;  %v4178_v7 = vpack.c.bf16 %v293_v61, %v292_v60  ;;  %v4196_v60 = vpack.c.bf16 %v319_v55, %v318_v32  ;;  %v302_v61 = vld [vmem:[%s7437_s1 + $0x860] sm:$0xff] }
  0x76   :  { %4129 = vmatprep.subr.bf16.mxu0 %v4128_v4  ;;  %v342_v4 = vld [vmem:[%s7437_s1 + $0x9a0] sm:$0xff]  ;;  %v4180_v9 = vpack.c.bf16 %v311_v2, %v310_v1  ;;  %v335_v1 = vld [vmem:[%s7437_s1 + $0x968] sm:$0xff]  ;;  %v320_v2 = vld [vmem:[%s7437_s1 + $0x8f0] sm:$0xff] }
  0x77   :  { %4159 = vmatpush3.bf16.msra.mxu1 %v4158_v3  ;;  %v921_v3 = vcombine.high %v5664_v54, %v5664_v54  ;;  %v4212_v14 = vpack.c.bf16 %v343_v5, %v342_v4  ;;  %v352_v4 = vld [vmem:[%s7437_s1 + $0x9f0] sm:$0xff]  ;;  %v353_v5 = vld [vmem:[%s7437_s1 + $0x9f8] sm:$0xff]  ;;  %v359_v32 = vld [vmem:[%s7437_s1 + $0xa28] sm:$0xff] }
  0x78   :  { %4161 = vmatprep.subr.bf16.mxu1 %v4160_v8  ;;  %v4210_v8 = vpack.c.bf16 %v325_v0, %v324_v62  ;;  %v303_v62 = vld [vmem:[%s7437_s1 + $0x868] sm:$0xff]  ;;  %v390_v55 = vld [vmem:[%s7437_s1 + $0xb20] sm:$0xff] }
  0x79   :  { %4131 = vmatpush3.bf16.msra.mxu0 %v4130_v17  ;;  %v313_v17 = vld [vmem:[%s7437_s1 + $0x8b8] sm:$0xff] }
  0x7a   :  { %4133 = vmatprep.subr.bf16.mxu0 %v4132_v19  ;;  %v345_v19 = vld [vmem:[%s7437_s1 + $0x9b8] sm:$0xff]  ;;  %v4184_v22 = vpack.c.bf16 %v313_v17, %v312_v16  ;;  %v370_v16 = vld [vmem:[%s7437_s1 + $0xa80] sm:$0xff]  ;;  %v371_v17 = vld [vmem:[%s7437_s1 + $0xa88] sm:$0xff] }
  0x7b   :  { %4163 = vmatpush3.bf16.msra.mxu1 %v4162_v18  ;;  %v344_v18 = vld [vmem:[%s7437_s1 + $0x9b0] sm:$0xff] }
  0x7c   :  { %4165 = vmatprep.subr.bf16.mxu1 %v4164_v23  ;;  %v296_v23 = vld [vmem:[%s7437_s1 + $0x830] sm:$0xff]  ;;  %v4216_v26 = vpack.c.bf16 %v345_v19, %v344_v18  ;;  %v402_v18 = vld [vmem:[%s7437_s1 + $0xb80] sm:$0xff]  ;;  %v403_v19 = vld [vmem:[%s7437_s1 + $0xb88] sm:$0xff] }
  0x7d   :  { %4135 = vmatpush3.bf16.msra.mxu0 %v4134_v29  ;;  %v315_v29 = vld [vmem:[%s7437_s1 + $0x8c8] sm:$0xff]  ;;  %v4268_v27 = vpack.c.bf16 %v403_v19, %v402_v18  ;;  %v380_v18 = vld [vmem:[%s7437_s1 + $0xad0] sm:$0xff]  ;;  %v381_v19 = vld [vmem:[%s7437_s1 + $0xad8] sm:$0xff] }
  0x7e   :  { %4137 = vmatprep.subr.bf16.mxu0 %v4136_v33  ;;  %v4186_v33 = vpack.c.bf16 %v297_v24, %v296_v23  ;;  %v4188_v34 = vpack.c.bf16 %v315_v29, %v314_v28  ;;  %v4236_v23 = vpack.c.bf16 %v371_v17, %v370_v16  ;;  %v354_v24 = vld [vmem:[%s7437_s1 + $0xa00] sm:$0xff]  ;;  %v387_v28 = vld [vmem:[%s7437_s1 + $0xb08] sm:$0xff]  ;;  %v372_v29 = vld [vmem:[%s7437_s1 + $0xa90] sm:$0xff] }
  0x7f   :  { %4167 = vmatpush3.bf16.msra.mxu1 %v4166_v31  ;;  %v347_v31 = vld [vmem:[%s7437_s1 + $0x9c8] sm:$0xff] }
  0x80   :  { %4169 = vmatprep.subr.bf16.mxu1 %v4168_v36  ;;  %v299_v36 = vld [vmem:[%s7437_s1 + $0x848] sm:$0xff]  ;;  %v4220_v37 = vpack.c.bf16 %v347_v31, %v346_v30  ;;  %v373_v30 = vld [vmem:[%s7437_s1 + $0xa98] sm:$0xff] }
  0x81   :  { %4139 = vmatpush3.bf16.msra.mxu0 %v4138_v44  ;;  %v349_v44 = vld [vmem:[%s7437_s1 + $0x9d8] sm:$0xff]  ;;  %v395_v17 = vld [vmem:[%s7437_s1 + $0xb48] sm:$0xff] }
  0x82   :  { %4173 = vmatprep.subr.bf16.mxu0 %v4172_v46  ;;  %v4222_v46 = vpack.c.bf16 %v331_v38, %v330_v52  ;;  %v4224_v51 = vpack.c.bf16 %v349_v44, %v348_v42  ;;  %v4240_v52 = vpack.c.bf16 %v373_v30, %v372_v29  ;;  %v357_v38 = vld [vmem:[%s7437_s1 + $0xa18] sm:$0xff]  ;;  %v374_v44 = vld [vmem:[%s7437_s1 + $0xaa0] sm:$0xff] }
  0x83   :  { %4171 = vmatpush3.bf16.msra.mxu1 %v4170_v45  ;;  %v4190_v45 = vpack.c.bf16 %v299_v36, %v298_v35  ;;  %v4238_v35 = vpack.c.bf16 %v355_v25, %v354_v24  ;;  %v389_v42 = vld [vmem:[%s7437_s1 + $0xb18] sm:$0xff]  ;;  %v4256_v24 = vpack.c.bf16 %v381_v19, %v380_v18  ;;  %v364_v25 = vld [vmem:[%s7437_s1 + $0xa50] sm:$0xff]  ;;  %v382_v30 = vld [vmem:[%s7437_s1 + $0xae0] sm:$0xff] }
  0x84   :  { %4205 = vmatprep.subr.bf16.mxu1 %v4204_v50  ;;  %1583 = vmatmul.mubr.f32.vlgmr.msra.gmra.mrb[6].mxu0 %v5457_v12  ;;  %v294_v12 = vld [vmem:[%s7437_s1 + $0x820] sm:$0xff]  ;;  %v332_v50 = vld [vmem:[%s7437_s1 + $0x950] sm:$0xff]  ;;  %v397_v29 = vld [vmem:[%s7437_s1 + $0xb58] sm:$0xff] }
  0x85   :  { %4175 = vmatpush3.bf16.msra.mxu0 %v4174_v41  ;;  %1722 = vmatprep.mubr.f32.mxu0 %v921_v3  ;;  %v4182_v20 = vpack.c.bf16 %v295_v11, %v294_v12  ;;  %v351_v41 = vld [vmem:[%s7437_s1 + $0x9e8] sm:$0xff]  ;;  %v321_v3 = vld [vmem:[%s7437_s1 + $0x8f8] sm:$0xff]  ;;  %v304_v12 = vld [vmem:[%s7437_s1 + $0x870] sm:$0xff] }
  0x86   :  { %1653 = vmatmul.mubr.f32.vlgmr.msra.gmra.mrb[6].mxu1 %v5466_v15  ;;  %4177 = vmatprep.subr.bf16.mxu0 %v4176_v59  ;;  %v327_v15 = vld [vmem:[%s7437_s1 + $0x928] sm:$0xff]  ;;  %v4226_v59 = vpack.c.bf16 %v333_v53, %v332_v50  ;;  %v4228_v0 = vpack.c.bf16 %v351_v41, %v350_v56  ;;  %v305_v11 = vld [vmem:[%s7437_s1 + $0x878] sm:$0xff]  ;;  %v376_v41 = vld [vmem:[%s7437_s1 + $0xab0] sm:$0xff] }
  0x87   :  { %4207 = vmatpush3.bf16.msra.mxu1 %v4206_v58  ;;  %1792 = vmatprep.mubr.f32.mxu1 %v922_v6  ;;  %v4214_v21 = vpack.c.bf16 %v327_v15, %v326_v13  ;;  %v4194_v58 = vpack.c.bf16 %v301_v49, %v300_v48  ;;  %v4198_v6 = vpack.c.bf16 %v303_v62, %v302_v61  ;;  %v336_v13 = vld [vmem:[%s7437_s1 + $0x970] sm:$0xff]  ;;  %v337_v15 = vld [vmem:[%s7437_s1 + $0x978] sm:$0xff]  ;;  %v407_v48 = vld [vmem:[%s7437_s1 + $0xba8] sm:$0xff] }
  0x88   :  { %4209 = vmatprep.subr.bf16.mxu1 %v4208_v63  ;;  %v334_v63 = vld [vmem:[%s7437_s1 + $0x960] sm:$0xff]  ;;  %v452_v18 = vld [vmem:[%s7437_s1 + $0xd10] sm:$0xff] }
  0x89   :  { %4179 = vmatpush3.bf16.msra.mxu0 %v4178_v7  ;;  %v26_v7 = vld [vmem:[%s7436_s0 + $0x28] sm:$0xff] }
  0x8a   :  { %4181 = vmatprep.subr.bf16.mxu0 %v4180_v9  ;;  %v4200_v9 = vpack.c.bf16 %v321_v3, %v320_v2  ;;  %v5871_v31 = vrot.slane %v26_v7, %v4956_v10  ;;  %v392_v2 = vld [vmem:[%s7437_s1 + $0xb30] sm:$0xff] }
  0x8b   :  { %4211 = vmatpush3.bf16.msra.mxu1 %v4210_v8  ;;  %v4230_v8 = vpack.c.bf16 %v335_v1, %v334_v63  ;;  %v361_v1 = vld [vmem:[%s7437_s1 + $0xa38] sm:$0xff] }
  0x8c   :  { %4213 = vmatprep.subr.bf16.mxu1 %v4212_v14  ;;  %v4232_v14 = vpack.c.bf16 %v353_v5, %v352_v4  ;;  %v393_v4 = vld [vmem:[%s7437_s1 + $0xb38] sm:$0xff]  ;;  %v378_v5 = vld [vmem:[%s7437_s1 + $0xac0] sm:$0xff] }
  0x8d   :  { %4183 = vmatpush3.bf16.msra.mxu0 %v4182_v20  ;;  %v923_v20 = vcombine.high %v26_v7, %v26_v7  ;;  %v410_v7 = vld [vmem:[%s7437_s1 + $0xbc0] sm:$0xff] }
  0x8e   :  { %4185 = vmatprep.subr.bf16.mxu0 %v4184_v22  ;;  %v4234_v22 = vpack.c.bf16 %v337_v15, %v336_v13  ;;  %v362_v13 = vld [vmem:[%s7437_s1 + $0xa40] sm:$0xff] }
  0x8f   :  { %4215 = vmatpush3.bf16.msra.mxu1 %v4214_v21  ;;  %v4202_v21 = vpack.c.bf16 %v305_v11, %v304_v12  ;;  %v4282_v12 = vpack.c.bf16 %v393_v4, %v392_v2  ;;  %v394_v15 = vld [vmem:[%s7437_s1 + $0xb40] sm:$0xff]  ;;  %v419_v2 = vld [vmem:[%s7437_s1 + $0xc08] sm:$0xff] }
  0x90   :  { %4217 = vmatprep.subr.bf16.mxu1 %v4216_v26  ;;  %v386_v26 = vld [vmem:[%s7437_s1 + $0xb00] sm:$0xff] }
  0x91   :  { %4187 = vmatpush3.bf16.msra.mxu0 %v4186_v33  ;;  %v404_v33 = vld [vmem:[%s7437_s1 + $0xb90] sm:$0xff]  ;;  %v4270_v36 = vpack.c.bf16 %v387_v28, %v386_v26  ;;  %v365_v26 = vld [vmem:[%s7437_s1 + $0xa58] sm:$0xff] }
  0x92   :  { %4189 = vmatprep.subr.bf16.mxu0 %v4188_v34  ;;  %v5880_v34 = vrot.slane %v923_v20, %v4956_v10  ;;  %v412_v20 = vld [vmem:[%s7437_s1 + $0xbd0] sm:$0xff] }
  0x93   :  { %4219 = vmatpush3.bf16.msra.mxu1 %v4218_v43  ;;  %v405_v43 = vld [vmem:[%s7437_s1 + $0xb98] sm:$0xff] }
  0x94   :  { %4221 = vmatprep.subr.bf16.mxu1 %v4220_v37  ;;  %v356_v37 = vld [vmem:[%s7437_s1 + $0xa10] sm:$0xff]  ;;  %v4272_v40 = vpack.c.bf16 %v405_v43, %v404_v33  ;;  %v939_v49 = vcombine.high %v5880_v34, %v5880_v34  ;;  %v383_v33 = vld [vmem:[%s7437_s1 + $0xae8] sm:$0xff]  ;;  %v414_v43 = vld [vmem:[%s7437_s1 + $0xbe0] sm:$0xff] }
  0x95   :  { %4191 = vmatpush3.bf16.msra.mxu0 %v4190_v45  ;;  %v375_v45 = vld [vmem:[%s7437_s1 + $0xaa8] sm:$0xff]  ;;  %v4242_v50 = vpack.c.bf16 %v357_v38, %v356_v37  ;;  %v4260_v37 = vpack.c.bf16 %v383_v33, %v382_v30  ;;  %v366_v38 = vld [vmem:[%s7437_s1 + $0xa60] sm:$0xff] }
  0x96   :  { %4193 = vmatprep.subr.bf16.mxu0 %v4192_v47  ;;  %v406_v47 = vld [vmem:[%s7437_s1 + $0xba0] sm:$0xff]  ;;  %v4244_v53 = vpack.c.bf16 %v375_v45, %v374_v44  ;;  %v399_v44 = vld [vmem:[%s7437_s1 + $0xb68] sm:$0xff]  ;;  %v384_v45 = vld [vmem:[%s7437_s1 + $0xaf0] sm:$0xff] }
  0x97   :  { %4223 = vmatpush3.bf16.msra.mxu1 %v4222_v46  ;;  %v938_v46 = vcombine.high %v5871_v31, %v5871_v31  ;;  %v4276_v56 = vpack.c.bf16 %v407_v48, %v406_v47  ;;  %v416_v47 = vld [vmem:[%s7437_s1 + $0xbf0] sm:$0xff]  ;;  %v417_v48 = vld [vmem:[%s7437_s1 + $0xbf8] sm:$0xff]  ;;  %v423_v30 = vld [vmem:[%s7437_s1 + $0xc28] sm:$0xff] }
  0x98   :  { %4225 = vmatprep.subr.bf16.mxu1 %v4224_v51  ;;  %v4274_v51 = vpack.c.bf16 %v389_v42, %v388_v39  ;;  %v367_v39 = vld [vmem:[%s7437_s1 + $0xa68] sm:$0xff]  ;;  %v454_v33 = vld [vmem:[%s7437_s1 + $0xd20] sm:$0xff] }
  0x99   :  { %4195 = vmatpush3.bf16.msra.mxu0 %v4194_v58  ;;  %v377_v58 = vld [vmem:[%s7437_s1 + $0xab8] sm:$0xff] }
  0x9a   :  { %4197 = vmatprep.subr.bf16.mxu0 %v4196_v60  ;;  %v409_v60 = vld [vmem:[%s7437_s1 + $0xbb8] sm:$0xff]  ;;  %v4248_v63 = vpack.c.bf16 %v377_v58, %v376_v41  ;;  %v434_v41 = vld [vmem:[%s7437_s1 + $0xc80] sm:$0xff]  ;;  %v435_v58 = vld [vmem:[%s7437_s1 + $0xc88] sm:$0xff] }
  0x9b   :  { %4227 = vmatpush3.bf16.msra.mxu1 %v4226_v59  ;;  %v408_v59 = vld [vmem:[%s7437_s1 + $0xbb0] sm:$0xff] }
  0x9c   :  { %4229 = vmatprep.subr.bf16.mxu1 %v4228_v0  ;;  %v360_v0 = vld [vmem:[%s7437_s1 + $0xa30] sm:$0xff]  ;;  %v4280_v3 = vpack.c.bf16 %v409_v60, %v408_v59  ;;  %v466_v59 = vld [vmem:[%s7437_s1 + $0xd80] sm:$0xff]  ;;  %v467_v60 = vld [vmem:[%s7437_s1 + $0xd88] sm:$0xff] }
  0x9d   :  { %4199 = vmatpush3.bf16.msra.mxu0 %v4198_v6  ;;  %v379_v6 = vld [vmem:[%s7437_s1 + $0xac8] sm:$0xff]  ;;  %v4332_v4 = vpack.c.bf16 %v467_v60, %v466_v59  ;;  %v444_v59 = vld [vmem:[%s7437_s1 + $0xcd0] sm:$0xff]  ;;  %v445_v60 = vld [vmem:[%s7437_s1 + $0xcd8] sm:$0xff] }
  0x9e   :  { %4201 = vmatprep.subr.bf16.mxu0 %v4200_v9  ;;  %v4250_v9 = vpack.c.bf16 %v361_v1, %v360_v0  ;;  %v4252_v11 = vpack.c.bf16 %v379_v6, %v378_v5  ;;  %v4300_v0 = vpack.c.bf16 %v435_v58, %v434_v41  ;;  %v418_v1 = vld [vmem:[%s7437_s1 + $0xc00] sm:$0xff]  ;;  %v451_v5 = vld [vmem:[%s7437_s1 + $0xd08] sm:$0xff]  ;;  %v436_v6 = vld [vmem:[%s7437_s1 + $0xc90] sm:$0xff] }
  0x9f   :  { %4231 = vmatpush3.bf16.msra.mxu1 %v4230_v8  ;;  %v411_v8 = vld [vmem:[%s7437_s1 + $0xbc8] sm:$0xff] }
  0xa0   :  { %4233 = vmatprep.subr.bf16.mxu1 %v4232_v14  ;;  %v363_v14 = vld [vmem:[%s7437_s1 + $0xa48] sm:$0xff]  ;;  %v4284_v16 = vpack.c.bf16 %v411_v8, %v410_v7  ;;  %v437_v7 = vld [vmem:[%s7437_s1 + $0xc98] sm:$0xff] }
  0xa1   :  { %4203 = vmatpush3.bf16.msra.mxu0 %v4202_v21  ;;  %v413_v21 = vld [vmem:[%s7437_s1 + $0xbd8] sm:$0xff]  ;;  %v459_v58 = vld [vmem:[%s7437_s1 + $0xd48] sm:$0xff] }
  0xa2   :  { %4237 = vmatprep.subr.bf16.mxu0 %v4236_v23  ;;  %v4286_v23 = vpack.c.bf16 %v395_v17, %v394_v15  ;;  %v4288_v28 = vpack.c.bf16 %v413_v21, %v412_v20  ;;  %v4304_v15 = vpack.c.bf16 %v437_v7, %v436_v6  ;;  %v421_v17 = vld [vmem:[%s7437_s1 + $0xc18] sm:$0xff]  ;;  %v438_v21 = vld [vmem:[%s7437_s1 + $0xca0] sm:$0xff] }
  0xa3   :  { %4235 = vmatpush3.bf16.msra.mxu1 %v4234_v22  ;;  %v4254_v22 = vpack.c.bf16 %v363_v14, %v362_v13  ;;  %v4302_v13 = vpack.c.bf16 %v419_v2, %v418_v1  ;;  %v453_v20 = vld [vmem:[%s7437_s1 + $0xd18] sm:$0xff]  ;;  %v4320_v1 = vpack.c.bf16 %v445_v60, %v444_v59  ;;  %v428_v2 = vld [vmem:[%s7437_s1 + $0xc50] sm:$0xff]  ;;  %v446_v7 = vld [vmem:[%s7437_s1 + $0xce0] sm:$0xff] }
  0xa4   :  { %4269 = vmatprep.subr.bf16.mxu1 %v4268_v27  ;;  %1723 = vmatmul.mubr.f32.vlgmr.msra.gmra.mrb[8].mxu0 %v5664_v54  ;;  %v358_v54 = vld [vmem:[%s7437_s1 + $0xa20] sm:$0xff]  ;;  %v396_v27 = vld [vmem:[%s7437_s1 + $0xb50] sm:$0xff]  ;;  %v461_v6 = vld [vmem:[%s7437_s1 + $0xd58] sm:$0xff] }
  0xa5   :  { %4239 = vmatpush3.bf16.msra.mxu0 %v4238_v35  ;;  %1862 = vmatprep.mubr.f32.mxu0 %v938_v46  ;;  %v4246_v61 = vpack.c.bf16 %v359_v32, %v358_v54  ;;  %v415_v35 = vld [vmem:[%s7437_s1 + $0xbe8] sm:$0xff]  ;;  %v385_v46 = vld [vmem:[%s7437_s1 + $0xaf8] sm:$0xff]  ;;  %v368_v54 = vld [vmem:[%s7437_s1 + $0xa70] sm:$0xff] }
  0xa6   :  { %1793 = vmatmul.mubr.f32.vlgmr.msra.gmra.mrb[8].mxu1 %v5673_v57  ;;  %4241 = vmatprep.subr.bf16.mxu0 %v4240_v52  ;;  %v391_v57 = vld [vmem:[%s7437_s1 + $0xb28] sm:$0xff]  ;;  %v4290_v52 = vpack.c.bf16 %v397_v29, %v396_v27  ;;  %v4292_v42 = vpack.c.bf16 %v415_v35, %v414_v43  ;;  %v369_v32 = vld [vmem:[%s7437_s1 + $0xa78] sm:$0xff]  ;;  %v440_v35 = vld [vmem:[%s7437_s1 + $0xcb0] sm:$0xff] }
  0xa7   :  { %4271 = vmatpush3.bf16.msra.mxu1 %v4270_v36  ;;  %1932 = vmatprep.mubr.f32.mxu1 %v939_v49  ;;  %v4278_v62 = vpack.c.bf16 %v391_v57, %v390_v55  ;;  %v4258_v36 = vpack.c.bf16 %v365_v26, %v364_v25  ;;  %v4262_v49 = vpack.c.bf16 %v367_v39, %v366_v38  ;;  %v400_v55 = vld [vmem:[%s7437_s1 + $0xb70] sm:$0xff]  ;;  %v401_v57 = vld [vmem:[%s7437_s1 + $0xb78] sm:$0xff]  ;;  %v471_v25 = vld [vmem:[%s7437_s1 + $0xda8] sm:$0xff] }
  0xa8   :  { %4273 = vmatprep.subr.bf16.mxu1 %v4272_v40  ;;  %v398_v40 = vld [vmem:[%s7437_s1 + $0xb60] sm:$0xff]  ;;  %v516_v59 = vld [vmem:[%s7437_s1 + $0xf10] sm:$0xff] }
  0xa9   :  { %4243 = vmatpush3.bf16.msra.mxu0 %v4242_v50  ;;  %v27_v50 = vld [vmem:[%s7436_s0 + $0x30] sm:$0xff] }
  0xaa   :  { %4245 = vmatprep.subr.bf16.mxu0 %v4244_v53  ;;  %v4264_v53 = vpack.c.bf16 %v385_v46, %v384_v45  ;;  %v6078_v8 = vrot.slane %v27_v50, %v4956_v10  ;;  %v456_v45 = vld [vmem:[%s7437_s1 + $0xd30] sm:$0xff] }
  0xab   :  { %4275 = vmatpush3.bf16.msra.mxu1 %v4274_v51  ;;  %v4294_v51 = vpack.c.bf16 %v399_v44, %v398_v40  ;;  %v425_v44 = vld [vmem:[%s7437_s1 + $0xc38] sm:$0xff] }
  0xac   :  { %4277 = vmatprep.subr.bf16.mxu1 %v4276_v56  ;;  %v4296_v56 = vpack.c.bf16 %v417_v48, %v416_v47  ;;  %v457_v47 = vld [vmem:[%s7437_s1 + $0xd38] sm:$0xff]  ;;  %v442_v48 = vld [vmem:[%s7437_s1 + $0xcc0] sm:$0xff] }
  0xad   :  { %4247 = vmatpush3.bf16.msra.mxu0 %v4246_v61  ;;  %v940_v61 = vcombine.high %v27_v50, %v27_v50  ;;  %v474_v50 = vld [vmem:[%s7437_s1 + $0xdc0] sm:$0xff] }
  0xae   :  { %4249 = vmatprep.subr.bf16.mxu0 %v4248_v63  ;;  %v4298_v63 = vpack.c.bf16 %v401_v57, %v400_v55  ;;  %v426_v55 = vld [vmem:[%s7437_s1 + $0xc40] sm:$0xff] }
  0xaf   :  { %4279 = vmatpush3.bf16.msra.mxu1 %v4278_v62  ;;  %v4266_v62 = vpack.c.bf16 %v369_v32, %v368_v54  ;;  %v4346_v54 = vpack.c.bf16 %v457_v47, %v456_v45  ;;  %v458_v57 = vld [vmem:[%s7437_s1 + $0xd40] sm:$0xff]  ;;  %v483_v45 = vld [vmem:[%s7437_s1 + $0xe08] sm:$0xff] }
  0xb0   :  { %4281 = vmatprep.subr.bf16.mxu1 %v4280_v3  ;;  %v450_v3 = vld [vmem:[%s7437_s1 + $0xd00] sm:$0xff] }
  0xb1   :  { %4251 = vmatpush3.bf16.msra.mxu0 %v4250_v9  ;;  %v468_v9 = vld [vmem:[%s7437_s1 + $0xd90] sm:$0xff]  ;;  %v4334_v14 = vpack.c.bf16 %v451_v5, %v450_v3  ;;  %v429_v3 = vld [vmem:[%s7437_s1 + $0xc58] sm:$0xff] }
  0xb2   :  { %4253 = vmatprep.subr.bf16.mxu0 %v4252_v11  ;;  %v6087_v11 = vrot.slane %v940_v61, %v4956_v10  ;;  %v476_v61 = vld [vmem:[%s7437_s1 + $0xdd0] sm:$0xff] }
  0xb3   :  { %4283 = vmatpush3.bf16.msra.mxu1 %v4282_v12  ;;  %v469_v12 = vld [vmem:[%s7437_s1 + $0xd98] sm:$0xff] }
  0xb4   :  { %4285 = vmatprep.subr.bf16.mxu1 %v4284_v16  ;;  %v420_v16 = vld [vmem:[%s7437_s1 + $0xc10] sm:$0xff]  ;;  %v4336_v19 = vpack.c.bf16 %v469_v12, %v468_v9  ;;  %v956_v26 = vcombine.high %v6087_v11, %v6087_v11  ;;  %v447_v9 = vld [vmem:[%s7437_s1 + $0xce8] sm:$0xff]  ;;  %v478_v12 = vld [vmem:[%s7437_s1 + $0xde0] sm:$0xff] }
  0xb5   :  { %4255 = vmatpush3.bf16.msra.mxu0 %v4254_v22  ;;  %v439_v22 = vld [vmem:[%s7437_s1 + $0xca8] sm:$0xff]  ;;  %v4306_v27 = vpack.c.bf16 %v421_v17, %v420_v16  ;;  %v4324_v16 = vpack.c.bf16 %v447_v9, %v446_v7  ;;  %v430_v17 = vld [vmem:[%s7437_s1 + $0xc60] sm:$0xff] }
  0xb6   :  { %4257 = vmatprep.subr.bf16.mxu0 %v4256_v24  ;;  %v470_v24 = vld [vmem:[%s7437_s1 + $0xda0] sm:$0xff]  ;;  %v4308_v29 = vpack.c.bf16 %v439_v22, %v438_v21  ;;  %v463_v21 = vld [vmem:[%s7437_s1 + $0xd68] sm:$0xff]  ;;  %v448_v22 = vld [vmem:[%s7437_s1 + $0xcf0] sm:$0xff] }
  0xb7   :  { %4287 = vmatpush3.bf16.msra.mxu1 %v4286_v23  ;;  %v955_v23 = vcombine.high %v6078_v8, %v6078_v8  ;;  %v4340_v43 = vpack.c.bf16 %v471_v25, %v470_v24  ;;  %v480_v24 = vld [vmem:[%s7437_s1 + $0xdf0] sm:$0xff]  ;;  %v481_v25 = vld [vmem:[%s7437_s1 + $0xdf8] sm:$0xff]  ;;  %v487_v7 = vld [vmem:[%s7437_s1 + $0xe28] sm:$0xff] }
  0xb8   :  { %4289 = vmatprep.subr.bf16.mxu1 %v4288_v28  ;;  %v4338_v28 = vpack.c.bf16 %v453_v20, %v452_v18  ;;  %v431_v18 = vld [vmem:[%s7437_s1 + $0xc68] sm:$0xff]  ;;  %v518_v9 = vld [vmem:[%s7437_s1 + $0xf20] sm:$0xff] }
  0xb9   :  { %4259 = vmatpush3.bf16.msra.mxu0 %v4258_v36  ;;  %v441_v36 = vld [vmem:[%s7437_s1 + $0xcb8] sm:$0xff] }
  0xba   :  { %4261 = vmatprep.subr.bf16.mxu0 %v4260_v37  ;;  %v473_v37 = vld [vmem:[%s7437_s1 + $0xdb8] sm:$0xff]  ;;  %v4312_v40 = vpack.c.bf16 %v441_v36, %v440_v35  ;;  %v498_v35 = vld [vmem:[%s7437_s1 + $0xe80] sm:$0xff]  ;;  %v499_v36 = vld [vmem:[%s7437_s1 + $0xe88] sm:$0xff] }
  0xbb   :  { %4291 = vmatpush3.bf16.msra.mxu1 %v4290_v52  ;;  %v472_v52 = vld [vmem:[%s7437_s1 + $0xdb0] sm:$0xff] }
  0xbc   :  { %4293 = vmatprep.subr.bf16.mxu1 %v4292_v42  ;;  %v424_v42 = vld [vmem:[%s7437_s1 + $0xc30] sm:$0xff]  ;;  %v4344_v46 = vpack.c.bf16 %v473_v37, %v472_v52  ;;  %v530_v52 = vld [vmem:[%s7437_s1 + $0xf80] sm:$0xff]  ;;  %v531_v37 = vld [vmem:[%s7437_s1 + $0xf88] sm:$0xff] }
  0xbd   :  { %4263 = vmatpush3.bf16.msra.mxu0 %v4262_v49  ;;  %v443_v49 = vld [vmem:[%s7437_s1 + $0xcc8] sm:$0xff]  ;;  %v4396_v47 = vpack.c.bf16 %v531_v37, %v530_v52  ;;  %v508_v52 = vld [vmem:[%s7437_s1 + $0xed0] sm:$0xff]  ;;  %v509_v37 = vld [vmem:[%s7437_s1 + $0xed8] sm:$0xff] }
  0xbe   :  { %4265 = vmatprep.subr.bf16.mxu0 %v4264_v53  ;;  %v4314_v53 = vpack.c.bf16 %v425_v44, %v424_v42  ;;  %v4316_v32 = vpack.c.bf16 %v443_v49, %v442_v48  ;;  %v4364_v42 = vpack.c.bf16 %v499_v36, %v498_v35  ;;  %v482_v44 = vld [vmem:[%s7437_s1 + $0xe00] sm:$0xff]  ;;  %v515_v48 = vld [vmem:[%s7437_s1 + $0xf08] sm:$0xff]  ;;  %v500_v49 = vld [vmem:[%s7437_s1 + $0xe90] sm:$0xff] }
  0xbf   :  { %4295 = vmatpush3.bf16.msra.mxu1 %v4294_v51  ;;  %v475_v51 = vld [vmem:[%s7437_s1 + $0xdc8] sm:$0xff] }
  0xc0   :  { %4297 = vmatprep.subr.bf16.mxu1 %v4296_v56  ;;  %v427_v56 = vld [vmem:[%s7437_s1 + $0xc48] sm:$0xff]  ;;  %v4348_v41 = vpack.c.bf16 %v475_v51, %v474_v50  ;;  %v501_v50 = vld [vmem:[%s7437_s1 + $0xe98] sm:$0xff] }
  0xc1   :  { %4267 = vmatpush3.bf16.msra.mxu0 %v4266_v62  ;;  %v477_v62 = vld [vmem:[%s7437_s1 + $0xdd8] sm:$0xff]  ;;  %v523_v36 = vld [vmem:[%s7437_s1 + $0xf48] sm:$0xff] }
  0xc2   :  { %4301 = vmatprep.subr.bf16.mxu0 %v4300_v0  ;;  %v4350_v0 = vpack.c.bf16 %v459_v58, %v458_v57  ;;  %v4352_v5 = vpack.c.bf16 %v477_v62, %v476_v61  ;;  %v4368_v57 = vpack.c.bf16 %v501_v50, %v500_v49  ;;  %v485_v58 = vld [vmem:[%s7437_s1 + $0xe18] sm:$0xff]  ;;  %v502_v62 = vld [vmem:[%s7437_s1 + $0xea0] sm:$0xff] }
  0xc3   :  { %4299 = vmatpush3.bf16.msra.mxu1 %v4298_v63  ;;  %v4318_v63 = vpack.c.bf16 %v427_v56, %v426_v55  ;;  %v4366_v55 = vpack.c.bf16 %v483_v45, %v482_v44  ;;  %v517_v61 = vld [vmem:[%s7437_s1 + $0xf18] sm:$0xff]  ;;  %v4384_v44 = vpack.c.bf16 %v509_v37, %v508_v52  ;;  %v492_v45 = vld [vmem:[%s7437_s1 + $0xe50] sm:$0xff]  ;;  %v510_v50 = vld [vmem:[%s7437_s1 + $0xee0] sm:$0xff] }
  0xc4   :  { %4333 = vmatprep.subr.bf16.mxu1 %v4332_v4  ;;  %1863 = vmatmul.mubr.f32.vlgmr.msra.gmra.mrb[10].mxu0 %v5871_v31  ;;  %v422_v31 = vld [vmem:[%s7437_s1 + $0xc20] sm:$0xff]  ;;  %v460_v4 = vld [vmem:[%s7437_s1 + $0xd50] sm:$0xff]  ;;  %v525_v49 = vld [vmem:[%s7437_s1 + $0xf58] sm:$0xff] }
  0xc5   :  { %4303 = vmatpush3.bf16.msra.mxu0 %v4302_v13  ;;  %2002 = vmatprep.mubr.f32.mxu0 %v955_v23  ;;  %v4310_v38 = vpack.c.bf16 %v423_v30, %v422_v31  ;;  %v479_v13 = vld [vmem:[%s7437_s1 + $0xde8] sm:$0xff]  ;;  %v449_v23 = vld [vmem:[%s7437_s1 + $0xcf8] sm:$0xff]  ;;  %v432_v31 = vld [vmem:[%s7437_s1 + $0xc70] sm:$0xff] }
  0xc6   :  { %1933 = vmatmul.mubr.f32.vlgmr.msra.gmra.mrb[10].mxu1 %v5880_v34  ;;  %4305 = vmatprep.subr.bf16.mxu0 %v4304_v15  ;;  %v455_v34 = vld [vmem:[%s7437_s1 + $0xd28] sm:$0xff]  ;;  %v4354_v15 = vpack.c.bf16 %v461_v6, %v460_v4  ;;  %v4356_v20 = vpack.c.bf16 %v479_v13, %v478_v12  ;;  %v433_v30 = vld [vmem:[%s7437_s1 + $0xc78] sm:$0xff]  ;;  %v504_v13 = vld [vmem:[%s7437_s1 + $0xeb0] sm:$0xff] }
  0xc7   :  { %4335 = vmatpush3.bf16.msra.mxu1 %v4334_v14  ;;  %2072 = vmatprep.mubr.f32.mxu1 %v956_v26  ;;  %v4342_v39 = vpack.c.bf16 %v455_v34, %v454_v33  ;;  %v4322_v14 = vpack.c.bf16 %v429_v3, %v428_v2  ;;  %v4326_v26 = vpack.c.bf16 %v431_v18, %v430_v17  ;;  %v464_v33 = vld [vmem:[%s7437_s1 + $0xd70] sm:$0xff]  ;;  %v465_v34 = vld [vmem:[%s7437_s1 + $0xd78] sm:$0xff]  ;;  %v535_v2 = vld [vmem:[%s7437_s1 + $0xfa8] sm:$0xff] }
  0xc8   :  { %4337 = vmatprep.subr.bf16.mxu1 %v4336_v19  ;;  %v462_v19 = vld [vmem:[%s7437_s1 + $0xd60] sm:$0xff]  ;;  %v596_v37 = vld [vmem:[%s7437_s1 + $0x1190] sm:$0xff] }
  0xc9   :  { %4307 = vmatpush3.bf16.msra.mxu0 %v4306_v27  ;;  %v28_v27 = vld [vmem:[%s7436_s0 + $0x38] sm:$0xff] }
  0xca   :  { %4309 = vmatprep.subr.bf16.mxu0 %v4308_v29  ;;  %v4328_v29 = vpack.c.bf16 %v449_v23, %v448_v22  ;;  %v6285_v51 = vrot.slane %v28_v27, %v4956_v10  ;;  %v520_v22 = vld [vmem:[%s7437_s1 + $0xf30] sm:$0xff] }
  0xcb   :  { %4339 = vmatpush3.bf16.msra.mxu1 %v4338_v28  ;;  %v4358_v28 = vpack.c.bf16 %v463_v21, %v462_v19  ;;  %v489_v21 = vld [vmem:[%s7437_s1 + $0xe38] sm:$0xff] }
  0xcc   :  { %4341 = vmatprep.subr.bf16.mxu1 %v4340_v43  ;;  %v4360_v43 = vpack.c.bf16 %v481_v25, %v480_v24  ;;  %v521_v24 = vld [vmem:[%s7437_s1 + $0xf38] sm:$0xff]  ;;  %v506_v25 = vld [vmem:[%s7437_s1 + $0xec0] sm:$0xff] }
  0xcd   :  { %4311 = vmatpush3.bf16.msra.mxu0 %v4310_v38  ;;  %v957_v38 = vcombine.high %v28_v27, %v28_v27  ;;  %v538_v27 = vld [vmem:[%s7437_s1 + $0xfc0] sm:$0xff] }
  0xce   :  { %4313 = vmatprep.subr.bf16.mxu0 %v4312_v40  ;;  %v4362_v40 = vpack.c.bf16 %v465_v34, %v464_v33  ;;  %v490_v33 = vld [vmem:[%s7437_s1 + $0xe40] sm:$0xff] }
  0xcf   :  { %4343 = vmatpush3.bf16.msra.mxu1 %v4342_v39  ;;  %v4330_v39 = vpack.c.bf16 %v433_v30, %v432_v31  ;;  %v4410_v31 = vpack.c.bf16 %v521_v24, %v520_v22  ;;  %v522_v34 = vld [vmem:[%s7437_s1 + $0xf40] sm:$0xff]  ;;  %v563_v22 = vld [vmem:[%s7437_s1 + $0x1088] sm:$0xff] }
  0xd0   :  { %4345 = vmatprep.subr.bf16.mxu1 %v4344_v46  ;;  %v514_v46 = vld [vmem:[%s7437_s1 + $0xf00] sm:$0xff]  ;;  %v595_v24 = vld [vmem:[%s7437_s1 + $0x1188] sm:$0xff] }
  0xd1   :  { %4315 = vmatpush3.bf16.msra.mxu0 %v4314_v53  ;;  %v532_v53 = vld [vmem:[%s7437_s1 + $0xf90] sm:$0xff]  ;;  %v4398_v56 = vpack.c.bf16 %v515_v48, %v514_v46  ;;  %v493_v46 = vld [vmem:[%s7437_s1 + $0xe58] sm:$0xff] }
  0xd2   :  { %4317 = vmatprep.subr.bf16.mxu0 %v4316_v32  ;;  %v6294_v32 = vrot.slane %v957_v38, %v4956_v10  ;;  %v540_v38 = vld [vmem:[%s7437_s1 + $0xfd0] sm:$0xff] }
  0xd3   :  { %4347 = vmatpush3.bf16.msra.mxu1 %v4346_v54  ;;  %v533_v54 = vld [vmem:[%s7437_s1 + $0xf98] sm:$0xff] }
  0xd4   :  { %4349 = vmatprep.subr.bf16.mxu1 %v4348_v41  ;;  %v484_v41 = vld [vmem:[%s7437_s1 + $0xe10] sm:$0xff]  ;;  %v4400_v60 = vpack.c.bf16 %v533_v54, %v532_v53  ;;  %v973_v3 = vcombine.high %v6294_v32, %v6294_v32  ;;  %v511_v53 = vld [vmem:[%s7437_s1 + $0xee8] sm:$0xff]  ;;  %v542_v54 = vld [vmem:[%s7437_s1 + $0xfe0] sm:$0xff] }
  0xd5   :  { %4319 = vmatpush3.bf16.msra.mxu0 %v4318_v63  ;;  %v503_v63 = vld [vmem:[%s7437_s1 + $0xea8] sm:$0xff]  ;;  %v4370_v4 = vpack.c.bf16 %v485_v58, %v484_v41  ;;  %v4388_v41 = vpack.c.bf16 %v511_v53, %v510_v50  ;;  %v494_v58 = vld [vmem:[%s7437_s1 + $0xe60] sm:$0xff] }
  0xd6   :  { %4321 = vmatprep.subr.bf16.mxu0 %v4320_v1  ;;  %v534_v1 = vld [vmem:[%s7437_s1 + $0xfa0] sm:$0xff]  ;;  %v4372_v6 = vpack.c.bf16 %v503_v63, %v502_v62  ;;  %v527_v63 = vld [vmem:[%s7437_s1 + $0xf68] sm:$0xff] }
  0xd7   :  { %4351 = vmatpush3.bf16.msra.mxu1 %v4350_v0  ;;  %v972_v0 = vcombine.high %v6285_v51, %v6285_v51  ;;  %v4404_v12 = vpack.c.bf16 %v535_v2, %v534_v1  ;;  %v513_v1 = vld [vmem:[%s7437_s1 + $0xef8] sm:$0xff]  ;;  %v2969_v2 = vld [vmem:[%s7438_s2] ss:$0 sm:$0xff]  ;;  %v567_v53 = vld [vmem:[%s7437_s1 + $0x10a8] sm:$0xff] }
  0xd8   :  { %4353 = vmatprep.subr.bf16.mxu1 %v4352_v5  ;;  %v4402_v5 = vpack.c.bf16 %v517_v61, %v516_v59  ;;  %v495_v59 = vld [vmem:[%s7437_s1 + $0xe68] sm:$0xff]  ;;  %v566_v50 = vld [vmem:[%s7437_s1 + $0x10a0] sm:$0xff] }
  0xd9   :  { %4323 = vmatpush3.bf16.msra.mxu0 %v4322_v14  ;;  %v505_v14 = vld [vmem:[%s7437_s1 + $0xeb8] sm:$0xff] }
  0xda   :  { %4325 = vmatprep.subr.bf16.mxu0 %v4324_v16  ;;  %v537_v16 = vld [vmem:[%s7437_s1 + $0xfb8] sm:$0xff]  ;;  %v4376_v19 = vpack.c.bf16 %v505_v14, %v504_v13 }
  0xdb   :  { %4355 = vmatpush3.bf16.msra.mxu1 %v4354_v15  ;;  %v536_v15 = vld [vmem:[%s7437_s1 + $0xfb0] sm:$0xff] }
  0xdc   :  { %4357 = vmatprep.subr.bf16.mxu1 %v4356_v20  ;;  %v488_v20 = vld [vmem:[%s7437_s1 + $0xe30] sm:$0xff]  ;;  %v4408_v23 = vpack.c.bf16 %v537_v16, %v536_v15  ;;  %v497_v16 = vld [vmem:[%s7437_s1 + $0xe78] sm:$0xff] }
  0xdd   :  { %4327 = vmatpush3.bf16.msra.mxu0 %v4326_v26  ;;  %v507_v26 = vld [vmem:[%s7437_s1 + $0xec8] sm:$0xff]  ;;  %v496_v15 = vld [vmem:[%s7437_s1 + $0xe70] sm:$0xff] }
  0xde   :  { %4329 = vmatprep.subr.bf16.mxu0 %v4328_v29  ;;  %v4378_v29 = vpack.c.bf16 %v489_v21, %v488_v20  ;;  %v4380_v30 = vpack.c.bf16 %v507_v26, %v506_v25  ;;  %v529_v20 = vld [vmem:[%s7437_s1 + $0xf78] sm:$0xff]  ;;  %v562_v21 = vld [vmem:[%s7437_s1 + $0x1080] sm:$0xff] }
  0xdf   :  { %4359 = vmatpush3.bf16.msra.mxu1 %v4358_v28  ;;  %v539_v28 = vld [vmem:[%s7437_s1 + $0xfc8] sm:$0xff] }
  0xe0   :  { %4361 = vmatprep.subr.bf16.mxu1 %v4360_v43  ;;  %v491_v43 = vld [vmem:[%s7437_s1 + $0xe48] sm:$0xff]  ;;  %v4412_v35 = vpack.c.bf16 %v539_v28, %v538_v27  ;;  %v4394_v27 = vpack.c.bf16 %v497_v16, %v496_v15 }
  0xe1   :  { %4331 = vmatpush3.bf16.msra.mxu0 %v4330_v39  ;;  %v541_v39 = vld [vmem:[%s7437_s1 + $0xfd8] sm:$0xff] }
  0xe2   :  { %4365 = vmatprep.subr.bf16.mxu0 %v4364_v42  ;;  %v4414_v42 = vpack.c.bf16 %v523_v36, %v522_v34  ;;  %v4416_v48 = vpack.c.bf16 %v541_v39, %v540_v38  ;;  %v579_v34 = vld [vmem:[%s7437_s1 + $0x1108] sm:$0xff]  ;;  %v565_v36 = vld [vmem:[%s7437_s1 + $0x1098] sm:$0xff] }
  0xe3   :  { %4363 = vmatpush3.bf16.msra.mxu1 %v4362_v40  ;;  %v4382_v40 = vpack.c.bf16 %v491_v43, %v490_v33  ;;  %v578_v33 = vld [vmem:[%s7437_s1 + $0x1100] sm:$0xff]  ;;  %v597_v38 = vld [vmem:[%s7437_s1 + $0x1198] sm:$0xff] }
  0xe4   :  { %4397 = vmatprep.subr.bf16.mxu1 %v4396_v47  ;;  %2003 = vmatmul.mubr.f32.vlgmr.msra.gmra.mrb[12].mxu0 %v6078_v8  ;;  %v486_v8 = vld [vmem:[%s7437_s1 + $0xe20] sm:$0xff]  ;;  %v524_v47 = vld [vmem:[%s7437_s1 + $0xf50] sm:$0xff] }
  0xe5   :  { %4367 = vmatpush3.bf16.msra.mxu0 %v4366_v55  ;;  %2142 = vmatprep.mubr.f32.mxu0 %v972_v0  ;;  %v4374_v17 = vpack.c.bf16 %v487_v7, %v486_v8  ;;  %v543_v55 = vld [vmem:[%s7437_s1 + $0xfe8] sm:$0xff]  ;;  %v512_v0 = vld [vmem:[%s7437_s1 + $0xef0] sm:$0xff] }
  0xe6   :  { %2073 = vmatmul.mubr.f32.vlgmr.msra.gmra.mrb[12].mxu1 %v6087_v11  ;;  %4369 = vmatprep.subr.bf16.mxu0 %v4368_v57  ;;  %v519_v11 = vld [vmem:[%s7437_s1 + $0xf28] sm:$0xff]  ;;  %v4418_v57 = vpack.c.bf16 %v525_v49, %v524_v47  ;;  %v4420_v62 = vpack.c.bf16 %v543_v55, %v542_v54  ;;  %v4392_v14 = vpack.c.bf16 %v513_v1, %v512_v0  ;;  %v580_v47 = vld [vmem:[%s7437_s1 + $0x1110] sm:$0xff]  ;;  %v581_v49 = vld [vmem:[%s7437_s1 + $0x1118] sm:$0xff] }
  0xe7   :  { %4399 = vmatpush3.bf16.msra.mxu1 %v4398_v56  ;;  %2212 = vmatprep.mubr.f32.mxu1 %v973_v3  ;;  %v4406_v18 = vpack.c.bf16 %v519_v11, %v518_v9  ;;  %v4386_v56 = vpack.c.bf16 %v493_v46, %v492_v45  ;;  %v4390_v9 = vpack.c.bf16 %v495_v59, %v494_v58  ;;  %v548_v45 = vld [vmem:[%s7437_s1 + $0x1010] sm:$0xff]  ;;  %v549_v46 = vld [vmem:[%s7437_s1 + $0x1018] sm:$0xff]  ;;  %v598_v55 = vld [vmem:[%s7437_s1 + $0x11a0] sm:$0xff] }
  0xe8   :  { %4401 = vmatprep.subr.bf16.mxu1 %v4400_v60  ;;  %v526_v60 = vld [vmem:[%s7437_s1 + $0xf60] sm:$0xff]  ;;  %v4436_v59 = vpack.c.bf16 %v567_v53, %v566_v50 }
  0xe9   :  { %4371 = vmatpush3.bf16.msra.mxu0 %v4370_v4  ;;  %v4422_v13 = vpack.c.bf16 %v527_v63, %v526_v60  ;;  %v550_v58 = vld [vmem:[%s7437_s1 + $0x1020] sm:$0xff]  ;;  %v551_v60 = vld [vmem:[%s7437_s1 + $0x1028] sm:$0xff] }
  0xea   :  { %4373 = vmatprep.subr.bf16.mxu0 %v4372_v6  ;;  %v545_v6 = vld [vmem:[%s7437_s1 + $0xff8] sm:$0xff] }
  0xeb   :  { %4403 = vmatpush3.bf16.msra.mxu1 %v4402_v5  ;;  %v544_v5 = vld [vmem:[%s7437_s1 + $0xff0] sm:$0xff] }
  0xec   :  { %4405 = vmatprep.subr.bf16.mxu1 %v4404_v12  ;;  %v29_v12 = vld [vmem:[%s7436_s0 + $0x40] sm:$0xff] }
  0xed   :  { %4375 = vmatpush3.bf16.msra.mxu0 %v4374_v17  ;;  %v528_v17 = vld [vmem:[%s7437_s1 + $0xf70] sm:$0xff]  ;;  %v974_v25 = vcombine.high %v29_v12, %v29_v12  ;;  %v6497_v52 = vrot.slane %v29_v12, %v4956_v10 }
  0xee   :  { %4377 = vmatprep.subr.bf16.mxu0 %v4376_v19  ;;  %v4424_v19 = vpack.c.bf16 %v545_v6, %v544_v5  ;;  %v4426_v28 = vpack.c.bf16 %v529_v20, %v528_v17 }
  0xef   :  { %4407 = vmatpush3.bf16.msra.mxu1 %v4406_v18  ;;  %v6506_v39 = vrot.slane %v974_v25, %v4956_v10  ;;  %v989_v54 = vcombine.high %v6497_v52, %v6497_v52 }
  0xf0   :  { %4409 = vmatprep.subr.bf16.mxu1 %v4408_v23  ;;  %v594_v23 = vld [vmem:[%s7437_s1 + $0x1180] sm:$0xff] }
  0xf1   :  { %4379 = vmatpush3.bf16.msra.mxu0 %v4378_v29  ;;  %v4428_v29 = vpack.c.bf16 %v563_v22, %v562_v21  ;;  %v4460_v43 = vpack.c.bf16 %v595_v24, %v594_v23 }
  0xf2   :  { %4381 = vmatprep.subr.bf16.mxu0 %v4380_v30  ;;  %v547_v30 = vld [vmem:[%s7437_s1 + $0x1008] sm:$0xff] }
  0xf3   :  { %4411 = vmatpush3.bf16.msra.mxu1 %v4410_v31  ;;  %v546_v31 = vld [vmem:[%s7437_s1 + $0x1000] sm:$0xff] }
  0xf4   :  { %4413 = vmatprep.subr.bf16.mxu1 %v4412_v35  ;;  %v564_v35 = vld [vmem:[%s7437_s1 + $0x1090] sm:$0xff] }
  0xf5   :  { %4383 = vmatpush3.bf16.msra.mxu0 %v4382_v40  ;;  %v4430_v40 = vpack.c.bf16 %v547_v30, %v546_v31 }
  0xf6   :  { %4385 = vmatprep.subr.bf16.mxu0 %v4384_v44  ;;  %v4432_v44 = vpack.c.bf16 %v565_v36, %v564_v35 }
  0xf7   :  { %4415 = vmatpush3.bf16.msra.mxu1 %v4414_v42  ;;  %v3004_v61 = vpop.f32.mrb[0].mxu0  ;;  %v4462_v42 = vpack.c.bf16 %v579_v34, %v578_v33 }
  0xf8   :  { %4417 = vmatprep.subr.bf16.mxu1 %v4416_v48  ;;  %v3005_v3 = vpop.f32.mrb[1].mxu0  ;;  %v4464_v48 = vpack.c.bf16 %v597_v38, %v596_v37 }
  0xf9   :  { %v3039_v4 = vpop.f32.mrb[0].mxu1  ;;  %v3006_v8 = vadd.f32 %v3005_v3, %v3004_v61  ;;  %4387 = vmatpush3.bf16.msra.mxu0 %v4386_v56  ;;  %v599_v56 = vld [vmem:[%s7437_s1 + $0x11a8] sm:$0xff]  ;;  %v582_v61 = vld [vmem:[%s7437_s1 + $0x1120] sm:$0xff] }
  0xfa   :  { %v3040_v7 = vpop.f32.mrb[1].mxu1  ;;  %4389 = vmatprep.subr.bf16.mxu0 %v4388_v41  ;;  %v4434_v41 = vpack.c.bf16 %v549_v46, %v548_v45 }
  0xfb   :  { %v3041_v11 = vadd.f32 %v3040_v7, %v3039_v4  ;;  %4419 = vmatpush3.bf16.msra.mxu1 %v4418_v57  ;;  %v1165_v18 = vadd.f32 %v3006_v8, %v2969_v2  ;;  %v990_v57 = vcombine.high %v6506_v39, %v6506_v39 }
  0xfc   :  { %4421 = vmatprep.subr.bf16.mxu1 %v4420_v62 }
  0xfd   :  { %v6476_v26 = vadd.f32 %v3041_v11, %v1165_v18  ;;  %4391 = vmatpush3.bf16.msra.mxu0 %v4390_v9 }
  0xfe   :  { %4393 = vmatprep.subr.bf16.mxu0 %v4392_v14 }
  0xff   :  { %4423 = vmatpush3.bf16.msra.mxu1 %v4422_v13 }
 0x100   :  { %4425 = vmatprep.subr.bf16.mxu1 %v4424_v19 }
 0x101   :  { %4395 = vmatpush3.bf16.msra.mxu0 %v4394_v27 }
 0x102   :  { %4429 = vmatprep.subr.bf16.mxu0 %v4428_v29 }
 0x103   :  { %4427 = vmatpush3.bf16.msra.mxu1 %v4426_v28 }
 0x104   :  { %4461 = vmatprep.subr.bf16.mxu1 %v4460_v43  ;;  %2143 = vmatmul.mubr.f32.vlgmr.msra.gmra.mrb[14].mxu0 %v6285_v51  ;;  %v4466_v51 = vpack.c.bf16 %v581_v49, %v580_v47 }
 0x105   :  { %4431 = vmatpush3.bf16.msra.mxu0 %v4430_v40 }
 0x106   :  { %2213 = vmatmul.mubr.f32.vlgmr.msra.gmra.mrb[14].mxu1 %v6294_v32  ;;  %4433 = vmatprep.subr.bf16.mxu0 %v4432_v44 }
 0x107   :  { %4463 = vmatpush3.bf16.msra.mxu1 %v4462_v42 }
 0x108   :  { %10 = vsyncpa [#allocation3], 0  ;;  %4465 = vmatprep.subr.bf16.mxu1 %v4464_v48  ;;  %v4468_v32 = vpack.c.bf16 %v599_v56, %v598_v55  ;;  %v583_v62 = vld [vmem:[%s7437_s1 + $0x1128] sm:$0xff]  ;;  %v568_v63 = vld [vmem:[%s7437_s1 + $0x10b0] sm:$0xff]  ;;  %2282 = vmatprep.mubr.f32.mxu0 %v989_v54  ;;  %v4438_v3 = vpack.c.bf16 %v551_v60, %v550_v58  ;;  %vm4779_vm0 = vmmov 0   ;;  %vm2941_vm1 = vcmask 74752  }
 0x109   :  { %v569_v0 = vld [vmem:[%s7437_s1 + $0x10b8] sm:$0xff]  ;;  %v600_v1 = vld [vmem:[%s7437_s1 + $0x11b0] sm:$0xff]  ;;  %2352 = vmatprep.mubr.f32.mxu1 %v990_v57  ;;  %4435 = vmatpush3.bf16.msra.mxu0 %v4434_v41  ;;  %v4470_v4 = vpack.c.bf16 %v583_v62, %v582_v61  ;;  %v570_v11 = vld [vmem:[%s7437_s1 + $0x10c0] sm:$0xff]  ;;  %s4781_s20 = smov [#allocation2]  }
 0x10a   :  { %v601_v2 = vld [vmem:[%s7437_s1 + $0x11b8] sm:$0xff]  ;;  %4437 = vmatprep.subr.bf16.mxu0 %v4436_v59  ;;  %v4440_v5 = vpack.c.bf16 %v569_v0, %v568_v63  ;;  %v552_v6 = vld [vmem:[%s7437_s1 + $0x1030] sm:$0xff]  ;;  %v571_v13 = vld [vmem:[%s7437_s1 + $0x10c8] sm:$0xff] }
 0x10b   :  { %4467 = vmatpush3.bf16.msra.mxu1 %v4466_v51  ;;  %v553_v8 = vld [vmem:[%s7437_s1 + $0x1038] sm:$0xff]  ;;  %v584_v7 = vld [vmem:[%s7437_s1 + $0x1130] sm:$0xff]  ;;  %v4472_v9 = vpack.c.bf16 %v601_v2, %v600_v1  ;;  %v602_v14 = vld [vmem:[%s7437_s1 + $0x11c0] sm:$0xff]  ;;  %v4444_v18 = vpack.c.bf16 %v571_v13, %v570_v11 }
 0x10c   :  { %4469 = vmatprep.subr.bf16.mxu1 %v4468_v32  ;;  %v585_v12 = vld [vmem:[%s7437_s1 + $0x1138] sm:$0xff]  ;;  %v603_v15 = vld [vmem:[%s7437_s1 + $0x11c8] sm:$0xff]  ;;  %v4442_v16 = vpack.c.bf16 %v553_v8, %v552_v6  ;;  %v554_v19 = vld [vmem:[%s7437_s1 + $0x1040] sm:$0xff] }
 0x10d   :  { %4439 = vmatpush3.bf16.msra.mxu0 %v4438_v3  ;;  %v4474_v17 = vpack.c.bf16 %v585_v12, %v584_v7  ;;  %v555_v20 = vld [vmem:[%s7437_s1 + $0x1048] sm:$0xff]  ;;  %v586_v21 = vld [vmem:[%s7437_s1 + $0x1140] sm:$0xff]  ;;  %v4476_v22 = vpack.c.bf16 %v603_v15, %v602_v14  ;;  %v572_v24 = vld [vmem:[%s7437_s1 + $0x10d0] sm:$0xff] }
 0x10e   :  { %4441 = vmatprep.subr.bf16.mxu0 %v4440_v5  ;;  %v587_v23 = vld [vmem:[%s7437_s1 + $0x1148] sm:$0xff]  ;;  %v573_v25 = vld [vmem:[%s7437_s1 + $0x10d8] sm:$0xff]  ;;  %v604_v27 = vld [vmem:[%s7437_s1 + $0x11d0] sm:$0xff]  ;;  %v4446_v29 = vpack.c.bf16 %v555_v20, %v554_v19 }
 0x10f   :  { %4471 = vmatpush3.bf16.msra.mxu1 %v4470_v4  ;;  %v605_v28 = vld [vmem:[%s7437_s1 + $0x11d8] sm:$0xff]  ;;  %v4478_v31 = vpack.c.bf16 %v587_v23, %v586_v21  ;;  %v4448_v30 = vpack.c.bf16 %v573_v25, %v572_v24  ;;  %v556_v33 = vld [vmem:[%s7437_s1 + $0x1050] sm:$0xff]  ;;  %v574_v37 = vld [vmem:[%s7437_s1 + $0x10e0] sm:$0xff] }
 0x110   :  { %4473 = vmatprep.subr.bf16.mxu1 %v4472_v9  ;;  %v557_v43 = vld [vmem:[%s7437_s1 + $0x1058] sm:$0xff]  ;;  %v588_v34 = vld [vmem:[%s7437_s1 + $0x1150] sm:$0xff]  ;;  %v4480_v35 = vpack.c.bf16 %v605_v28, %v604_v27  ;;  %v575_v38 = vld [vmem:[%s7437_s1 + $0x10e8] sm:$0xff] }
 0x111   :  { %4443 = vmatpush3.bf16.msra.mxu0 %v4442_v16  ;;  %v589_v36 = vld [vmem:[%s7437_s1 + $0x1158] sm:$0xff]  ;;  %v606_v40 = vld [vmem:[%s7437_s1 + $0x11e0] sm:$0xff]  ;;  %v607_v42 = vld [vmem:[%s7437_s1 + $0x11e8] sm:$0xff]  ;;  %v4450_v44 = vpack.c.bf16 %v557_v43, %v556_v33  ;;  %v4452_v46 = vpack.c.bf16 %v575_v38, %v574_v37 }
 0x112   :  { %4445 = vmatprep.subr.bf16.mxu0 %v4444_v18  ;;  %v4482_v45 = vpack.c.bf16 %v589_v36, %v588_v34  ;;  %v558_v47 = vld [vmem:[%s7437_s1 + $0x1060] sm:$0xff]  ;;  %v559_v48 = vld [vmem:[%s7437_s1 + $0x1068] sm:$0xff]  ;;  %v4484_v53 = vpack.c.bf16 %v607_v42, %v606_v40  ;;  %v576_v55 = vld [vmem:[%s7437_s1 + $0x10f0] sm:$0xff] }
 0x113   :  { %4475 = vmatpush3.bf16.msra.mxu1 %v4474_v17  ;;  %v590_v49 = vld [vmem:[%s7437_s1 + $0x1160] sm:$0xff]  ;;  %v591_v54 = vld [vmem:[%s7437_s1 + $0x1168] sm:$0xff]  ;;  %v577_v56 = vld [vmem:[%s7437_s1 + $0x10f8] sm:$0xff]  ;;  %v4454_v61 = vpack.c.bf16 %v559_v48, %v558_v47 }
 0x114   :  { %4477 = vmatprep.subr.bf16.mxu1 %v4476_v22  ;;  %v608_v58 = vld [vmem:[%s7437_s1 + $0x11f0] sm:$0xff]  ;;  %v609_v51 = vld [vmem:[%s7437_s1 + $0x11f8] sm:$0xff]  ;;  %v30_v32 = vld [vmem:[%s7436_s0 + $0x48] sm:$0xff]  ;;  %v4486_v63 = vpack.c.bf16 %v591_v54, %v590_v49  ;;  %v4456_v0 = vpack.c.bf16 %v577_v56, %v576_v55 }
 0x115   :  { %4447 = vmatpush3.bf16.msra.mxu0 %v4446_v29  ;;  %v560_v1 = vld [vmem:[%s7437_s1 + $0x1070] sm:$0xff]  ;;  %v561_v2 = vld [vmem:[%s7437_s1 + $0x1078] sm:$0xff]  ;;  %v4488_v5 = vpack.c.bf16 %v609_v51, %v608_v58  ;;  %v626_v8 = vld [vmem:[%s7437_s1 + $0x1280] sm:$0xff]  ;;  %v991_v12 = vcombine.high %v30_v32, %v30_v32  ;;  %v6707_v23 = vrot.slane %v30_v32, %v4956_v10 }
 0x116   :  { %4449 = vmatprep.subr.bf16.mxu0 %v4448_v30  ;;  %v592_v3 = vld [vmem:[%s7437_s1 + $0x1170] sm:$0xff]  ;;  %v593_v6 = vld [vmem:[%s7437_s1 + $0x1178] sm:$0xff]  ;;  %v627_v7 = vld [vmem:[%s7437_s1 + $0x1288] sm:$0xff]  ;;  %v4458_v13 = vpack.c.bf16 %v561_v2, %v560_v1 }
 0x117   :  { %4479 = vmatpush3.bf16.msra.mxu1 %v4478_v31  ;;  %v3074_v50 = vpop.f32.mrb[2].mxu0  ;;  %v658_v9 = vld [vmem:[%s7437_s1 + $0x1380] sm:$0xff]  ;;  %v4490_v14 = vpack.c.bf16 %v593_v6, %v592_v3  ;;  %v4492_v15 = vpack.c.bf16 %v627_v7, %v626_v8  ;;  %v611_v17 = vld [vmem:[%s7437_s1 + $0x1208] sm:$0xff]  ;;  %v628_v21 = vld [vmem:[%s7437_s1 + $0x1290] sm:$0xff]  ;;  %v6716_v27 = vrot.slane %v991_v12, %v4956_v10  ;;  %v1006_v38 = vcombine.high %v6707_v23, %v6707_v23 }
 0x118   :  { %4481 = vmatprep.subr.bf16.mxu1 %v4480_v35  ;;  %v3075_v57 = vpop.f32.mrb[3].mxu0  ;;  %v610_v16 = vld [vmem:[%s7437_s1 + $0x1200] sm:$0xff]  ;;  %v643_v20 = vld [vmem:[%s7437_s1 + $0x1308] sm:$0xff]  ;;  %v629_v22 = vld [vmem:[%s7437_s1 + $0x1298] sm:$0xff] }
 0x119   :  { %v3109_v41 = vpop.f32.mrb[2].mxu1  ;;  %v3076_v59 = vadd.f32 %v3075_v57, %v3074_v50  ;;  %4451 = vmatpush3.bf16.msra.mxu0 %v4450_v44  ;;  %v642_v18 = vld [vmem:[%s7437_s1 + $0x1300] sm:$0xff]  ;;  %v660_v24 = vld [vmem:[%s7437_s1 + $0x1390] sm:$0xff]  ;;  %v661_v25 = vld [vmem:[%s7437_s1 + $0x1398] sm:$0xff]  ;;  %v4494_v28 = vpack.c.bf16 %v611_v17, %v610_v16  ;;  %v4496_v31 = vpack.c.bf16 %v629_v22, %v628_v21  ;;  %v1007_v44 = vcombine.high %v6716_v27, %v6716_v27 }
 0x11a   :  { %v3110_v60 = vpop.f32.mrb[3].mxu1  ;;  %4453 = vmatprep.subr.bf16.mxu0 %v4452_v46  ;;  %v4526_v29 = vpack.c.bf16 %v643_v20, %v642_v18  ;;  %v612_v30 = vld [vmem:[%s7437_s1 + $0x1210] sm:$0xff]  ;;  %v613_v33 = vld [vmem:[%s7437_s1 + $0x1218] sm:$0xff]  ;;  %v4528_v34 = vpack.c.bf16 %v661_v25, %v660_v24  ;;  %v630_v36 = vld [vmem:[%s7437_s1 + $0x12a0] sm:$0xff] }
 0x11b   :  { %v3111_v62 = vadd.f32 %v3110_v60, %v3109_v41  ;;  %4483 = vmatpush3.bf16.msra.mxu1 %v4482_v45  ;;  %v1305_v4 = vadd.f32 %v3076_v59, %v6476_v26  ;;  %v659_v26 = vld [vmem:[%s7437_s1 + $0x1388] sm:$0xff]  ;;  %v644_v43 = vld [vmem:[%s7437_s1 + $0x1310] sm:$0xff]  ;;  %v645_v35 = vld [vmem:[%s7437_s1 + $0x1318] sm:$0xff]  ;;  %v4498_v45 = vpack.c.bf16 %v613_v33, %v612_v30 }
 0x11c   :  { %4485 = vmatprep.subr.bf16.mxu1 %v4484_v53  ;;  %v4524_v19 = vpack.c.bf16 %v659_v26, %v658_v9  ;;  %v631_v37 = vld [vmem:[%s7437_s1 + $0x12a8] sm:$0xff]  ;;  %v662_v40 = vld [vmem:[%s7437_s1 + $0x13a0] sm:$0xff]  ;;  %v4530_v46 = vpack.c.bf16 %v645_v35, %v644_v43  ;;  %v632_v53 = vld [vmem:[%s7437_s1 + $0x12b0] sm:$0xff] }
 0x11d   :  { %v6686_v11 = vadd.f32 %v3111_v62, %v1305_v4  ;;  %4455 = vmatpush3.bf16.msra.mxu0 %v4454_v61  ;;  %v663_v42 = vld [vmem:[%s7437_s1 + $0x13a8] sm:$0xff]  ;;  %v4500_v47 = vpack.c.bf16 %v631_v37, %v630_v36  ;;  %v646_v49 = vld [vmem:[%s7437_s1 + $0x1320] sm:$0xff]  ;;  %v633_v54 = vld [vmem:[%s7437_s1 + $0x12b8] sm:$0xff] }
 0x11e   :  { %4457 = vmatprep.subr.bf16.mxu0 %v4456_v0  ;;  %v615_v48 = vld [vmem:[%s7437_s1 + $0x1228] sm:$0xff]  ;;  %v4532_v50 = vpack.c.bf16 %v663_v42, %v662_v40  ;;  %v664_v55 = vld [vmem:[%s7437_s1 + $0x13b0] sm:$0xff]  ;;  %v665_v56 = vld [vmem:[%s7437_s1 + $0x13b8] sm:$0xff]  ;;  %v4504_v58 = vpack.c.bf16 %v633_v54, %v632_v53 }
 0x11f   :  { %4487 = vmatpush3.bf16.msra.mxu1 %v4486_v63  ;;  %v616_v51 = vld [vmem:[%s7437_s1 + $0x1230] sm:$0xff]  ;;  %v617_v59 = vld [vmem:[%s7437_s1 + $0x1238] sm:$0xff]  ;;  %v4536_v61 = vpack.c.bf16 %v665_v56, %v664_v55  ;;  %v634_v62 = vld [vmem:[%s7437_s1 + $0x12c0] sm:$0xff] }
 0x120   :  { %4489 = vmatprep.subr.bf16.mxu1 %v4488_v5  ;;  %v648_v60 = vld [vmem:[%s7437_s1 + $0x1330] sm:$0xff]  ;;  %v649_v32 = vld [vmem:[%s7437_s1 + $0x1338] sm:$0xff]  ;;  %v635_v63 = vld [vmem:[%s7437_s1 + $0x12c8] sm:$0xff]  ;;  %v4506_v2 = vpack.c.bf16 %v617_v59, %v616_v51 }
 0x121   :  { %4459 = vmatpush3.bf16.msra.mxu0 %v4458_v13  ;;  %v666_v0 = vld [vmem:[%s7437_s1 + $0x13c0] sm:$0xff]  ;;  %v667_v1 = vld [vmem:[%s7437_s1 + $0x13c8] sm:$0xff]  ;;  %v4538_v3 = vpack.c.bf16 %v649_v32, %v648_v60  ;;  %v4508_v4 = vpack.c.bf16 %v635_v63, %v634_v62  ;;  %v636_v26 = vld [vmem:[%s7437_s1 + $0x12d0] sm:$0xff] }
 0x122   :  { %4493 = vmatprep.subr.bf16.mxu0 %v4492_v15  ;;  %v618_v5 = vld [vmem:[%s7437_s1 + $0x1240] sm:$0xff]  ;;  %v619_v6 = vld [vmem:[%s7437_s1 + $0x1248] sm:$0xff]  ;;  %v4540_v7 = vpack.c.bf16 %v667_v1, %v666_v0  ;;  %v637_v12 = vld [vmem:[%s7437_s1 + $0x12d8] sm:$0xff] }
 0x123   :  { %4491 = vmatpush3.bf16.msra.mxu1 %v4490_v14  ;;  %v650_v8 = vld [vmem:[%s7437_s1 + $0x1340] sm:$0xff]  ;;  %v651_v9 = vld [vmem:[%s7437_s1 + $0x1348] sm:$0xff]  ;;  %v668_v13 = vld [vmem:[%s7437_s1 + $0x13d0] sm:$0xff]  ;;  %v4510_v15 = vpack.c.bf16 %v619_v6, %v618_v5  ;;  %v4512_v17 = vpack.c.bf16 %v637_v12, %v636_v26 }
 0x124   :  { %4525 = vmatprep.subr.bf16.mxu1 %v4524_v19  ;;  %2283 = vmatmul.mubr.f32.vlgmr.msra.gmra.mrb[16].mxu0 %v6497_v52  ;;  %v614_v52 = vld [vmem:[%s7437_s1 + $0x1220] sm:$0xff]  ;;  %v669_v14 = vld [vmem:[%s7437_s1 + $0x13d8] sm:$0xff]  ;;  %v4542_v16 = vpack.c.bf16 %v651_v9, %v650_v8  ;;  %v620_v18 = vld [vmem:[%s7437_s1 + $0x1250] sm:$0xff] }
 0x125   :  { %4495 = vmatpush3.bf16.msra.mxu0 %v4494_v28  ;;  %2422 = vmatprep.mubr.f32.mxu0 %v1006_v38  ;;  %v4502_v57 = vpack.c.bf16 %v615_v48, %v614_v52  ;;  %v621_v19 = vld [vmem:[%s7437_s1 + $0x1258] sm:$0xff]  ;;  %v652_v20 = vld [vmem:[%s7437_s1 + $0x1350] sm:$0xff]  ;;  %v4544_v21 = vpack.c.bf16 %v669_v14, %v668_v13  ;;  %v638_v24 = vld [vmem:[%s7437_s1 + $0x12e0] sm:$0xff] }
 0x126   :  { %2353 = vmatmul.mubr.f32.vlgmr.msra.gmra.mrb[16].mxu1 %v6506_v39  ;;  %4497 = vmatprep.subr.bf16.mxu0 %v4496_v31  ;;  %v647_v39 = vld [vmem:[%s7437_s1 + $0x1328] sm:$0xff]  ;;  %v653_v22 = vld [vmem:[%s7437_s1 + $0x1358] sm:$0xff]  ;;  %v670_v28 = vld [vmem:[%s7437_s1 + $0x13e0] sm:$0xff]  ;;  %v4514_v31 = vpack.c.bf16 %v621_v19, %v620_v18 }
 0x127   :  { %4527 = vmatpush3.bf16.msra.mxu1 %v4526_v29  ;;  %2492 = vmatprep.mubr.f32.mxu1 %v1007_v44  ;;  %v4534_v41 = vpack.c.bf16 %v647_v39, %v646_v49  ;;  %v639_v25 = vld [vmem:[%s7437_s1 + $0x12e8] sm:$0xff]  ;;  %v4546_v30 = vpack.c.bf16 %v653_v22, %v652_v20  ;;  %v622_v43 = vld [vmem:[%s7437_s1 + $0x1260] sm:$0xff]  ;;  %v640_v40 = vld [vmem:[%s7437_s1 + $0x12f0] sm:$0xff] }
 0x128   :  { %4529 = vmatprep.subr.bf16.mxu1 %v4528_v34  ;;  %v671_v29 = vld [vmem:[%s7437_s1 + $0x13e8] sm:$0xff]  ;;  %v4516_v33 = vpack.c.bf16 %v639_v25, %v638_v24  ;;  %v654_v35 = vld [vmem:[%s7437_s1 + $0x1360] sm:$0xff]  ;;  %v641_v42 = vld [vmem:[%s7437_s1 + $0x12f8] sm:$0xff] }
 0x129   :  { %4499 = vmatpush3.bf16.msra.mxu0 %v4498_v45  ;;  %v623_v34 = vld [vmem:[%s7437_s1 + $0x1268] sm:$0xff]  ;;  %v4548_v37 = vpack.c.bf16 %v671_v29, %v670_v28  ;;  %v4520_v54 = vpack.c.bf16 %v641_v42, %v640_v40  ;;  %v624_v55 = vld [vmem:[%s7437_s1 + $0x1270] sm:$0xff]  ;;  %v625_v56 = vld [vmem:[%s7437_s1 + $0x1278] sm:$0xff] }
 0x12a   :  { %4501 = vmatprep.subr.bf16.mxu0 %v4500_v47  ;;  %v655_v38 = vld [vmem:[%s7437_s1 + $0x1368] sm:$0xff]  ;;  %v673_v47 = vld [vmem:[%s7437_s1 + $0x13f8] sm:$0xff]  ;;  %v4518_v49 = vpack.c.bf16 %v623_v34, %v622_v43  ;;  %v690_v59 = vld [vmem:[%s7437_s1 + $0x1480] sm:$0xff]  ;;  %v4522_v63 = vpack.c.bf16 %v625_v56, %v624_v55 }
 0x12b   :  { %4531 = vmatpush3.bf16.msra.mxu1 %v4530_v46  ;;  %v672_v46 = vld [vmem:[%s7437_s1 + $0x13f0] sm:$0xff]  ;;  %v4550_v53 = vpack.c.bf16 %v655_v38, %v654_v35  ;;  %v657_v51 = vld [vmem:[%s7437_s1 + $0x1378] sm:$0xff]  ;;  %v691_v60 = vld [vmem:[%s7437_s1 + $0x1488] sm:$0xff] }
 0x12c   :  { %4533 = vmatprep.subr.bf16.mxu1 %v4532_v50  ;;  %v31_v50 = vld [vmem:[%s7436_s0 + $0x50] sm:$0xff]  ;;  %v4556_v1 = vpack.c.bf16 %v691_v60, %v690_v59  ;;  %v707_v6 = vld [vmem:[%s7437_s1 + $0x1508] sm:$0xff]  ;;  %v725_v12 = vld [vmem:[%s7437_s1 + $0x1598] sm:$0xff] }
 0x12d   :  { %4503 = vmatpush3.bf16.msra.mxu0 %v4502_v57  ;;  %v656_v57 = vld [vmem:[%s7437_s1 + $0x1370] sm:$0xff]  ;;  %v1008_v32 = vcombine.high %v31_v50, %v31_v50  ;;  %v6917_v9 = vrot.slane %v31_v50, %v4956_v10  ;;  %v677_v18 = vld [vmem:[%s7437_s1 + $0x1418] sm:$0xff]  ;;  %v694_v22 = vld [vmem:[%s7437_s1 + $0x14a0] sm:$0xff] }
 0x12e   :  { %4505 = vmatprep.subr.bf16.mxu0 %v4504_v58  ;;  %v4552_v58 = vpack.c.bf16 %v673_v47, %v672_v46  ;;  %v4554_v0 = vpack.c.bf16 %v657_v51, %v656_v57  ;;  %v692_v8 = vld [vmem:[%s7437_s1 + $0x1490] sm:$0xff]  ;;  %v695_v24 = vld [vmem:[%s7437_s1 + $0x14a8] sm:$0xff]  ;;  %v726_v28 = vld [vmem:[%s7437_s1 + $0x15a0] sm:$0xff] }
 0x12f   :  { %4535 = vmatpush3.bf16.msra.mxu1 %v4534_v41  ;;  %v724_v26 = vld [vmem:[%s7437_s1 + $0x1590] sm:$0xff]  ;;  %v6926_v13 = vrot.slane %v1008_v32, %v4956_v10  ;;  %v1023_v25 = vcombine.high %v6917_v9, %v6917_v9  ;;  %v727_v29 = vld [vmem:[%s7437_s1 + $0x15a8] sm:$0xff]  ;;  %v4564_v43 = vpack.c.bf16 %v695_v24, %v694_v22  ;;  %v710_v35 = vld [vmem:[%s7437_s1 + $0x1520] sm:$0xff] }
 0x130   :  { %4537 = vmatprep.subr.bf16.mxu1 %v4536_v61  ;;  %v722_v61 = vld [vmem:[%s7437_s1 + $0x1580] sm:$0xff]  ;;  %v708_v19 = vld [vmem:[%s7437_s1 + $0x1510] sm:$0xff]  ;;  %v4592_v20 = vpack.c.bf16 %v725_v12, %v724_v26  ;;  %v679_v34 = vld [vmem:[%s7437_s1 + $0x1428] sm:$0xff] }
 0x131   :  { %4507 = vmatpush3.bf16.msra.mxu0 %v4506_v2  ;;  %v674_v2 = vld [vmem:[%s7437_s1 + $0x1400] sm:$0xff]  ;;  %v697_v38 = vld [vmem:[%s7437_s1 + $0x14b8] sm:$0xff]  ;;  %v728_v40 = vld [vmem:[%s7437_s1 + $0x15b0] sm:$0xff] }
 0x132   :  { %4509 = vmatprep.subr.bf16.mxu0 %v4508_v4  ;;  %v706_v4 = vld [vmem:[%s7437_s1 + $0x1500] sm:$0xff]  ;;  %v729_v42 = vld [vmem:[%s7437_s1 + $0x15b8] sm:$0xff]  ;;  %v680_v47 = vld [vmem:[%s7437_s1 + $0x1430] sm:$0xff] }
 0x133   :  { %4539 = vmatpush3.bf16.msra.mxu1 %v4538_v3  ;;  %v675_v3 = vld [vmem:[%s7437_s1 + $0x1408] sm:$0xff]  ;;  %v713_v50 = vld [vmem:[%s7437_s1 + $0x1538] sm:$0xff]  ;;  %v714_v59 = vld [vmem:[%s7437_s1 + $0x1540] sm:$0xff] }
 0x134   :  { %4541 = vmatprep.subr.bf16.mxu1 %v4540_v7  ;;  %v693_v7 = vld [vmem:[%s7437_s1 + $0x1498] sm:$0xff]  ;;  %v4558_v14 = vpack.c.bf16 %v675_v3, %v674_v2  ;;  %v731_v55 = vld [vmem:[%s7437_s1 + $0x15c8] sm:$0xff]  ;;  %v702_v26 = vld [vmem:[%s7437_s1 + $0x14e0] sm:$0xff] }
 0x135   :  { %4511 = vmatpush3.bf16.msra.mxu0 %v4510_v15  ;;  %v4590_v15 = vpack.c.bf16 %v707_v6, %v706_v4  ;;  %v683_v51 = vld [vmem:[%s7437_s1 + $0x1448] sm:$0xff]  ;;  %v701_v32 = vld [vmem:[%s7437_s1 + $0x14d8] sm:$0xff]  ;;  %v684_v4 = vld [vmem:[%s7437_s1 + $0x1450] sm:$0xff] }
 0x136   :  { %4513 = vmatprep.subr.bf16.mxu0 %v4512_v17  ;;  %v676_v17 = vld [vmem:[%s7437_s1 + $0x1410] sm:$0xff]  ;;  %v703_v12 = vld [vmem:[%s7437_s1 + $0x14e8] sm:$0xff] }
 0x137   :  { %4543 = vmatpush3.bf16.msra.mxu1 %v4542_v16  ;;  %v3144_v36 = vpop.f32.mrb[4].mxu0  ;;  %v4560_v16 = vpack.c.bf16 %v693_v7, %v692_v8  ;;  %v716_v6 = vld [vmem:[%s7437_s1 + $0x1550] sm:$0xff]  ;;  %v717_v7 = vld [vmem:[%s7437_s1 + $0x1558] sm:$0xff] }
 0x138   :  { %4545 = vmatprep.subr.bf16.mxu1 %v4544_v21  ;;  %v3145_v44 = vpop.f32.mrb[5].mxu0  ;;  %v709_v21 = vld [vmem:[%s7437_s1 + $0x1518] sm:$0xff] }
 0x139   :  { %v3179_v45 = vpop.f32.mrb[4].mxu1  ;;  %v3146_v52 = vadd.f32 %v3145_v44, %v3144_v36  ;;  %4515 = vmatpush3.bf16.msra.mxu0 %v4514_v31  ;;  %v1024_v31 = vcombine.high %v6926_v13, %v6926_v13  ;;  %v4596_v36 = vpack.c.bf16 %v727_v29, %v726_v28  ;;  %v704_v28 = vld [vmem:[%s7437_s1 + $0x14f0] sm:$0xff]  ;;  %v705_v29 = vld [vmem:[%s7437_s1 + $0x14f8] sm:$0xff] }
 0x13a   :  { %v3180_v48 = vpop.f32.mrb[5].mxu1  ;;  %4517 = vmatprep.subr.bf16.mxu0 %v4516_v33  ;;  %v4594_v33 = vpack.c.bf16 %v709_v21, %v708_v19  ;;  %v686_v19 = vld [vmem:[%s7437_s1 + $0x1460] sm:$0xff] }
 0x13b   :  { %v3181_v39 = vadd.f32 %v3180_v48, %v3179_v45  ;;  %4547 = vmatpush3.bf16.msra.mxu1 %v4546_v30  ;;  %v1445_v41 = vadd.f32 %v3146_v52, %v6686_v11  ;;  %v723_v11 = vld [vmem:[%s7437_s1 + $0x1588] sm:$0xff]  ;;  %v4562_v30 = vpack.c.bf16 %v677_v18, %v676_v17  ;;  %v681_v52 = vld [vmem:[%s7437_s1 + $0x1438] sm:$0xff]  ;;  %v712_v48 = vld [vmem:[%s7437_s1 + $0x1530] sm:$0xff]  ;;  %v4610_v17 = vpack.c.bf16 %v717_v7, %v716_v6 }
 0x13c   :  { %4549 = vmatprep.subr.bf16.mxu1 %v4548_v37  ;;  %v4588_v5 = vpack.c.bf16 %v723_v11, %v722_v61  ;;  %v696_v37 = vld [vmem:[%s7437_s1 + $0x14b0] sm:$0xff]  ;;  %v4570_v56 = vpack.c.bf16 %v681_v52, %v680_v47  ;;  %v4602_v57 = vpack.c.bf16 %v713_v50, %v712_v48  ;;  %v715_v61 = vld [vmem:[%s7437_s1 + $0x1548] sm:$0xff]  ;;  %v4580_v18 = vpack.c.bf16 %v703_v12, %v702_v26  ;;  %v718_v21 = vld [vmem:[%s7437_s1 + $0x1560] sm:$0xff] }
 0x13d   :  { %v6896_v62 = vadd.f32 %v3181_v39, %v1445_v41  ;;  %4519 = vmatpush3.bf16.msra.mxu0 %v4518_v49  ;;  %v4568_v46 = vpack.c.bf16 %v697_v38, %v696_v37  ;;  %v4600_v49 = vpack.c.bf16 %v729_v42, %v728_v40  ;;  %v698_v39 = vld [vmem:[%s7437_s1 + $0x14c0] sm:$0xff]  ;;  %v700_v11 = vld [vmem:[%s7437_s1 + $0x14d0] sm:$0xff]  ;;  %v4606_v2 = vpack.c.bf16 %v715_v61, %v714_v59  ;;  %v689_v42 = vld [vmem:[%s7437_s1 + $0x1478] sm:$0xff] }
 0x13e   :  { %4521 = vmatprep.subr.bf16.mxu0 %v4520_v54  ;;  %v730_v54 = vld [vmem:[%s7437_s1 + $0x15c0] sm:$0xff]  ;;  %v4576_v3 = vpack.c.bf16 %v701_v32, %v700_v11  ;;  %v4584_v38 = vpack.c.bf16 %v705_v29, %v704_v28  ;;  %v688_v40 = vld [vmem:[%s7437_s1 + $0x1470] sm:$0xff]  ;;  %v721_v47 = vld [vmem:[%s7437_s1 + $0x1578] sm:$0xff] }
 0x13f   :  { %4551 = vmatpush3.bf16.msra.mxu1 %v4550_v53  ;;  %v699_v53 = vld [vmem:[%s7437_s1 + $0x14c8] sm:$0xff]  ;;  %v4604_v60 = vpack.c.bf16 %v731_v55, %v730_v54  ;;  %v754_v52 = vld [vmem:[%s7437_s1 + $0x1680] sm:$0xff]  ;;  %v756_v59 = vld [vmem:[%s7437_s1 + $0x1690] sm:$0xff] }
 0x140   :  { %4553 = vmatprep.subr.bf16.mxu1 %v4552_v58  ;;  %v4572_v41 = vpack.c.bf16 %v699_v53, %v698_v39  ;;  %v682_v58 = vld [vmem:[%s7437_s1 + $0x1440] sm:$0xff]  ;;  %v755_v48 = vld [vmem:[%s7437_s1 + $0x1688] sm:$0xff]  ;;  %v4586_v53 = vpack.c.bf16 %v689_v42, %v688_v40  ;;  %v788_v11 = vld [vmem:[%s7437_s1 + $0x1790] sm:$0xff] }
 0x141   :  { %4523 = vmatpush3.bf16.msra.mxu0 %v4522_v63  ;;  %v732_v63 = vld [vmem:[%s7437_s1 + $0x15d0] sm:$0xff]  ;;  %v4620_v55 = vpack.c.bf16 %v755_v48, %v754_v52  ;;  %v789_v32 = vld [vmem:[%s7437_s1 + $0x1798] sm:$0xff]  ;;  %v759_v7 = vld [vmem:[%s7437_s1 + $0x16a8] sm:$0xff] }
 0x142   :  { %4557 = vmatprep.subr.bf16.mxu0 %v4556_v1  ;;  %v4574_v1 = vpack.c.bf16 %v683_v51, %v682_v58  ;;  %v771_v51 = vld [vmem:[%s7437_s1 + $0x1708] sm:$0xff]  ;;  %v773_v6 = vld [vmem:[%s7437_s1 + $0x1718] sm:$0xff]  ;;  %v790_v12 = vld [vmem:[%s7437_s1 + $0x17a0] sm:$0xff] }
 0x143   :  { %4555 = vmatpush3.bf16.msra.mxu1 %v4554_v0  ;;  %v733_v0 = vld [vmem:[%s7437_s1 + $0x15d8] sm:$0xff]  ;;  %v779_v48 = vld [vmem:[%s7437_s1 + $0x1748] sm:$0xff] }
 0x144   :  { %4589 = vmatprep.subr.bf16.mxu1 %v4588_v5  ;;  %2423 = vmatmul.mubr.f32.vlgmr.msra.gmra.mrb[18].mxu0 %v6707_v23  ;;  %v678_v23 = vld [vmem:[%s7437_s1 + $0x1420] sm:$0xff]  ;;  %v685_v5 = vld [vmem:[%s7437_s1 + $0x1458] sm:$0xff]  ;;  %v4608_v8 = vpack.c.bf16 %v733_v0, %v732_v63 }
 0x145   :  { %4559 = vmatpush3.bf16.msra.mxu0 %v4558_v14  ;;  %2562 = vmatprep.mubr.f32.mxu0 %v1023_v25  ;;  %v4566_v44 = vpack.c.bf16 %v679_v34, %v678_v23  ;;  %v734_v14 = vld [vmem:[%s7437_s1 + $0x15e0] sm:$0xff]  ;;  %v719_v25 = vld [vmem:[%s7437_s1 + $0x1568] sm:$0xff]  ;;  %v793_v28 = vld [vmem:[%s7437_s1 + $0x17b8] sm:$0xff] }
 0x146   :  { %2493 = vmatmul.mubr.f32.vlgmr.msra.gmra.mrb[18].mxu1 %v6716_v27  ;;  %4561 = vmatprep.subr.bf16.mxu0 %v4560_v16  ;;  %v711_v27 = vld [vmem:[%s7437_s1 + $0x1528] sm:$0xff]  ;;  %v4578_v16 = vpack.c.bf16 %v685_v5, %v684_v4  ;;  %v4614_v37 = vpack.c.bf16 %v719_v25, %v718_v21  ;;  %v741_v4 = vld [vmem:[%s7437_s1 + $0x1618] sm:$0xff]  ;;  %v772_v5 = vld [vmem:[%s7437_s1 + $0x1710] sm:$0xff] }
 0x147   :  { %4591 = vmatpush3.bf16.msra.mxu1 %v4590_v15  ;;  %2632 = vmatprep.mubr.f32.mxu1 %v1024_v31  ;;  %v4598_v45 = vpack.c.bf16 %v711_v27, %v710_v35  ;;  %v735_v15 = vld [vmem:[%s7437_s1 + $0x15e8] sm:$0xff]  ;;  %v792_v25 = vld [vmem:[%s7437_s1 + $0x17b0] sm:$0xff] }
 0x148   :  { %4593 = vmatprep.subr.bf16.mxu1 %v4592_v20  ;;  %v687_v20 = vld [vmem:[%s7437_s1 + $0x1468] sm:$0xff]  ;;  %v4612_v24 = vpack.c.bf16 %v735_v15, %v734_v14 }
 0x149   :  { %4563 = vmatpush3.bf16.msra.mxu0 %v4562_v30  ;;  %v4582_v35 = vpack.c.bf16 %v687_v20, %v686_v19  ;;  %v791_v14 = vld [vmem:[%s7437_s1 + $0x17a8] sm:$0xff]  ;;  %v774_v20 = vld [vmem:[%s7437_s1 + $0x1720] sm:$0xff] }
 0x14a   :  { %4565 = vmatprep.subr.bf16.mxu0 %v4564_v43  ;;  %v737_v43 = vld [vmem:[%s7437_s1 + $0x15f8] sm:$0xff]  ;;  %v743_v19 = vld [vmem:[%s7437_s1 + $0x1628] sm:$0xff]  ;;  %v4660_v21 = vpack.c.bf16 %v791_v14, %v790_v12 }
 0x14b   :  { %4595 = vmatpush3.bf16.msra.mxu1 %v4594_v33  ;;  %v736_v33 = vld [vmem:[%s7437_s1 + $0x15f0] sm:$0xff]  ;;  %v769_v12 = vld [vmem:[%s7437_s1 + $0x16f8] sm:$0xff] }
 0x14c   :  { %4597 = vmatprep.subr.bf16.mxu1 %v4596_v36  ;;  %v32_v36 = vld [vmem:[%s7436_s0 + $0x58] sm:$0xff] }
 0x14d   :  { %4567 = vmatpush3.bf16.msra.mxu0 %v4566_v44  ;;  %v720_v44 = vld [vmem:[%s7437_s1 + $0x1570] sm:$0xff]  ;;  %v1025_v50 = vcombine.high %v32_v36, %v32_v36  ;;  %v7127_v61 = vrot.slane %v32_v36, %v4956_v10  ;;  %v762_v36 = vld [vmem:[%s7437_s1 + $0x16c0] sm:$0xff] }
 0x14e   :  { %4569 = vmatprep.subr.bf16.mxu0 %v4568_v46  ;;  %v4616_v46 = vpack.c.bf16 %v737_v43, %v736_v33  ;;  %v4618_v54 = vpack.c.bf16 %v721_v47, %v720_v44  ;;  %v744_v33 = vld [vmem:[%s7437_s1 + $0x1630] sm:$0xff]  ;;  %v745_v43 = vld [vmem:[%s7437_s1 + $0x1638] sm:$0xff]  ;;  %v778_v47 = vld [vmem:[%s7437_s1 + $0x1740] sm:$0xff] }
 0x14f   :  { %4599 = vmatpush3.bf16.msra.mxu1 %v4598_v45  ;;  %v7136_v63 = vrot.slane %v1025_v50, %v4956_v10  ;;  %v4656_v10 = vpack.c.bf16 %v789_v32, %v788_v11  ;;  %v1040_v26 = vcombine.high %v7127_v61, %v7127_v61  ;;  %v4634_v40 = vpack.c.bf16 %v745_v43, %v744_v33  ;;  %v796_v50 = vld [vmem:[%s7437_s1 + $0x17d0] sm:$0xff]  ;;  %v767_v11 = vld [vmem:[%s7437_s1 + $0x16e8] sm:$0xff]  ;;  %v798_v32 = vld [vmem:[%s7437_s1 + $0x17e0] sm:$0xff] }
 0x150   :  { %4601 = vmatprep.subr.bf16.mxu1 %v4600_v49  ;;  %v786_v49 = vld [vmem:[%s7437_s1 + $0x1780] sm:$0xff] }
 0x151   :  { %4571 = vmatpush3.bf16.msra.mxu0 %v4570_v56  ;;  %v738_v56 = vld [vmem:[%s7437_s1 + $0x1600] sm:$0xff]  ;;  %v1041_v15 = vcombine.high %v7136_v63, %v7136_v63 }
 0x152   :  { %4573 = vmatprep.subr.bf16.mxu0 %v4572_v41  ;;  %v770_v41 = vld [vmem:[%s7437_s1 + $0x1700] sm:$0xff] }
 0x153   :  { %4603 = vmatpush3.bf16.msra.mxu1 %v4602_v57  ;;  %v739_v57 = vld [vmem:[%s7437_s1 + $0x1608] sm:$0xff] }
 0x154   :  { %4605 = vmatprep.subr.bf16.mxu1 %v4604_v60  ;;  %v757_v60 = vld [vmem:[%s7437_s1 + $0x1698] sm:$0xff]  ;;  %v4622_v0 = vpack.c.bf16 %v739_v57, %v738_v56  ;;  %v748_v57 = vld [vmem:[%s7437_s1 + $0x1650] sm:$0xff] }
 0x155   :  { %4575 = vmatpush3.bf16.msra.mxu0 %v4574_v1  ;;  %v4654_v1 = vpack.c.bf16 %v771_v51, %v770_v41  ;;  %v749_v41 = vld [vmem:[%s7437_s1 + $0x1658] sm:$0xff] }
 0x156   :  { %4577 = vmatprep.subr.bf16.mxu0 %v4576_v3  ;;  %v740_v3 = vld [vmem:[%s7437_s1 + $0x1610] sm:$0xff] }
 0x157   :  { %4607 = vmatpush3.bf16.msra.mxu1 %v4606_v2  ;;  %v3214_v22 = vpop.f32.mrb[6].mxu0  ;;  %v4624_v2 = vpack.c.bf16 %v757_v60, %v756_v59  ;;  %v781_v59 = vld [vmem:[%s7437_s1 + $0x1758] sm:$0xff]  ;;  %v766_v60 = vld [vmem:[%s7437_s1 + $0x16e0] sm:$0xff] }
 0x158   :  { %4609 = vmatprep.subr.bf16.mxu1 %v4608_v8  ;;  %v3215_v31 = vpop.f32.mrb[7].mxu0  ;;  %v758_v8 = vld [vmem:[%s7437_s1 + $0x16a0] sm:$0xff] }
 0x159   :  { %v3249_v30 = vpop.f32.mrb[6].mxu1  ;;  %v3216_v23 = vadd.f32 %v3215_v31, %v3214_v22  ;;  %4579 = vmatpush3.bf16.msra.mxu0 %v4578_v16  ;;  %v4626_v16 = vpack.c.bf16 %v741_v4, %v740_v3  ;;  %v760_v22 = vld [vmem:[%s7437_s1 + $0x16b0] sm:$0xff]  ;;  %v4644_v3 = vpack.c.bf16 %v767_v11, %v766_v60  ;;  %v750_v4 = vld [vmem:[%s7437_s1 + $0x1660] sm:$0xff]  ;;  %v817_v60 = vld [vmem:[%s7437_s1 + $0x1878] sm:$0xff] }
 0x15a   :  { %v3250_v34 = vpop.f32.mrb[7].mxu1  ;;  %4581 = vmatprep.subr.bf16.mxu0 %v4580_v18  ;;  %v4628_v18 = vpack.c.bf16 %v759_v7, %v758_v8  ;;  %v783_v7 = vld [vmem:[%s7437_s1 + $0x1768] sm:$0xff] }
 0x15b   :  { %v3251_v27 = vadd.f32 %v3250_v34, %v3249_v30  ;;  %4611 = vmatpush3.bf16.msra.mxu1 %v4610_v17  ;;  %v1585_v45 = vadd.f32 %v3216_v23, %v6896_v62  ;;  %v787_v62 = vld [vmem:[%s7437_s1 + $0x1788] sm:$0xff]  ;;  %v4658_v17 = vpack.c.bf16 %v773_v6, %v772_v5  ;;  %v776_v23 = vld [vmem:[%s7437_s1 + $0x1730] sm:$0xff]  ;;  %v4664_v34 = vpack.c.bf16 %v793_v28, %v792_v25 }
 0x15c   :  { %4613 = vmatprep.subr.bf16.mxu1 %v4612_v24  ;;  %v4652_v58 = vpack.c.bf16 %v787_v62, %v786_v49  ;;  %v761_v24 = vld [vmem:[%s7437_s1 + $0x16b8] sm:$0xff]  ;;  %v764_v49 = vld [vmem:[%s7437_s1 + $0x16d0] sm:$0xff]  ;;  %v751_v5 = vld [vmem:[%s7437_s1 + $0x1668] sm:$0xff] }
 0x15d   :  { %v7106_v39 = vadd.f32 %v3251_v27, %v1585_v45  ;;  %4583 = vmatpush3.bf16.msra.mxu0 %v4582_v35  ;;  %v4632_v30 = vpack.c.bf16 %v761_v24, %v760_v22  ;;  %v777_v35 = vld [vmem:[%s7437_s1 + $0x1738] sm:$0xff]  ;;  %v763_v27 = vld [vmem:[%s7437_s1 + $0x16c8] sm:$0xff]  ;;  %v746_v45 = vld [vmem:[%s7437_s1 + $0x1640] sm:$0xff] }
 0x15e   :  { %4585 = vmatprep.subr.bf16.mxu0 %v4584_v38  ;;  %v795_v38 = vld [vmem:[%s7437_s1 + $0x17c8] sm:$0xff]  ;;  %v4666_v42 = vpack.c.bf16 %v777_v35, %v776_v23  ;;  %v4636_v44 = vpack.c.bf16 %v763_v27, %v762_v36  ;;  %v765_v62 = vld [vmem:[%s7437_s1 + $0x16d8] sm:$0xff]  ;;  %v752_v22 = vld [vmem:[%s7437_s1 + $0x1670] sm:$0xff]  ;;  %v4778_v35 = vmov 0.0|0.0  }
 0x15f   :  { %4615 = vmatpush3.bf16.msra.mxu1 %v4614_v37  ;;  %v794_v37 = vld [vmem:[%s7437_s1 + $0x17c0] sm:$0xff]  ;;  %v4640_v56 = vpack.c.bf16 %v765_v62, %v764_v49  ;;  %v753_v24 = vld [vmem:[%s7437_s1 + $0x1678] sm:$0xff]  ;;  %v803_v23 = vld [vmem:[%s7437_s1 + $0x1808] sm:$0xff] }
 0x160   :  { %4617 = vmatprep.subr.bf16.mxu1 %v4616_v46  ;;  %v747_v46 = vld [vmem:[%s7437_s1 + $0x1648] sm:$0xff]  ;;  %v4668_v52 = vpack.c.bf16 %v795_v38, %v794_v37  ;;  %v4650_v33 = vpack.c.bf16 %v753_v24, %v752_v22  ;;  %v804_v36 = vld [vmem:[%s7437_s1 + $0x1810] sm:$0xff]  ;;  %v805_v27 = vld [vmem:[%s7437_s1 + $0x1818] sm:$0xff] }
 0x161   :  { %4587 = vmatpush3.bf16.msra.mxu0 %v4586_v53  ;;  %v797_v53 = vld [vmem:[%s7437_s1 + $0x17d8] sm:$0xff]  ;;  %v4688_v37 = vpack.c.bf16 %v805_v27, %v804_v36  ;;  %v806_v38 = vld [vmem:[%s7437_s1 + $0x1820] sm:$0xff] }
 0x162   :  { %4621 = vmatprep.subr.bf16.mxu0 %v4620_v55  ;;  %v4670_v55 = vpack.c.bf16 %v779_v48, %v778_v47  ;;  %v4672_v51 = vpack.c.bf16 %v797_v53, %v796_v50  ;;  %v811_v47 = vld [vmem:[%s7437_s1 + $0x1848] sm:$0xff]  ;;  %v812_v48 = vld [vmem:[%s7437_s1 + $0x1850] sm:$0xff]  ;;  %v813_v49 = vld [vmem:[%s7437_s1 + $0x1858] sm:$0xff] }
 0x163   :  { %4619 = vmatpush3.bf16.msra.mxu1 %v4618_v54  ;;  %v4638_v54 = vpack.c.bf16 %v747_v46, %v746_v45  ;;  %v810_v46 = vld [vmem:[%s7437_s1 + $0x1840] sm:$0xff]  ;;  %v4700_v62 = vpack.c.bf16 %v813_v49, %v812_v48  ;;  %v815_v53 = vld [vmem:[%s7437_s1 + $0x1868] sm:$0xff]  ;;  %v2859_v36 = vld [vmem:[%s7439_s3 + $0x58] sm:$0xff] }
 0x164   :  { %4653 = vmatprep.subr.bf16.mxu1 %v4652_v58  ;;  %2563 = vmatmul.mubr.f32.vlgmr.msra.gmra.mrb[20].mxu0 %v6917_v9  ;;  %v742_v9 = vld [vmem:[%s7437_s1 + $0x1620] sm:$0xff]  ;;  %v780_v58 = vld [vmem:[%s7437_s1 + $0x1750] sm:$0xff] }
 0x165   :  { %4623 = vmatpush3.bf16.msra.mxu0 %v4622_v0  ;;  %2702 = vmatprep.mubr.f32.mxu0 %v1040_v26  ;;  %v4630_v29 = vpack.c.bf16 %v743_v19, %v742_v9  ;;  %v799_v0 = vld [vmem:[%s7437_s1 + $0x17e8] sm:$0xff]  ;;  %v768_v26 = vld [vmem:[%s7437_s1 + $0x16f0] sm:$0xff]  ;;  %v4646_v19 = vpack.c.bf16 %v751_v5, %v750_v4  ;;  %v814_v50 = vld [vmem:[%s7437_s1 + $0x1860] sm:$0xff] }
 0x166   :  { %2633 = vmatmul.mubr.f32.vlgmr.msra.gmra.mrb[20].mxu1 %v6926_v13  ;;  %4625 = vmatprep.subr.bf16.mxu0 %v4624_v2  ;;  %v775_v13 = vld [vmem:[%s7437_s1 + $0x1728] sm:$0xff]  ;;  %v4674_v2 = vpack.c.bf16 %v781_v59, %v780_v58  ;;  %v4676_v8 = vpack.c.bf16 %v799_v0, %v798_v32  ;;  %v4703_v58 = vpack.c.bf16 %v815_v53, %v814_v50  ;;  %v816_v59 = vld [vmem:[%s7437_s1 + $0x1870] sm:$0xff]  ;;  %v2852_v24 = vld [vmem:[%s7439_s3 + $0x20] sm:$0xff] }
 0x167   :  { %4655 = vmatpush3.bf16.msra.mxu1 %v4654_v1  ;;  %2772 = vmatprep.mubr.f32.mxu1 %v1041_v15  ;;  %v4662_v31 = vpack.c.bf16 %v775_v13, %v774_v20  ;;  %v4642_v1 = vpack.c.bf16 %v749_v41, %v748_v57  ;;  %v4648_v13 = vpack.c.bf16 %v769_v12, %v768_v26 }
 0x168   :  { %4657 = vmatprep.subr.bf16.mxu1 %v4656_v10  ;;  %v782_v10 = vld [vmem:[%s7437_s1 + $0x1760] sm:$0xff]  ;;  %v4706_v0 = vpack.c.bf16 %v817_v60, %v816_v59 }
 0x169   :  { %4627 = vmatpush3.bf16.msra.mxu0 %v4626_v16  ;;  %v800_v16 = vld [vmem:[%s7437_s1 + $0x17f0] sm:$0xff] }
 0x16a   :  { %4629 = vmatprep.subr.bf16.mxu0 %v4628_v18 }
 0x16b   :  { %4659 = vmatpush3.bf16.msra.mxu1 %v4658_v17  ;;  %v801_v17 = vld [vmem:[%s7437_s1 + $0x17f8] sm:$0xff] }
 0x16c   :  { %4661 = vmatprep.subr.bf16.mxu1 %v4660_v21  ;;  %v4678_v21 = vpack.c.bf16 %v783_v7, %v782_v10  ;;  %v4680_v28 = vpack.c.bf16 %v801_v17, %v800_v16  ;;  %v2849_v16 = vld [vmem:[%s7439_s3 + $0x8] sm:$0xff] }
 0x16d   :  { %4631 = vmatpush3.bf16.msra.mxu0 %v4630_v29  ;;  %v784_v29 = vld [vmem:[%s7437_s1 + $0x1770] sm:$0xff] }
 0x16e   :  { %4633 = vmatprep.subr.bf16.mxu0 %v4632_v30 }
 0x16f   :  { %4663 = vmatpush3.bf16.msra.mxu1 %v4662_v31  ;;  %v785_v31 = vld [vmem:[%s7437_s1 + $0x1778] sm:$0xff] }
 0x170   :  { %4665 = vmatprep.subr.bf16.mxu1 %v4664_v34  ;;  %v4682_v43 = vpack.c.bf16 %v785_v31, %v784_v29  ;;  %v2854_v31 = vld [vmem:[%s7439_s3 + $0x30] sm:$0xff] }
 0x171   :  { %4635 = vmatpush3.bf16.msra.mxu0 %v4634_v40  ;;  %v807_v40 = vld [vmem:[%s7437_s1 + $0x1828] sm:$0xff] }
 0x172   :  { %4637 = vmatprep.subr.bf16.mxu0 %v4636_v44  ;;  %v809_v44 = vld [vmem:[%s7437_s1 + $0x1838] sm:$0xff] }
 0x173   :  { %4667 = vmatpush3.bf16.msra.mxu1 %v4666_v42  ;;  %v4780_v42 = vmov 0.0  }
 0x174   :  { %4669 = vmatprep.subr.bf16.mxu1 %v4668_v52  ;;  %v4697_v52 = vpack.c.bf16 %v811_v47, %v810_v46 }
 0x175   :  { %4639 = vmatpush3.bf16.msra.mxu0 %v4638_v54 }
 0x176   :  { %4641 = vmatprep.subr.bf16.mxu0 %v4640_v56 }
 0x177   :  { %4671 = vmatpush3.bf16.msra.mxu1 %v4670_v55  ;;  %v3284_v6 = vpop.f32.mrb[8].mxu0 }
 0x178   :  { %4673 = vmatprep.subr.bf16.mxu1 %v4672_v51  ;;  %v3285_v14 = vpop.f32.mrb[9].mxu0 }
 0x179   :  { %v3319_v15 = vpop.f32.mrb[8].mxu1  ;;  %v3286_v18 = vadd.f32 %v3285_v14, %v3284_v6  ;;  %4643 = vmatpush3.bf16.msra.mxu0 %v4642_v1  ;;  %v2970_v1 = vld.sshfl [vmem:[%s7436_s0 + $0x60] sm:$0x3 pattern:$0x76325410] }
 0x17a   :  { %v3320_v9 = vpop.f32.mrb[9].mxu1  ;;  %4645 = vmatprep.subr.bf16.mxu0 %v4644_v3 }
 0x17b   :  { %v3321_v20 = vadd.f32 %v3320_v9, %v3319_v15  ;;  %4675 = vmatpush3.bf16.msra.mxu1 %v4674_v2  ;;  %v1725_v25 = vadd.f32 %v3286_v18, %v7106_v39  ;;  %v802_v39 = vld [vmem:[%s7437_s1 + $0x1800] sm:$0xff] }
 0x17c   :  { %4677 = vmatprep.subr.bf16.mxu1 %v4676_v8  ;;  %v4685_v34 = vpack.c.bf16 %v803_v23, %v802_v39  ;;  %v2848_v15 = vld [vmem:[%s7439_s3] sm:$0xff]  ;;  %v2857_v39 = vld [vmem:[%s7439_s3 + $0x48] sm:$0xff] }
 0x17d   :  { %v1795_v30 = vadd.f32 %v3321_v20, %v1725_v25  ;;  %4647 = vmatpush3.bf16.msra.mxu0 %v4646_v19  ;;  %v4709_v9 = vpack.c.bf16 %v2849_v16, %v2848_v15  ;;  %v2853_v25 = vld [vmem:[%s7439_s3 + $0x28] sm:$0xff]  ;;  %v2971_v15 = vld [vmem:[%s7440_s4] ss:$0 sm:$0xff]  ;;  %s2961_s4 = sshll.u32 %s4781_s20, 4  ;;  %s2962_s4 = int_to_ptr.vmem [resolvable:$true] %s2961_s4 }
 0x17e   :  { %4649 = vmatprep.subr.bf16.mxu0 %v4648_v13  ;;  %v2851_v13 = vld [vmem:[%s7439_s3 + $0x18] sm:$0xff]  ;;  %v4715_v29 = vpack.c.bf16 %v2853_v25, %v2852_v24  ;;  %s4753_s21 = scalar_lea.vmem %s2962_s4, 32  ;;  %p4758_p1 = scmp.lt.s32.totalorder %s2962_s4, %s2962_s4 }
 0x17f   :  { %4679 = vmatpush3.bf16.msra.mxu1 %v4678_v21  ;;  %v2850_v21 = vld [vmem:[%s7439_s3 + $0x10] sm:$0xff]  ;;  %p4754_p0 = scmp.ne.s32.totalorder %s2962_s4, %s4753_s21  ;;  %p4759_p2 = scmp.lt.s32.totalorder %s4753_s21, %s4753_s21 }
 0x180   :  { %4681 = vmatprep.subr.bf16.mxu1 %v4680_v28  ;;  %v4712_v22 = vpack.c.bf16 %v2851_v13, %v2850_v21 }
 0x181   :  { %4651 = vmatpush3.bf16.msra.mxu0 %v4650_v33  ;;  %p4760_p3 = por %p4759_p2, %p4758_p1 }
 0x182   :  { %4684 = vmatprep.subr.bf16.mxu0 %v4778_v35 }
 0x183   :  { %4683 = vmatpush3.bf16.msra.mxu1 %v4682_v43  ;;  %v2856_v43 = vld [vmem:[%s7439_s3 + $0x40] sm:$0xff]  ;;  %p4761_p4 = pnand %p4760_p3, %p4754_p0 }
 0x184   :  { %4708 = vmatprep.subr.bf16.mxu1 %v4778_v35  ;;  %2703 = vmatmul.mubr.f32.vlgmr.msra.gmra.mrb[22].mxu0 %v7127_v61  ;;  %v4691_v61 = vpack.c.bf16 %v807_v40, %v806_v38  ;;  %v4721_v23 = vpack.c.bf16 %v2857_v39, %v2856_v43  ;;  %v2861_v38 = vld [vmem:[%s7439_s3 + $0x68] sm:$0xff] }
 0x185   :  { %4686 = vmatpush3.bf16.msra.mxu0 %v4685_v34  ;;  %3878 = vmatprep.mubr.msk.f32.mxu0 %vm4779_vm0, %v4780_v42  ;;  %v2858_v34 = vld [vmem:[%s7439_s3 + $0x50] sm:$0xff] }
 0x186   :  { %2773 = vmatmul.mubr.f32.vlgmr.msra.gmra.mrb[22].mxu1 %v7136_v63  ;;  %4687 = vmatprep.subr.bf16.mxu0 %v4778_v35  ;;  %v808_v63 = vld [vmem:[%s7437_s1 + $0x1830] sm:$0xff]  ;;  %v4724_v27 = vpack.c.bf16 %v2859_v36, %v2858_v34 }
 0x187   :  { %3913 = vmatprep.mubr.msk.f32.mxu1 %vm4779_vm0, %v4780_v42  ;;  %v4694_v45 = vpack.c.bf16 %v809_v44, %v808_v63  ;;  %4710 = vmatpush3.bf16.msra.mxu1 %v4709_v9  ;;  %v2862_v42 = vld [vmem:[%s7439_s3 + $0x70] sm:$0xff] }
 0x188   :  { %4711 = vmatprep.subr.bf16.mxu1 %v4778_v35 }
 0x189   :  { %4689 = vmatpush3.bf16.msra.mxu0 %v4688_v37  ;;  %v2860_v37 = vld [vmem:[%s7439_s3 + $0x60] sm:$0xff] }
 0x18a   :  { %4690 = vmatprep.subr.bf16.mxu0 %v4778_v35  ;;  %v4727_v40 = vpack.c.bf16 %v2861_v38, %v2860_v37 }
 0x18b   :  { %4713 = vmatpush3.bf16.msra.mxu1 %v4712_v22 }
 0x18c   :  { %4714 = vmatprep.subr.bf16.mxu1 %v4778_v35 }
 0x18d   :  { %4692 = vmatpush3.bf16.msra.mxu0 %v4691_v61  ;;  %v2863_v61 = vld [vmem:[%s7439_s3 + $0x78] sm:$0xff] }
 0x18e   :  { %4693 = vmatprep.subr.bf16.mxu0 %v4778_v35  ;;  %v4730_v63 = vpack.c.bf16 %v2863_v61, %v2862_v42 }
 0x18f   :  { %4716 = vmatpush3.bf16.msra.mxu1 %v4715_v29 }
 0x190   :  { %4717 = vmatprep.subr.bf16.mxu1 %v4778_v35 }
 0x191   :  { %4695 = vmatpush3.bf16.msra.mxu0 %v4694_v45 }
 0x192   :  { %4696 = vmatprep.subr.bf16.mxu0 %v4778_v35 }
 0x195   :  { %4698 = vmatpush3.bf16.msra.mxu0 %v4697_v52 }
 0x196   :  { %4699 = vmatprep.subr.bf16.mxu0 %v4778_v35 }
 0x197   :  { %v3354_v54 = vpop.f32.mrb[10].mxu0 }
 0x198   :  { %v3355_v55 = vpop.f32.mrb[11].mxu0 }
 0x199   :  { %v3389_v56 = vpop.f32.mrb[10].mxu1  ;;  %v3356_v57 = vadd.f32 %v3355_v55, %v3354_v54  ;;  %4701 = vmatpush3.bf16.msra.mxu0 %v4700_v62 }
 0x19a   :  { %v3390_v41 = vpop.f32.mrb[11].mxu1  ;;  %4702 = vmatprep.subr.bf16.mxu0 %v4778_v35 }
 0x19b   :  { %v3391_v51 = vadd.f32 %v3390_v41, %v3389_v56  ;;  %v1865_v11 = vadd.f32 %v3356_v57, %v1795_v30  ;;  %v2855_v30 = vld [vmem:[%s7439_s3 + $0x38] sm:$0xff] }
 0x19c   :  { %v4718_v33 = vpack.c.bf16 %v2855_v30, %v2854_v31 }
 0x19d   :  { %v1935_v32 = vadd.f32 %v3391_v51, %v1865_v11  ;;  %4704 = vmatpush3.bf16.msra.mxu0 %v4703_v58 }
 0x19e   :  { %4705 = vmatprep.subr.bf16.mxu0 %v4778_v35  ;;  %4719 = vmatpush3.bf16.msra.mxu1 %v4718_v33 }
 0x19f   :  { %4720 = vmatprep.subr.bf16.mxu1 %v4778_v35 }
 0x1a1   :  { %4707 = vmatpush3.bf16.msra.mxu0 %v4706_v0 }
 0x1a2   :  { %4722 = vmatpush3.bf16.msra.mxu1 %v4721_v23 }
 0x1a3   :  { %4723 = vmatprep.subr.bf16.mxu1 %v4778_v35 }
 0x1a4   :  { %3879 = vmatmul.mubr.f32.vlgmr.msra.gmra.mrb[24].mxu0 %v2970_v1 }
 0x1a6   :  { %4725 = vmatpush3.bf16.msra.mxu1 %v4724_v27 }
 0x1a7   :  { %4726 = vmatprep.subr.bf16.mxu1 %v4778_v35 }
 0x1aa   :  { %4728 = vmatpush3.bf16.msra.mxu1 %v4727_v40 }
 0x1ab   :  { %4729 = vmatprep.subr.bf16.mxu1 %v4778_v35 }
 0x1ae   :  { %4731 = vmatpush3.bf16.msra.mxu1 %v4730_v63 }
 0x1b7   :  { %v3424_v2 = vpop.f32.mrb[12].mxu0 }
 0x1b8   :  { %v3425_v3 = vpop.f32.mrb[13].mxu0 }
 0x1b9   :  { %v3459_v4 = vpop.f32.mrb[12].mxu1  ;;  %v3426_v5 = vadd.f32 %v3425_v3, %v3424_v2 }
 0x1ba   :  { %v3460_v10 = vpop.f32.mrb[13].mxu1 }
 0x1bb   :  { %v3461_v6 = vadd.f32 %v3460_v10, %v3459_v4  ;;  %v2005_v8 = vadd.f32 %v3426_v5, %v1935_v32 }
 0x1bd   :  { %v2075_v7 = vadd.f32 %v3461_v6, %v2005_v8 }
 0x1d7   :  { %v3494_v26 = vpop.f32.mrb[14].mxu0 }
 0x1d8   :  { %v3495_v12 = vpop.f32.mrb[15].mxu0 }
 0x1d9   :  { %v3529_v14 = vpop.f32.mrb[14].mxu1  ;;  %v3496_v17 = vadd.f32 %v3495_v12, %v3494_v26 }
 0x1da   :  { %v3530_v18 = vpop.f32.mrb[15].mxu1 }
 0x1db   :  { %v3531_v19 = vadd.f32 %v3530_v18, %v3529_v14  ;;  %v2145_v20 = vadd.f32 %v3496_v17, %v2075_v7 }
 0x1dd   :  { %v2215_v28 = vadd.f32 %v3531_v19, %v2145_v20 }
 0x1f7   :  { %v3564_v44 = vpop.f32.mrb[16].mxu0 }
 0x1f8   :  { %v3565_v45 = vpop.f32.mrb[17].mxu0 }
 0x1f9   :  { %v3599_v46 = vpop.f32.mrb[16].mxu1  ;;  %v3566_v47 = vadd.f32 %v3565_v45, %v3564_v44 }
 0x1fa   :  { %v3600_v52 = vpop.f32.mrb[17].mxu1 }
 0x1fb   :  { %v3601_v48 = vadd.f32 %v3600_v52, %v3599_v46  ;;  %v2285_v49 = vadd.f32 %v3566_v47, %v2215_v28 }
 0x1fd   :  { %v2355_v62 = vadd.f32 %v3601_v48, %v2285_v49 }
 0x217   :  { %v3634_v50 = vpop.f32.mrb[18].mxu0 }
 0x218   :  { %v3635_v35 = vpop.f32.mrb[19].mxu0 }
 0x219   :  { %v3669_v53 = vpop.f32.mrb[18].mxu1  ;;  %v3636_v54 = vadd.f32 %v3635_v35, %v3634_v50 }
 0x21a   :  { %v3670_v55 = vpop.f32.mrb[19].mxu1 }
 0x21b   :  { %v3671_v56 = vadd.f32 %v3670_v55, %v3669_v53  ;;  %v2425_v57 = vadd.f32 %v3636_v54, %v2355_v62 }
 0x21d   :  { %v2495_v41 = vadd.f32 %v3671_v56, %v2425_v57 }
 0x237   :  { %v3704_v58 = vpop.f32.mrb[20].mxu0 }
 0x238   :  { %v3705_v51 = vpop.f32.mrb[21].mxu0 }
 0x239   :  { %v3739_v59 = vpop.f32.mrb[20].mxu1  ;;  %v3706_v60 = vadd.f32 %v3705_v51, %v3704_v58 }
 0x23a   :  { %v3740_v11 = vpop.f32.mrb[21].mxu1 }
 0x23b   :  { %v3741_v32 = vadd.f32 %v3740_v11, %v3739_v59  ;;  %v2565_v0 = vadd.f32 %v3706_v60, %v2495_v41 }
 0x23d   :  { %v2635_v1 = vadd.f32 %v3741_v32, %v2565_v0 }
 0x257   :  { %v3774_v2 = vpop.f32.mrb[22].mxu0 }
 0x258   :  { %v3775_v3 = vpop.f32.mrb[23].mxu0 }
 0x259   :  { %v3809_v4 = vpop.f32.mrb[22].mxu1  ;;  %v3776_v5 = vadd.f32 %v3775_v3, %v3774_v2 }
 0x25a   :  { %v3810_v10 = vpop.f32.mrb[23].mxu1 }
 0x25b   :  { %v3811_v6 = vadd.f32 %v3810_v10, %v3809_v4  ;;  %v2705_v8 = vadd.f32 %v3776_v5, %v2635_v1 }
 0x25d   :  { %v2775_v7 = vadd.f32 %v3811_v6, %v2705_v8 }
 0x277   :  { %v2844_v26 = vpop.f32.mrb[24].mxu0 }
 0x278   :  { %v2845_v12 = vadd.f32 %v2844_v26, %v2775_v7  ;;  %v3880_v14 = vpop.f32.mrb[25].mxu0 }
 0x27a   :  { %3914 = vmatmul.mubr.f32.vlgmr.msra.gmra.mrb[24].mxu1 %v2845_v12 }
 0x34d   :  { %v2937_v16 = vpop.f32.mrb[24].mxu1 }
 0x34e   :  { %v2938_v17 = vadd.f32 %v2971_v15, %v2937_v16  ;;  %v3915_v18 = vpop.f32.mrb[25].mxu1 }
 0x350   :  { %v2942_v9 = vsel %vm2941_vm1, %v2938_v17, -inf }
 0x351   :  { %2943 = vmax.xlane.f32.xlu0 %v2942_v9 }
 0x3de   :  { %v2944_v19 = vpop.xlane.xlu0 %2943 }
 0x3df   :  { %v2945_v20 = vsub.f32 %v2938_v17, %v2944_v19 }
 0x3e1   :  { %v2946_v21 = vmul.f32 1.442695, %v2945_v20 }
 0x3e3   :  { %4749 = vpow2.f32 %v2946_v21 }
 0x3ed   :  { %v4750_v13 = vpop.eup %4749 }
 0x3ee   :  { %v2948_v22 = vsel %vm2941_vm1, %v4750_v13, 0.0 }
 0x3ef   :  { %2949 = vadd.xlane.f32.xlu0 %v2948_v22 }
 0x47c   :  { %v2950_v24 = vpop.xlane.xlu0 %2949 }
 0x47d   :  { %4751 = vlog2.f32 %v2950_v24 }
 0x487   :  { %v4752_v25 = vpop.eup %4751 }
 0x488   :  { %v2952_v28 = vmul.f32 0.6931472, %v4752_v25 }
 0x48a   :  { %v2953_v29 = vsub.f32 %v2945_v20, %v2952_v28 }
 0x48c   :  { %2954 = vst.msk [vmem:[#allocation2] sm:$0x3] %vm2941_vm1, %v2953_v29 }
 0x48d   :  { %4764 = shalt.err (!%p4761_p4)
}
 0x48e   :  { %s4765_s24 = scalar_lea.hbm %s7441_s5, 32 }
 0x48f   :  { %p4766_p5 = scmp.ne.s32.totalorder %s7441_s5, %s4765_s24  ;;  %p4769_p6 = scmp.lt.u32.totalorder %s4765_s24, %s7441_s5 }
 0x491   :  { %p4771_p7 = pnand %p4769_p6, %p4766_p5 }
 0x493   :  { %4774 = shalt.err (!%p4771_p7)
}
 0x494   :  { %2964 = dma.vmem_to_hbm [thread:$0]  %s2962_s4, 32, %s7441_s5, [#allocation3]  }
 0x495   :  { %4775 = dma.done.wait [#allocation3], 32  }
 0x496   :  { %4776 = vsyncadd [#allocation3], 4294967264 }
 0x497   :  { %2968 = vsyncpa [#allocation3], 1 }

</bundles_post_ra>
